<compile_context>
chip_gen: v7x
topology: tpu7x:2x2x1
jax: 0.10.0
libtpu: 0.0.40
codegen_flags: <defaults>
</compile_context>

<pallas_src>
import functools

import jax
import jax.numpy as jnp
from jax.experimental import pallas as pl
from jax.experimental.pallas import tpu as pltpu

N_NODES = 16
NUM_FEATURES = 16
HIDDEN = 32          # hidden_channels (small synthetic setting)
NUM_HEADS = 4
TOP_K = 5
BATCH = 2            # independent graphs, grid-parallel
LANES = 128


# ----------------------------------------------------------------------------
# Fused kernel: the whole RFGCN forward for ONE graph, VMEM-resident.
# ----------------------------------------------------------------------------
def _fused_rfgcn_kernel(x_ref, slab_ref, out_ref, *, layout, num_heads, top_k,
                        hidden):
    f32 = jnp.float32
    x = x_ref[...]
    n = x.shape[0]
    h2, h4 = hidden // 2, hidden // 4

    def r(name):                                # static slice of the param slab
        off, rows, cols = layout[name]
        return slab_ref[off:off + rows, 0:cols]

    def dot(a, b):
        return jnp.dot(a, b, preferred_element_type=f32)

    relu = lambda v: jnp.maximum(v, 0.0)

    def linear(xin, name):
        return dot(xin, r(name + "_w")) + r(name + "_b")

    def layer_norm(y, name):
        mu = jnp.mean(y, axis=-1, keepdims=True)
        var = jnp.mean((y - mu) * (y - mu), axis=-1, keepdims=True)
        return (y - mu) * jax.lax.rsqrt(var + 1e-5) * r(name + "_g") + r(name + "_beta")

    # ---- build_dynamic_graph: feature_proj + MHA attention weights ---------
    xp = dot(x, r("proj_w")) + r("proj_b")
    qk = dot(xp, r("wqk")) + r("bqk")                  # merged (Wq|Wk) matmul
    e_dim = qk.shape[-1] // 2
    hd = e_dim // num_heads
    q = qk[:, :e_dim]
    kT = qk[:, e_dim:].T                               # ONE transpose for all heads
    scale = 1.0 / float(hd) ** 0.5

    # per-head score tiles stacked along sublanes -> single softmax pass
    s_heads = [dot(q[:, h * hd:(h + 1) * hd], kT[h * hd:(h + 1) * hd, :])
               for h in range(num_heads)]
    s_all = jnp.concatenate(s_heads, axis=0) * scale   # (num_heads*n, n)
    s_all = s_all - jnp.max(s_all, axis=-1, keepdims=True)
    e_all = jnp.exp(s_all)
    # EXACT division: this softmax feeds discrete top-k edge selection.
    # 1/num_heads head-average folded into the denominator.
    p_all = e_all / (jnp.sum(e_all, axis=-1, keepdims=True) * float(num_heads))
    attn = p_all[0:n]
    for h in range(1, num_heads):
        attn = attn + p_all[h * n:(h + 1) * n]         # head-averaged weights

    # ---- in-kernel top-k (k=5) adjacency ------------------------------------
    col = jax.lax.broadcasted_iota(jnp.int32, (n, n), 1)
    row = jax.lax.broadcasted_iota(jnp.int32, (n, n), 0)
    # de-tie up front so each iteration needs only one cross-lane max
    work = attn - col.astype(f32) * 1e-7
    sel = jnp.zeros((n, n), f32)                       # sel[src, dst]
    for _ in range(top_k):
        row_max = jnp.max(work, axis=1, keepdims=True)
        hit = work >= row_max
        sel = jnp.where(hit, 1.0, sel)
        work = jnp.where(hit, f32(-1e30), work)
    adj = jnp.maximum(sel.T, (row == col).astype(f32))  # adj[dst, src] + self loops

    # Symmetric GCN normalization (PyG gcn_norm on the directed graph: both
    # factors use in-degrees, i.e. row sums of adj[dst, src]).
    deg = jnp.sum(adj, axis=1, keepdims=True)          # >= 1 (self loops)
    dis = jax.lax.rsqrt(deg)
    a_norm = adj * dis * dis.T
    # additive attention mask, hoisted once for all 3 GAT layers
    mask_neg = jnp.where(adj > 0.0, 0.0, f32(-1e30))

    # ---- GAT backbone (BN folded into w/b; att compensated; eval dropout=id)
    def gat(xin, name):
        xw = dot(xin, r(name + "_w"))
        av = dot(xw, r(name + "_attT"))                # (n, 2): [:,0]=src, [:,1]=dst
        e = av[:, 1:2] + av[:, 0:1].T                  # e[dst, src]
        e = jnp.where(e >= 0.0, e, 0.2 * e)            # LeakyReLU(0.2)
        e = e + mask_neg
        e = e - jnp.max(e, axis=1, keepdims=True)
        pe = jnp.exp(e)                                # masked entries underflow to 0
        pe = pe * pl.reciprocal(jnp.sum(pe, axis=1, keepdims=True), approx=True)
        return dot(pe, xw) + r(name + "_b")

    h = relu(gat(x, "gat1"))
    h = relu(gat(h, "gat2") + h)
    h = relu(gat(h, "gat3") + h)

    def gcn(xin, name):                                # BN already folded
        return dot(a_norm, dot(xin, r(name + "_w"))) + r(name + "_b")

    # rssi_conv1 | cqi_conv1 share input h  -> one merged wide GCN matmul
    g1 = relu(gcn(h, "g1"))                            # (n, 2*hidden)
    # rssi_conv2 | cqi_conv2 merged via block-diagonal weight -> one a_norm agg
    g2 = relu(gcn(g1, "g2"))                           # (n, hidden)
    rssi2 = g2[:, :h2]
    cqi2 = g2[:, h2:]

    # ---- RSSI head -----------------------------------------------------------
    logits = dot(rssi2, r("rssi_att_w")) + r("rssi_att_b")      # (n, 1)
    logits = logits - jnp.max(logits, axis=0, keepdims=True)
    pw = jnp.exp(logits)
    pw = pw * pl.reciprocal(jnp.sum(pw, axis=0, keepdims=True), approx=True)
    rs = rssi2 * pw                                    # apply_attention (dim=0 softmax)
    rs = relu(layer_norm(linear(rs, "rp1"), "rp1"))
    rs = relu(layer_norm(linear(rs, "rp2"), "rp2"))
    rssi_out = linear(rs, "rp3")                       # (n, 1)

    # ---- CQI head ------------------------------------------------------------
    # ca1 | sa1 share input cqi2 -> one merged matmul, split lanes before LN
    casa = dot(cqi2, r("casa_w")) + r("casa_b")        # (n, h2 + h4)
    cw = relu(layer_norm(casa[:, :h2], "ca1"))
    cw = jax.nn.sigmoid(layer_norm(linear(cw, "ca2"), "ca2"))
    channel_out = cqi2 * cw * 1.1
    sw = relu(layer_norm(casa[:, h2:h2 + h4], "sa1"))
    sw = relu(layer_norm(linear(sw, "sa2"), "sa2"))
    sw = jax.nn.sigmoid(linear(sw, "sa3"))             # (n, 1)
    spatial_out = cqi2 * sw * 0.9
    # cat([channel_out, spatial_out]) @ ff1_w  ==  split-weight form (no lane concat)
    fused = dot(channel_out, r("ff1_wa")) + dot(spatial_out, r("ff1_wb")) + r("ff1_b")
    fused = relu(layer_norm(fused, "ff1"))
    fused = relu(layer_norm(linear(fused, "ff2"), "ff2")) + cqi2   # fusion residual
    cq = relu(layer_norm(linear(fused, "cp1"), "cp1"))
    cq = relu(layer_norm(linear(cq, "cp2"), "cp2"))
    cqi_out = linear(cq, "cp3")                        # (n, 1)

    # final torch.cat([rssi, cqi], dim=1) built with broadcast + select
    lane = jax.lax.broadcasted_iota(jnp.int32, (n, 2), 1)
    out_ref[...] = jnp.where(lane == 0, rssi_out, cqi_out)


# ----------------------------------------------------------------------------
# Parameter init (deterministic, synthetic).
# ----------------------------------------------------------------------------
def init_params(key):
    keys = iter(jax.random.split(key, 160))

    def nrm(shape, s=0.1):
        return s * jax.random.normal(next(keys), shape, jnp.float32)

    def lin(din, dout):
        return nrm((din, dout), 0.2), nrm((1, dout), 0.05)

    def lnp(d):
        return 1.0 + nrm((1, d), 0.1), nrm((1, d), 0.05)

    def bnp(d):  # eval-mode BatchNorm folded to per-channel (scale, shift)
        gamma = 1.0 + nrm((1, d), 0.1)
        beta = nrm((1, d), 0.05)
        rmean = nrm((1, d), 0.1)
        rvar = 1.0 + jnp.abs(nrm((1, d), 0.1))
        scale = gamma * jax.lax.rsqrt(rvar + 1e-5)
        shift = beta - rmean * scale
        return scale, shift

    def gatp(din, dout):
        w, b = lin(din, dout)
        return dict(w=w, att=nrm((2, dout), 0.2), b=b)   # rows: (att_src, att_dst)

    H2, H4, H8 = HIDDEN // 2, HIDDEN // 4, HIDDEN // 8
    p = {}
    p["proj_w"], p["proj_b"] = lin(NUM_FEATURES, 16)
    p["wq"], p["bq"] = lin(16, 16)
    p["wk"], p["bk"] = lin(16, 16)
    p["gat1"], p["bn1"] = gatp(NUM_FEATURES, HIDDEN), bnp(HIDDEN)
    p["gat2"], p["bn2"] = gatp(HIDDEN, HIDDEN), bnp(HIDDEN)
    p["gat3"], p["bn3"] = gatp(HIDDEN, HIDDEN), bnp(HIDDEN)
    p["rssi_g1"], p["bn_r1"] = lin(HIDDEN, HIDDEN), bnp(HIDDEN)
    p["rssi_g2"], p["bn_r2"] = lin(HIDDEN, H2), bnp(H2)
    p["rssi_att"] = lin(H2, 1)
    p["rp1"], p["rp1_ln"] = lin(H2, H2), lnp(H2)
    p["rp2"], p["rp2_ln"] = lin(H2, H4), lnp(H4)
    p["rp3"] = lin(H4, 1)
    p["cqi_g1"], p["bn_c1"] = lin(HIDDEN, HIDDEN), bnp(HIDDEN)
    p["cqi_g2"], p["bn_c2"] = lin(HIDDEN, H2), bnp(H2)
    p["ca1"], p["ca1_ln"] = lin(H2, H2), lnp(H2)
    p["ca2"], p["ca2_ln"] = lin(H2, H2), lnp(H2)
    p["sa1"], p["sa1_ln"] = lin(H2, H4), lnp(H4)
    p["sa2"], p["sa2_ln"] = lin(H4, H8), lnp(H8)
    p["sa3"] = lin(H8, 1)
    p["ff1"], p["ff1_ln"] = lin(HIDDEN, H2), lnp(H2)
    p["ff2"], p["ff2_ln"] = lin(H2, H2), lnp(H2)
    p["cp1"], p["cp1_ln"] = lin(H2, H2), lnp(H2)
    p["cp2"], p["cp2_ln"] = lin(H2, H4), lnp(H4)
    p["cp3"] = lin(H4, 1)
    return p


# ----------------------------------------------------------------------------
# Param packing: fold eval-BN, merge co-input matmuls, build ONE (rows,128) slab.
# ----------------------------------------------------------------------------
class _Packer:
    def __init__(self, lanes=LANES):
        self.lanes = lanes
        self.blocks = []
        self.layout = {}
        self.offset = 0

    def add(self, name, arr):
        arr = jnp.asarray(arr, jnp.float32)
        rows, cols = arr.shape
        rpad = ((rows + 7) // 8) * 8                 # sublane-aligned block start
        blk = jnp.zeros((rpad, self.lanes), jnp.float32).at[:rows, :cols].set(arr)
        self.blocks.append(blk)
        self.layout[name] = (self.offset, rows, cols)
        self.offset += rpad

    def finalize(self):
        return jnp.concatenate(self.blocks, axis=0), self.layout


def prepare_kernel_params(p):
    H, H2 = HIDDEN, HIDDEN // 2
    pk = _Packer()

    pk.add("proj_w", p["proj_w"]); pk.add("proj_b", p["proj_b"])
    pk.add("wqk", jnp.concatenate([p["wq"], p["wk"]], axis=1))
    pk.add("bqk", jnp.concatenate([p["bq"], p["bk"]], axis=1))

    # GAT + BN fold:  W' = W*s, b' = b*s + t, att' = att/s  (logits unchanged).
    # att stored pre-transposed (dout, 2) so the kernel needs no extra vxpose.
    for i in (1, 2, 3):
        g, (s, t) = p[f"gat{i}"], p[f"bn{i}"]
        pk.add(f"gat{i}_w", g["w"] * s)
        pk.add(f"gat{i}_b", g["b"] * s + t)
        pk.add(f"gat{i}_attT", (g["att"] / s).T)

    def fold_lin(wb, bn):
        (w, b), (s, t) = wb, bn
        return w * s, b * s + t

    # rssi_conv1 | cqi_conv1 share input -> merged wide GCN matmul
    rw1, rb1 = fold_lin(p["rssi_g1"], p["bn_r1"])
    cw1, cb1 = fold_lin(p["cqi_g1"], p["bn_c1"])
    pk.add("g1_w", jnp.concatenate([rw1, cw1], axis=1))
    pk.add("g1_b", jnp.concatenate([rb1, cb1], axis=1))

    # rssi_conv2 | cqi_conv2 -> block-diagonal (2H, H) weight, single a_norm agg
    rw2, rb2 = fold_lin(p["rssi_g2"], p["bn_r2"])
    cw2, cb2 = fold_lin(p["cqi_g2"], p["bn_c2"])
    g2_w = jnp.zeros((2 * H, H), jnp.float32)
    g2_w = g2_w.at[:H, :H2].set(rw2).at[H:, H2:].set(cw2)
    pk.add("g2_w", g2_w)
    pk.add("g2_b", jnp.concatenate([rb2, cb2], axis=1))

    pk.add("rssi_att_w", p["rssi_att"][0]); pk.add("rssi_att_b", p["rssi_att"][1])

    def mlp(name, wb, ln=None):
        pk.add(f"{name}_w", wb[0]); pk.add(f"{name}_b", wb[1])
        if ln is not None:
            pk.add(f"{name}_g", ln[0]); pk.add(f"{name}_beta", ln[1])

    mlp("rp1", p["rp1"], p["rp1_ln"]); mlp("rp2", p["rp2"], p["rp2_ln"]); mlp("rp3", p["rp3"])

    # ca1 | sa1 share input cqi2 -> merged matmul, separate LayerNorm params
    pk.add("casa_w", jnp.concatenate([p["ca1"][0], p["sa1"][0]], axis=1))
    pk.add("casa_b", jnp.concatenate([p["ca1"][1], p["sa1"][1]], axis=1))
    pk.add("ca1_g", p["ca1_ln"][0]); pk.add("ca1_beta", p["ca1_ln"][1])
    pk.add("sa1_g", p["sa1_ln"][0]); pk.add("sa1_beta", p["sa1_ln"][1])

    mlp("ca2", p["ca2"], p["ca2_ln"])
    mlp("sa2", p["sa2"], p["sa2_ln"]); mlp("sa3", p["sa3"])

    # feature-fusion first layer split so the kernel never concatenates lanes
    ff1_w, ff1_b = p["ff1"]
    pk.add("ff1_wa", ff1_w[:H2]); pk.add("ff1_wb", ff1_w[H2:]); pk.add("ff1_b", ff1_b)
    pk.add("ff1_g", p["ff1_ln"][0]); pk.add("ff1_beta", p["ff1_ln"][1])
    mlp("ff2", p["ff2"], p["ff2_ln"])
    mlp("cp1", p["cp1"], p["cp1_ln"]); mlp("cp2", p["cp2"], p["cp2_ln"]); mlp("cp3", p["cp3"])

    return pk.finalize()


# ----------------------------------------------------------------------------
# Forward: ONE pallas_call, grid over the batch of graphs ("parallel").
# ----------------------------------------------------------------------------
def make_rfgcn_forward(layout, slab_shape):
    kernel = functools.partial(
        _fused_rfgcn_kernel, layout=layout,
        num_heads=NUM_HEADS, top_k=TOP_K, hidden=HIDDEN)

    def fwd(x, slab):
        B, n, f = x.shape
        return pl.pallas_call(
            kernel,
            out_shape=jax.ShapeDtypeStruct((B, n, 2), jnp.float32),
            grid=(B,),
            in_specs=[
                pl.BlockSpec((None, n, f), lambda b: (b, 0, 0)),
                pl.BlockSpec(slab_shape, lambda b: (0, 0)),   # resident param slab
            ],
            out_specs=pl.BlockSpec((None, n, 2), lambda b: (b, 0, 0)),
            compiler_params=pltpu.CompilerParams(
                dimension_semantics=("parallel",)),
        )(x, slab)

    return jax.jit(fwd)


if __name__ == "__main__":
    key = jax.random.PRNGKey(0)
    kx, kp = jax.random.split(key)
    x = jax.random.normal(kx, (BATCH, N_NODES, NUM_FEATURES), jnp.float32)
    raw_params = init_params(kp)
    slab, layout = prepare_kernel_params(raw_params)
    fwd = make_rfgcn_forward(layout, slab.shape)
    out = fwd(x, slab)
    jax.block_until_ready(out)
    assert out.shape == (BATCH, N_NODES, 2) and out.dtype == jnp.float32
    assert bool(jnp.all(jnp.isfinite(out)))
    print("KERNEL_OK")
</pallas_src>

<mosaic_0001>
module attributes {stable_mosaic.version = 11 : i64} {
  func.func @_fused_rfgcn_kernel(%arg0: i32, %arg1: memref<1x16x16xf32, #tpu.memory_space<vmem>>, %arg2: memref<816x128xf32, #tpu.memory_space<vmem>>, %arg3: memref<1x16x2xf32, #tpu.memory_space<vmem>>) attributes {dimension_semantics = [#tpu.dimension_semantics<parallel>], iteration_bounds = array<i64: 2>, scalar_prefetch = 0 : i64, scratch_operands = 0 : i64, tpu.core_type = #tpu.core_type<tc>, window_params = [{transform_indices = @transform_0, window_bounds = array<i64: 1, 16, 16>}, {pipeline_mode = #tpu.pipeline_mode<synchronous>, transform_indices = @transform_1, window_bounds = array<i64: 816, 128>}, {transform_indices = @transform_2, window_bounds = array<i64: 1, 16, 2>}]} {
    %c0 = arith.constant 0 : index
    %c0_0 = arith.constant 0 : index
    %c0_1 = arith.constant 0 : index
    %0 = vector.load %arg1[%c0, %c0_0, %c0_1] : memref<1x16x16xf32, #tpu.memory_space<vmem>>, vector<1x16x16xf32>
    %1 = vector.shape_cast %0 : vector<1x16x16xf32> to vector<16x16xf32>
    %c0_2 = arith.constant 0 : index
    %c0_3 = arith.constant 0 : index
    %2 = vector.load %arg2[%c0_2, %c0_3] : memref<816x128xf32, #tpu.memory_space<vmem>>, vector<16x16xf32>
    %cst = arith.constant dense<0.000000e+00> : vector<16x16xf32>
    %3 = tpu.matmul %1, %2, %cst {dimension_numbers = #tpu.dot_dimension_numbers<[1], [0], [0], [1], [0, 0, 1, 1], [], []>} : vector<16x16xf32>, vector<16x16xf32>, vector<16x16xf32> -> vector<16x16xf32>
    %c16 = arith.constant 16 : index
    %c0_4 = arith.constant 0 : index
    %4 = vector.load %arg2[%c16, %c0_4] : memref<816x128xf32, #tpu.memory_space<vmem>>, vector<1x16xf32>
    %5 = vector.broadcast %4 : vector<1x16xf32> to vector<16x16xf32>
    %6 = arith.addf %3, %5 : vector<16x16xf32>
    %c24 = arith.constant 24 : index
    %c0_5 = arith.constant 0 : index
    %7 = vector.load %arg2[%c24, %c0_5] : memref<816x128xf32, #tpu.memory_space<vmem>>, vector<16x32xf32>
    %cst_6 = arith.constant dense<0.000000e+00> : vector<16x32xf32>
    %8 = tpu.matmul %6, %7, %cst_6 {dimension_numbers = #tpu.dot_dimension_numbers<[1], [0], [0], [1], [0, 0, 1, 1], [], []>} : vector<16x16xf32>, vector<16x32xf32>, vector<16x32xf32> -> vector<16x32xf32>
    %c40 = arith.constant 40 : index
    %c0_7 = arith.constant 0 : index
    %9 = vector.load %arg2[%c40, %c0_7] : memref<816x128xf32, #tpu.memory_space<vmem>>, vector<1x32xf32>
    %10 = vector.broadcast %9 : vector<1x32xf32> to vector<16x32xf32>
    %11 = arith.addf %8, %10 : vector<16x32xf32>
    %12 = vector.extract_strided_slice %11 {offsets = [0, 0], sizes = [16, 16], strides = [1, 1]} : vector<16x32xf32> to vector<16x16xf32>
    %13 = vector.extract_strided_slice %11 {offsets = [0, 16], sizes = [16, 16], strides = [1, 1]} : vector<16x32xf32> to vector<16x16xf32>
    %14 = tpu.transpose %13, [1, 0] : vector<16x16xf32> -> vector<16x16xf32>
    %15 = vector.extract_strided_slice %12 {offsets = [0, 0], sizes = [16, 4], strides = [1, 1]} : vector<16x16xf32> to vector<16x4xf32>
    %16 = vector.extract_strided_slice %14 {offsets = [0, 0], sizes = [4, 16], strides = [1, 1]} : vector<16x16xf32> to vector<4x16xf32>
    %cst_8 = arith.constant dense<0.000000e+00> : vector<16x16xf32>
    %17 = tpu.matmul %15, %16, %cst_8 {dimension_numbers = #tpu.dot_dimension_numbers<[1], [0], [0], [1], [0, 0, 1, 1], [], []>} : vector<16x4xf32>, vector<4x16xf32>, vector<16x16xf32> -> vector<16x16xf32>
    %18 = vector.extract_strided_slice %12 {offsets = [0, 4], sizes = [16, 4], strides = [1, 1]} : vector<16x16xf32> to vector<16x4xf32>
    %19 = vector.extract_strided_slice %14 {offsets = [4, 0], sizes = [4, 16], strides = [1, 1]} : vector<16x16xf32> to vector<4x16xf32>
    %cst_9 = arith.constant dense<0.000000e+00> : vector<16x16xf32>
    %20 = tpu.matmul %18, %19, %cst_9 {dimension_numbers = #tpu.dot_dimension_numbers<[1], [0], [0], [1], [0, 0, 1, 1], [], []>} : vector<16x4xf32>, vector<4x16xf32>, vector<16x16xf32> -> vector<16x16xf32>
    %21 = vector.extract_strided_slice %12 {offsets = [0, 8], sizes = [16, 4], strides = [1, 1]} : vector<16x16xf32> to vector<16x4xf32>
    %22 = vector.extract_strided_slice %14 {offsets = [8, 0], sizes = [4, 16], strides = [1, 1]} : vector<16x16xf32> to vector<4x16xf32>
    %cst_10 = arith.constant dense<0.000000e+00> : vector<16x16xf32>
    %23 = tpu.matmul %21, %22, %cst_10 {dimension_numbers = #tpu.dot_dimension_numbers<[1], [0], [0], [1], [0, 0, 1, 1], [], []>} : vector<16x4xf32>, vector<4x16xf32>, vector<16x16xf32> -> vector<16x16xf32>
    %24 = vector.extract_strided_slice %12 {offsets = [0, 12], sizes = [16, 4], strides = [1, 1]} : vector<16x16xf32> to vector<16x4xf32>
    %25 = vector.extract_strided_slice %14 {offsets = [12, 0], sizes = [4, 16], strides = [1, 1]} : vector<16x16xf32> to vector<4x16xf32>
    %cst_11 = arith.constant dense<0.000000e+00> : vector<16x16xf32>
    %26 = tpu.matmul %24, %25, %cst_11 {dimension_numbers = #tpu.dot_dimension_numbers<[1], [0], [0], [1], [0, 0, 1, 1], [], []>} : vector<16x4xf32>, vector<4x16xf32>, vector<16x16xf32> -> vector<16x16xf32>
    %27 = tpu.concatenate %17, %20, %23, %26 in 0 : vector<16x16xf32>, vector<16x16xf32>, vector<16x16xf32>, vector<16x16xf32> -> vector<64x16xf32>
    %cst_12 = arith.constant 5.000000e-01 : f32
    %28 = vector.broadcast %cst_12 : f32 to vector<64x16xf32>
    %29 = arith.mulf %27, %28 : vector<64x16xf32>
    %cst_13 = arith.constant dense<0xFF800000> : vector<64xf32>
    %30 = vector.multi_reduction <maximumf>, %29, %cst_13 [1] : vector<64x16xf32> to vector<64xf32>
    %31 = vector.shape_cast %30 : vector<64xf32> to vector<64x1xf32>
    %32 = vector.broadcast %31 : vector<64x1xf32> to vector<64x16xf32>
    %33 = arith.subf %29, %32 : vector<64x16xf32>
    %34 = math.exp %33 : vector<64x16xf32>
    %cst_14 = arith.constant dense<0.000000e+00> : vector<64xf32>
    %35 = vector.multi_reduction <add>, %34, %cst_14 [1] : vector<64x16xf32> to vector<64xf32>
    %36 = vector.shape_cast %35 : vector<64xf32> to vector<64x1xf32>
    %cst_15 = arith.constant 4.000000e+00 : f32
    %37 = vector.broadcast %cst_15 : f32 to vector<64x1xf32>
    %38 = arith.mulf %36, %37 : vector<64x1xf32>
    %39 = vector.broadcast %38 : vector<64x1xf32> to vector<64x16xf32>
    %40 = arith.divf %34, %39 : vector<64x16xf32>
    %41 = vector.extract_strided_slice %40 {offsets = [0, 0], sizes = [16, 16], strides = [1, 1]} : vector<64x16xf32> to vector<16x16xf32>
    %42 = vector.extract_strided_slice %40 {offsets = [16, 0], sizes = [16, 16], strides = [1, 1]} : vector<64x16xf32> to vector<16x16xf32>
    %43 = arith.addf %41, %42 : vector<16x16xf32>
    %44 = vector.extract_strided_slice %40 {offsets = [32, 0], sizes = [16, 16], strides = [1, 1]} : vector<64x16xf32> to vector<16x16xf32>
    %45 = arith.addf %43, %44 : vector<16x16xf32>
    %46 = vector.extract_strided_slice %40 {offsets = [48, 0], sizes = [16, 16], strides = [1, 1]} : vector<64x16xf32> to vector<16x16xf32>
    %47 = arith.addf %45, %46 : vector<16x16xf32>
    %48 = tpu.iota {dimensions = array<i32: 1>} : vector<16x16xi32>
    %49 = tpu.iota {dimensions = array<i32: 0>} : vector<16x16xi32>
    %50 = arith.sitofp %48 : vector<16x16xi32> to vector<16x16xf32>
    %cst_16 = arith.constant 1.000000e-07 : f32
    %51 = vector.broadcast %cst_16 : f32 to vector<16x16xf32>
    %52 = arith.mulf %50, %51 : vector<16x16xf32>
    %53 = arith.subf %47, %52 : vector<16x16xf32>
    %cst_17 = arith.constant 0.000000e+00 : f32
    %54 = vector.broadcast %cst_17 : f32 to vector<16x16xf32>
    %cst_18 = arith.constant dense<0xFF800000> : vector<16xf32>
    %55 = vector.multi_reduction <maximumf>, %53, %cst_18 [1] : vector<16x16xf32> to vector<16xf32>
    %56 = vector.shape_cast %55 : vector<16xf32> to vector<16x1xf32>
    %57 = vector.broadcast %56 : vector<16x1xf32> to vector<16x16xf32>
    %58 = arith.cmpf oge, %53, %57 : vector<16x16xf32>
    %cst_19 = arith.constant 1.000000e+00 : f32
    %59 = vector.broadcast %cst_19 : f32 to vector<16x16xf32>
    %60 = arith.select %58, %59, %54 : vector<16x16xi1>, vector<16x16xf32>
    %cst_20 = arith.constant -1.000000e+30 : f32
    %61 = vector.broadcast %cst_20 : f32 to vector<16x16xf32>
    %62 = arith.select %58, %61, %53 : vector<16x16xi1>, vector<16x16xf32>
    %cst_21 = arith.constant dense<0xFF800000> : vector<16xf32>
    %63 = vector.multi_reduction <maximumf>, %62, %cst_21 [1] : vector<16x16xf32> to vector<16xf32>
    %64 = vector.shape_cast %63 : vector<16xf32> to vector<16x1xf32>
    %65 = vector.broadcast %64 : vector<16x1xf32> to vector<16x16xf32>
    %66 = arith.cmpf oge, %62, %65 : vector<16x16xf32>
    %cst_22 = arith.constant 1.000000e+00 : f32
    %67 = vector.broadcast %cst_22 : f32 to vector<16x16xf32>
    %68 = arith.select %66, %67, %60 : vector<16x16xi1>, vector<16x16xf32>
    %cst_23 = arith.constant -1.000000e+30 : f32
    %69 = vector.broadcast %cst_23 : f32 to vector<16x16xf32>
    %70 = arith.select %66, %69, %62 : vector<16x16xi1>, vector<16x16xf32>
    %cst_24 = arith.constant dense<0xFF800000> : vector<16xf32>
    %71 = vector.multi_reduction <maximumf>, %70, %cst_24 [1] : vector<16x16xf32> to vector<16xf32>
    %72 = vector.shape_cast %71 : vector<16xf32> to vector<16x1xf32>
    %73 = vector.broadcast %72 : vector<16x1xf32> to vector<16x16xf32>
    %74 = arith.cmpf oge, %70, %73 : vector<16x16xf32>
    %cst_25 = arith.constant 1.000000e+00 : f32
    %75 = vector.broadcast %cst_25 : f32 to vector<16x16xf32>
    %76 = arith.select %74, %75, %68 : vector<16x16xi1>, vector<16x16xf32>
    %cst_26 = arith.constant -1.000000e+30 : f32
    %77 = vector.broadcast %cst_26 : f32 to vector<16x16xf32>
    %78 = arith.select %74, %77, %70 : vector<16x16xi1>, vector<16x16xf32>
    %cst_27 = arith.constant dense<0xFF800000> : vector<16xf32>
    %79 = vector.multi_reduction <maximumf>, %78, %cst_27 [1] : vector<16x16xf32> to vector<16xf32>
    %80 = vector.shape_cast %79 : vector<16xf32> to vector<16x1xf32>
    %81 = vector.broadcast %80 : vector<16x1xf32> to vector<16x16xf32>
    %82 = arith.cmpf oge, %78, %81 : vector<16x16xf32>
    %cst_28 = arith.constant 1.000000e+00 : f32
    %83 = vector.broadcast %cst_28 : f32 to vector<16x16xf32>
    %84 = arith.select %82, %83, %76 : vector<16x16xi1>, vector<16x16xf32>
    %cst_29 = arith.constant -1.000000e+30 : f32
    %85 = vector.broadcast %cst_29 : f32 to vector<16x16xf32>
    %86 = arith.select %82, %85, %78 : vector<16x16xi1>, vector<16x16xf32>
    %cst_30 = arith.constant dense<0xFF800000> : vector<16xf32>
    %87 = vector.multi_reduction <maximumf>, %86, %cst_30 [1] : vector<16x16xf32> to vector<16xf32>
    %88 = vector.shape_cast %87 : vector<16xf32> to vector<16x1xf32>
    %89 = vector.broadcast %88 : vector<16x1xf32> to vector<16x16xf32>
    %90 = arith.cmpf oge, %86, %89 : vector<16x16xf32>
    %cst_31 = arith.constant 1.000000e+00 : f32
    %91 = vector.broadcast %cst_31 : f32 to vector<16x16xf32>
    %92 = arith.select %90, %91, %84 : vector<16x16xi1>, vector<16x16xf32>
    %93 = tpu.transpose %92, [1, 0] : vector<16x16xf32> -> vector<16x16xf32>
    %94 = arith.cmpi eq, %49, %48 : vector<16x16xi32>
    %95 = arith.extui %94 : vector<16x16xi1> to vector<16x16xi32>
    %96 = arith.sitofp %95 : vector<16x16xi32> to vector<16x16xf32>
    %97 = arith.maximumf %93, %96 : vector<16x16xf32>
    %cst_32 = arith.constant dense<0.000000e+00> : vector<16xf32>
    %98 = vector.multi_reduction <add>, %97, %cst_32 [1] : vector<16x16xf32> to vector<16xf32>
    %99 = vector.shape_cast %98 : vector<16xf32> to vector<16x1xf32>
    %100 = math.rsqrt %99 : vector<16x1xf32>
    %101 = vector.broadcast %100 : vector<16x1xf32> to vector<16x16xf32>
    %102 = arith.mulf %97, %101 : vector<16x16xf32>
    %103 = tpu.transpose %100, [1, 0] : vector<16x1xf32> -> vector<1x16xf32>
    %104 = vector.broadcast %103 : vector<1x16xf32> to vector<16x16xf32>
    %105 = arith.mulf %102, %104 : vector<16x16xf32>
    %cst_33 = arith.constant 0.000000e+00 : f32
    %106 = vector.broadcast %cst_33 : f32 to vector<16x16xf32>
    %107 = arith.cmpf ogt, %97, %106 : vector<16x16xf32>
    %cst_34 = arith.constant 0.000000e+00 : f32
    %cst_35 = arith.constant -1.000000e+30 : f32
    %108 = vector.broadcast %cst_34 : f32 to vector<16x16xf32>
    %109 = vector.broadcast %cst_35 : f32 to vector<16x16xf32>
    %110 = arith.select %107, %108, %109 : vector<16x16xi1>, vector<16x16xf32>
    %c48 = arith.constant 48 : index
    %c0_36 = arith.constant 0 : index
    %111 = vector.load %arg2[%c48, %c0_36] : memref<816x128xf32, #tpu.memory_space<vmem>>, vector<16x32xf32>
    %cst_37 = arith.constant dense<0.000000e+00> : vector<16x32xf32>
    %112 = tpu.matmul %1, %111, %cst_37 {dimension_numbers = #tpu.dot_dimension_numbers<[1], [0], [0], [1], [0, 0, 1, 1], [], []>} : vector<16x16xf32>, vector<16x32xf32>, vector<16x32xf32> -> vector<16x32xf32>
    %c72 = arith.constant 72 : index
    %c0_38 = arith.constant 0 : index
    %113 = vector.load %arg2[%c72, %c0_38] : memref<816x128xf32, #tpu.memory_space<vmem>>, vector<32x2xf32>
    %cst_39 = arith.constant dense<0.000000e+00> : vector<16x2xf32>
    %114 = tpu.matmul %112, %113, %cst_39 {dimension_numbers = #tpu.dot_dimension_numbers<[1], [0], [0], [1], [0, 0, 1, 1], [], []>} : vector<16x32xf32>, vector<32x2xf32>, vector<16x2xf32> -> vector<16x2xf32>
    %115 = vector.extract_strided_slice %114 {offsets = [0, 1], sizes = [16, 1], strides = [1, 1]} : vector<16x2xf32> to vector<16x1xf32>
    %116 = vector.extract_strided_slice %114 {offsets = [0, 0], sizes = [16, 1], strides = [1, 1]} : vector<16x2xf32> to vector<16x1xf32>
    %117 = tpu.transpose %116, [1, 0] : vector<16x1xf32> -> vector<1x16xf32>
    %118 = vector.broadcast %115 : vector<16x1xf32> to vector<16x16xf32>
    %119 = vector.broadcast %117 : vector<1x16xf32> to vector<16x16xf32>
    %120 = arith.addf %118, %119 : vector<16x16xf32>
    %cst_40 = arith.constant 0.000000e+00 : f32
    %121 = vector.broadcast %cst_40 : f32 to vector<16x16xf32>
    %122 = arith.cmpf oge, %120, %121 : vector<16x16xf32>
    %cst_41 = arith.constant 2.000000e-01 : f32
    %123 = vector.broadcast %cst_41 : f32 to vector<16x16xf32>
    %124 = arith.mulf %123, %120 : vector<16x16xf32>
    %125 = arith.select %122, %120, %124 : vector<16x16xi1>, vector<16x16xf32>
    %126 = arith.addf %125, %110 : vector<16x16xf32>
    %cst_42 = arith.constant dense<0xFF800000> : vector<16xf32>
    %127 = vector.multi_reduction <maximumf>, %126, %cst_42 [1] : vector<16x16xf32> to vector<16xf32>
    %128 = vector.shape_cast %127 : vector<16xf32> to vector<16x1xf32>
    %129 = vector.broadcast %128 : vector<16x1xf32> to vector<16x16xf32>
    %130 = arith.subf %126, %129 : vector<16x16xf32>
    %131 = math.exp %130 : vector<16x16xf32>
    %cst_43 = arith.constant dense<0.000000e+00> : vector<16xf32>
    %132 = vector.multi_reduction <add>, %131, %cst_43 [1] : vector<16x16xf32> to vector<16xf32>
    %133 = vector.shape_cast %132 : vector<16xf32> to vector<16x1xf32>
    %134 = tpu.reciprocal %133 {approx = true} : vector<16x1xf32> -> vector<16x1xf32>
    %135 = vector.broadcast %134 : vector<16x1xf32> to vector<16x16xf32>
    %136 = arith.mulf %131, %135 : vector<16x16xf32>
    %cst_44 = arith.constant dense<0.000000e+00> : vector<16x32xf32>
    %137 = tpu.matmul %136, %112, %cst_44 {dimension_numbers = #tpu.dot_dimension_numbers<[1], [0], [0], [1], [0, 0, 1, 1], [], []>} : vector<16x16xf32>, vector<16x32xf32>, vector<16x32xf32> -> vector<16x32xf32>
    %c64 = arith.constant 64 : index
    %c0_45 = arith.constant 0 : index
    %138 = vector.load %arg2[%c64, %c0_45] : memref<816x128xf32, #tpu.memory_space<vmem>>, vector<1x32xf32>
    %139 = vector.broadcast %138 : vector<1x32xf32> to vector<16x32xf32>
    %140 = arith.addf %137, %139 : vector<16x32xf32>
    %cst_46 = arith.constant 0.000000e+00 : f32
    %141 = vector.broadcast %cst_46 : f32 to vector<16x32xf32>
    %142 = arith.maximumf %140, %141 : vector<16x32xf32>
    %c104 = arith.constant 104 : index
    %c0_47 = arith.constant 0 : index
    %143 = vector.load %arg2[%c104, %c0_47] : memref<816x128xf32, #tpu.memory_space<vmem>>, vector<32x32xf32>
    %cst_48 = arith.constant dense<0.000000e+00> : vector<16x32xf32>
    %144 = tpu.matmul %142, %143, %cst_48 {dimension_numbers = #tpu.dot_dimension_numbers<[1], [0], [0], [1], [0, 0, 1, 1], [], []>} : vector<16x32xf32>, vector<32x32xf32>, vector<16x32xf32> -> vector<16x32xf32>
    %c144 = arith.constant 144 : index
    %c0_49 = arith.constant 0 : index
    %145 = vector.load %arg2[%c144, %c0_49] : memref<816x128xf32, #tpu.memory_space<vmem>>, vector<32x2xf32>
    %cst_50 = arith.constant dense<0.000000e+00> : vector<16x2xf32>
    %146 = tpu.matmul %144, %145, %cst_50 {dimension_numbers = #tpu.dot_dimension_numbers<[1], [0], [0], [1], [0, 0, 1, 1], [], []>} : vector<16x32xf32>, vector<32x2xf32>, vector<16x2xf32> -> vector<16x2xf32>
    %147 = vector.extract_strided_slice %146 {offsets = [0, 1], sizes = [16, 1], strides = [1, 1]} : vector<16x2xf32> to vector<16x1xf32>
    %148 = vector.extract_strided_slice %146 {offsets = [0, 0], sizes = [16, 1], strides = [1, 1]} : vector<16x2xf32> to vector<16x1xf32>
    %149 = tpu.transpose %148, [1, 0] : vector<16x1xf32> -> vector<1x16xf32>
    %150 = vector.broadcast %147 : vector<16x1xf32> to vector<16x16xf32>
    %151 = vector.broadcast %149 : vector<1x16xf32> to vector<16x16xf32>
    %152 = arith.addf %150, %151 : vector<16x16xf32>
    %cst_51 = arith.constant 0.000000e+00 : f32
    %153 = vector.broadcast %cst_51 : f32 to vector<16x16xf32>
    %154 = arith.cmpf oge, %152, %153 : vector<16x16xf32>
    %cst_52 = arith.constant 2.000000e-01 : f32
    %155 = vector.broadcast %cst_52 : f32 to vector<16x16xf32>
    %156 = arith.mulf %155, %152 : vector<16x16xf32>
    %157 = arith.select %154, %152, %156 : vector<16x16xi1>, vector<16x16xf32>
    %158 = arith.addf %157, %110 : vector<16x16xf32>
    %cst_53 = arith.constant dense<0xFF800000> : vector<16xf32>
    %159 = vector.multi_reduction <maximumf>, %158, %cst_53 [1] : vector<16x16xf32> to vector<16xf32>
    %160 = vector.shape_cast %159 : vector<16xf32> to vector<16x1xf32>
    %161 = vector.broadcast %160 : vector<16x1xf32> to vector<16x16xf32>
    %162 = arith.subf %158, %161 : vector<16x16xf32>
    %163 = math.exp %162 : vector<16x16xf32>
    %cst_54 = arith.constant dense<0.000000e+00> : vector<16xf32>
    %164 = vector.multi_reduction <add>, %163, %cst_54 [1] : vector<16x16xf32> to vector<16xf32>
    %165 = vector.shape_cast %164 : vector<16xf32> to vector<16x1xf32>
    %166 = tpu.reciprocal %165 {approx = true} : vector<16x1xf32> -> vector<16x1xf32>
    %167 = vector.broadcast %166 : vector<16x1xf32> to vector<16x16xf32>
    %168 = arith.mulf %163, %167 : vector<16x16xf32>
    %cst_55 = arith.constant dense<0.000000e+00> : vector<16x32xf32>
    %169 = tpu.matmul %168, %144, %cst_55 {dimension_numbers = #tpu.dot_dimension_numbers<[1], [0], [0], [1], [0, 0, 1, 1], [], []>} : vector<16x16xf32>, vector<16x32xf32>, vector<16x32xf32> -> vector<16x32xf32>
    %c136 = arith.constant 136 : index
    %c0_56 = arith.constant 0 : index
    %170 = vector.load %arg2[%c136, %c0_56] : memref<816x128xf32, #tpu.memory_space<vmem>>, vector<1x32xf32>
    %171 = vector.broadcast %170 : vector<1x32xf32> to vector<16x32xf32>
    %172 = arith.addf %169, %171 : vector<16x32xf32>
    %173 = arith.addf %172, %142 : vector<16x32xf32>
    %cst_57 = arith.constant 0.000000e+00 : f32
    %174 = vector.broadcast %cst_57 : f32 to vector<16x32xf32>
    %175 = arith.maximumf %173, %174 : vector<16x32xf32>
    %c176 = arith.constant 176 : index
    %c0_58 = arith.constant 0 : index
    %176 = vector.load %arg2[%c176, %c0_58] : memref<816x128xf32, #tpu.memory_space<vmem>>, vector<32x32xf32>
    %cst_59 = arith.constant dense<0.000000e+00> : vector<16x32xf32>
    %177 = tpu.matmul %175, %176, %cst_59 {dimension_numbers = #tpu.dot_dimension_numbers<[1], [0], [0], [1], [0, 0, 1, 1], [], []>} : vector<16x32xf32>, vector<32x32xf32>, vector<16x32xf32> -> vector<16x32xf32>
    %c216 = arith.constant 216 : index
    %c0_60 = arith.constant 0 : index
    %178 = vector.load %arg2[%c216, %c0_60] : memref<816x128xf32, #tpu.memory_space<vmem>>, vector<32x2xf32>
    %cst_61 = arith.constant dense<0.000000e+00> : vector<16x2xf32>
    %179 = tpu.matmul %177, %178, %cst_61 {dimension_numbers = #tpu.dot_dimension_numbers<[1], [0], [0], [1], [0, 0, 1, 1], [], []>} : vector<16x32xf32>, vector<32x2xf32>, vector<16x2xf32> -> vector<16x2xf32>
    %180 = vector.extract_strided_slice %179 {offsets = [0, 1], sizes = [16, 1], strides = [1, 1]} : vector<16x2xf32> to vector<16x1xf32>
    %181 = vector.extract_strided_slice %179 {offsets = [0, 0], sizes = [16, 1], strides = [1, 1]} : vector<16x2xf32> to vector<16x1xf32>
    %182 = tpu.transpose %181, [1, 0] : vector<16x1xf32> -> vector<1x16xf32>
    %183 = vector.broadcast %180 : vector<16x1xf32> to vector<16x16xf32>
    %184 = vector.broadcast %182 : vector<1x16xf32> to vector<16x16xf32>
    %185 = arith.addf %183, %184 : vector<16x16xf32>
    %cst_62 = arith.constant 0.000000e+00 : f32
    %186 = vector.broadcast %cst_62 : f32 to vector<16x16xf32>
    %187 = arith.cmpf oge, %185, %186 : vector<16x16xf32>
    %cst_63 = arith.constant 2.000000e-01 : f32
    %188 = vector.broadcast %cst_63 : f32 to vector<16x16xf32>
    %189 = arith.mulf %188, %185 : vector<16x16xf32>
    %190 = arith.select %187, %185, %189 : vector<16x16xi1>, vector<16x16xf32>
    %191 = arith.addf %190, %110 : vector<16x16xf32>
    %cst_64 = arith.constant dense<0xFF800000> : vector<16xf32>
    %192 = vector.multi_reduction <maximumf>, %191, %cst_64 [1] : vector<16x16xf32> to vector<16xf32>
    %193 = vector.shape_cast %192 : vector<16xf32> to vector<16x1xf32>
    %194 = vector.broadcast %193 : vector<16x1xf32> to vector<16x16xf32>
    %195 = arith.subf %191, %194 : vector<16x16xf32>
    %196 = math.exp %195 : vector<16x16xf32>
    %cst_65 = arith.constant dense<0.000000e+00> : vector<16xf32>
    %197 = vector.multi_reduction <add>, %196, %cst_65 [1] : vector<16x16xf32> to vector<16xf32>
    %198 = vector.shape_cast %197 : vector<16xf32> to vector<16x1xf32>
    %199 = tpu.reciprocal %198 {approx = true} : vector<16x1xf32> -> vector<16x1xf32>
    %200 = vector.broadcast %199 : vector<16x1xf32> to vector<16x16xf32>
    %201 = arith.mulf %196, %200 : vector<16x16xf32>
    %cst_66 = arith.constant dense<0.000000e+00> : vector<16x32xf32>
    %202 = tpu.matmul %201, %177, %cst_66 {dimension_numbers = #tpu.dot_dimension_numbers<[1], [0], [0], [1], [0, 0, 1, 1], [], []>} : vector<16x16xf32>, vector<16x32xf32>, vector<16x32xf32> -> vector<16x32xf32>
    %c208 = arith.constant 208 : index
    %c0_67 = arith.constant 0 : index
    %203 = vector.load %arg2[%c208, %c0_67] : memref<816x128xf32, #tpu.memory_space<vmem>>, vector<1x32xf32>
    %204 = vector.broadcast %203 : vector<1x32xf32> to vector<16x32xf32>
    %205 = arith.addf %202, %204 : vector<16x32xf32>
    %206 = arith.addf %205, %175 : vector<16x32xf32>
    %cst_68 = arith.constant 0.000000e+00 : f32
    %207 = vector.broadcast %cst_68 : f32 to vector<16x32xf32>
    %208 = arith.maximumf %206, %207 : vector<16x32xf32>
    %c248 = arith.constant 248 : index
    %c0_69 = arith.constant 0 : index
    %209 = vector.load %arg2[%c248, %c0_69] : memref<816x128xf32, #tpu.memory_space<vmem>>, vector<32x64xf32>
    %cst_70 = arith.constant dense<0.000000e+00> : vector<16x64xf32>
    %210 = tpu.matmul %208, %209, %cst_70 {dimension_numbers = #tpu.dot_dimension_numbers<[1], [0], [0], [1], [0, 0, 1, 1], [], []>} : vector<16x32xf32>, vector<32x64xf32>, vector<16x64xf32> -> vector<16x64xf32>
    %cst_71 = arith.constant dense<0.000000e+00> : vector<16x64xf32>
    %211 = tpu.matmul %105, %210, %cst_71 {dimension_numbers = #tpu.dot_dimension_numbers<[1], [0], [0], [1], [0, 0, 1, 1], [], []>} : vector<16x16xf32>, vector<16x64xf32>, vector<16x64xf32> -> vector<16x64xf32>
    %c280 = arith.constant 280 : index
    %c0_72 = arith.constant 0 : index
    %212 = vector.load %arg2[%c280, %c0_72] : memref<816x128xf32, #tpu.memory_space<vmem>>, vector<1x64xf32>
    %213 = vector.broadcast %212 : vector<1x64xf32> to vector<16x64xf32>
    %214 = arith.addf %211, %213 : vector<16x64xf32>
    %cst_73 = arith.constant 0.000000e+00 : f32
    %215 = vector.broadcast %cst_73 : f32 to vector<16x64xf32>
    %216 = arith.maximumf %214, %215 : vector<16x64xf32>
    %c288 = arith.constant 288 : index
    %c0_74 = arith.constant 0 : index
    %217 = vector.load %arg2[%c288, %c0_74] : memref<816x128xf32, #tpu.memory_space<vmem>>, vector<64x32xf32>
    %cst_75 = arith.constant dense<0.000000e+00> : vector<16x32xf32>
    %218 = tpu.matmul %216, %217, %cst_75 {dimension_numbers = #tpu.dot_dimension_numbers<[1], [0], [0], [1], [0, 0, 1, 1], [], []>} : vector<16x64xf32>, vector<64x32xf32>, vector<16x32xf32> -> vector<16x32xf32>
    %cst_76 = arith.constant dense<0.000000e+00> : vector<16x32xf32>
    %219 = tpu.matmul %105, %218, %cst_76 {dimension_numbers = #tpu.dot_dimension_numbers<[1], [0], [0], [1], [0, 0, 1, 1], [], []>} : vector<16x16xf32>, vector<16x32xf32>, vector<16x32xf32> -> vector<16x32xf32>
    %c352 = arith.constant 352 : index
    %c0_77 = arith.constant 0 : index
    %220 = vector.load %arg2[%c352, %c0_77] : memref<816x128xf32, #tpu.memory_space<vmem>>, vector<1x32xf32>
    %221 = vector.broadcast %220 : vector<1x32xf32> to vector<16x32xf32>
    %222 = arith.addf %219, %221 : vector<16x32xf32>
    %cst_78 = arith.constant 0.000000e+00 : f32
    %223 = vector.broadcast %cst_78 : f32 to vector<16x32xf32>
    %224 = arith.maximumf %222, %223 : vector<16x32xf32>
    %225 = vector.extract_strided_slice %224 {offsets = [0, 0], sizes = [16, 16], strides = [1, 1]} : vector<16x32xf32> to vector<16x16xf32>
    %226 = vector.extract_strided_slice %224 {offsets = [0, 16], sizes = [16, 16], strides = [1, 1]} : vector<16x32xf32> to vector<16x16xf32>
    %c360 = arith.constant 360 : index
    %c0_79 = arith.constant 0 : index
    %227 = vector.load %arg2[%c360, %c0_79] : memref<816x128xf32, #tpu.memory_space<vmem>>, vector<16x1xf32>
    %cst_80 = arith.constant dense<0.000000e+00> : vector<16x1xf32>
    %228 = tpu.matmul %225, %227, %cst_80 {dimension_numbers = #tpu.dot_dimension_numbers<[1], [0], [0], [1], [0, 0, 1, 1], [], []>} : vector<16x16xf32>, vector<16x1xf32>, vector<16x1xf32> -> vector<16x1xf32>
    %c376 = arith.constant 376 : index
    %c0_81 = arith.constant 0 : index
    %229 = vector.load %arg2[%c376, %c0_81] : memref<816x128xf32, #tpu.memory_space<vmem>>, vector<1x1xf32>
    %230 = vector.broadcast %229 : vector<1x1xf32> to vector<16x1xf32>
    %231 = arith.addf %228, %230 : vector<16x1xf32>
    %cst_82 = arith.constant dense<0xFF800000> : vector<1xf32>
    %232 = vector.multi_reduction <maximumf>, %231, %cst_82 [0] : vector<16x1xf32> to vector<1xf32>
    %233 = vector.shape_cast %232 : vector<1xf32> to vector<1x1xf32>
    %234 = vector.broadcast %233 : vector<1x1xf32> to vector<16x1xf32>
    %235 = arith.subf %231, %234 : vector<16x1xf32>
    %236 = math.exp %235 : vector<16x1xf32>
    %cst_83 = arith.constant dense<0.000000e+00> : vector<1xf32>
    %237 = vector.multi_reduction <add>, %236, %cst_83 [0] : vector<16x1xf32> to vector<1xf32>
    %238 = vector.shape_cast %237 : vector<1xf32> to vector<1x1xf32>
    %239 = tpu.reciprocal %238 {approx = true} : vector<1x1xf32> -> vector<1x1xf32>
    %240 = vector.broadcast %239 : vector<1x1xf32> to vector<16x1xf32>
    %241 = arith.mulf %236, %240 : vector<16x1xf32>
    %242 = vector.broadcast %241 : vector<16x1xf32> to vector<16x16xf32>
    %243 = arith.mulf %225, %242 : vector<16x16xf32>
    %c384 = arith.constant 384 : index
    %c0_84 = arith.constant 0 : index
    %244 = vector.load %arg2[%c384, %c0_84] : memref<816x128xf32, #tpu.memory_space<vmem>>, vector<16x16xf32>
    %cst_85 = arith.constant dense<0.000000e+00> : vector<16x16xf32>
    %245 = tpu.matmul %243, %244, %cst_85 {dimension_numbers = #tpu.dot_dimension_numbers<[1], [0], [0], [1], [0, 0, 1, 1], [], []>} : vector<16x16xf32>, vector<16x16xf32>, vector<16x16xf32> -> vector<16x16xf32>
    %c400 = arith.constant 400 : index
    %c0_86 = arith.constant 0 : index
    %246 = vector.load %arg2[%c400, %c0_86] : memref<816x128xf32, #tpu.memory_space<vmem>>, vector<1x16xf32>
    %247 = vector.broadcast %246 : vector<1x16xf32> to vector<16x16xf32>
    %248 = arith.addf %245, %247 : vector<16x16xf32>
    %cst_87 = arith.constant dense<0.000000e+00> : vector<16xf32>
    %249 = vector.multi_reduction <add>, %248, %cst_87 [1] : vector<16x16xf32> to vector<16xf32>
    %250 = vector.shape_cast %249 : vector<16xf32> to vector<16x1xf32>
    %cst_88 = arith.constant 1.600000e+01 : f32
    %251 = vector.broadcast %cst_88 : f32 to vector<16x1xf32>
    %252 = arith.divf %250, %251 : vector<16x1xf32>
    %253 = vector.broadcast %252 : vector<16x1xf32> to vector<16x16xf32>
    %254 = arith.subf %248, %253 : vector<16x16xf32>
    %255 = vector.broadcast %252 : vector<16x1xf32> to vector<16x16xf32>
    %256 = arith.subf %248, %255 : vector<16x16xf32>
    %257 = arith.mulf %254, %256 : vector<16x16xf32>
    %cst_89 = arith.constant dense<0.000000e+00> : vector<16xf32>
    %258 = vector.multi_reduction <add>, %257, %cst_89 [1] : vector<16x16xf32> to vector<16xf32>
    %259 = vector.shape_cast %258 : vector<16xf32> to vector<16x1xf32>
    %cst_90 = arith.constant 1.600000e+01 : f32
    %260 = vector.broadcast %cst_90 : f32 to vector<16x1xf32>
    %261 = arith.divf %259, %260 : vector<16x1xf32>
    %262 = vector.broadcast %252 : vector<16x1xf32> to vector<16x16xf32>
    %263 = arith.subf %248, %262 : vector<16x16xf32>
    %cst_91 = arith.constant 9.99999974E-6 : f32
    %264 = vector.broadcast %cst_91 : f32 to vector<16x1xf32>
    %265 = arith.addf %261, %264 : vector<16x1xf32>
    %266 = math.rsqrt %265 : vector<16x1xf32>
    %267 = vector.broadcast %266 : vector<16x1xf32> to vector<16x16xf32>
    %268 = arith.mulf %263, %267 : vector<16x16xf32>
    %c408 = arith.constant 408 : index
    %c0_92 = arith.constant 0 : index
    %269 = vector.load %arg2[%c408, %c0_92] : memref<816x128xf32, #tpu.memory_space<vmem>>, vector<1x16xf32>
    %270 = vector.broadcast %269 : vector<1x16xf32> to vector<16x16xf32>
    %271 = arith.mulf %268, %270 : vector<16x16xf32>
    %c416 = arith.constant 416 : index
    %c0_93 = arith.constant 0 : index
    %272 = vector.load %arg2[%c416, %c0_93] : memref<816x128xf32, #tpu.memory_space<vmem>>, vector<1x16xf32>
    %273 = vector.broadcast %272 : vector<1x16xf32> to vector<16x16xf32>
    %274 = arith.addf %271, %273 : vector<16x16xf32>
    %cst_94 = arith.constant 0.000000e+00 : f32
    %275 = vector.broadcast %cst_94 : f32 to vector<16x16xf32>
    %276 = arith.maximumf %274, %275 : vector<16x16xf32>
    %c424 = arith.constant 424 : index
    %c0_95 = arith.constant 0 : index
    %277 = vector.load %arg2[%c424, %c0_95] : memref<816x128xf32, #tpu.memory_space<vmem>>, vector<16x8xf32>
    %cst_96 = arith.constant dense<0.000000e+00> : vector<16x8xf32>
    %278 = tpu.matmul %276, %277, %cst_96 {dimension_numbers = #tpu.dot_dimension_numbers<[1], [0], [0], [1], [0, 0, 1, 1], [], []>} : vector<16x16xf32>, vector<16x8xf32>, vector<16x8xf32> -> vector<16x8xf32>
    %c440 = arith.constant 440 : index
    %c0_97 = arith.constant 0 : index
    %279 = vector.load %arg2[%c440, %c0_97] : memref<816x128xf32, #tpu.memory_space<vmem>>, vector<1x8xf32>
    %280 = vector.broadcast %279 : vector<1x8xf32> to vector<16x8xf32>
    %281 = arith.addf %278, %280 : vector<16x8xf32>
    %cst_98 = arith.constant dense<0.000000e+00> : vector<16xf32>
    %282 = vector.multi_reduction <add>, %281, %cst_98 [1] : vector<16x8xf32> to vector<16xf32>
    %283 = vector.shape_cast %282 : vector<16xf32> to vector<16x1xf32>
    %cst_99 = arith.constant 8.000000e+00 : f32
    %284 = vector.broadcast %cst_99 : f32 to vector<16x1xf32>
    %285 = arith.divf %283, %284 : vector<16x1xf32>
    %286 = vector.broadcast %285 : vector<16x1xf32> to vector<16x8xf32>
    %287 = arith.subf %281, %286 : vector<16x8xf32>
    %288 = vector.broadcast %285 : vector<16x1xf32> to vector<16x8xf32>
    %289 = arith.subf %281, %288 : vector<16x8xf32>
    %290 = arith.mulf %287, %289 : vector<16x8xf32>
    %cst_100 = arith.constant dense<0.000000e+00> : vector<16xf32>
    %291 = vector.multi_reduction <add>, %290, %cst_100 [1] : vector<16x8xf32> to vector<16xf32>
    %292 = vector.shape_cast %291 : vector<16xf32> to vector<16x1xf32>
    %cst_101 = arith.constant 8.000000e+00 : f32
    %293 = vector.broadcast %cst_101 : f32 to vector<16x1xf32>
    %294 = arith.divf %292, %293 : vector<16x1xf32>
    %295 = vector.broadcast %285 : vector<16x1xf32> to vector<16x8xf32>
    %296 = arith.subf %281, %295 : vector<16x8xf32>
    %cst_102 = arith.constant 9.99999974E-6 : f32
    %297 = vector.broadcast %cst_102 : f32 to vector<16x1xf32>
    %298 = arith.addf %294, %297 : vector<16x1xf32>
    %299 = math.rsqrt %298 : vector<16x1xf32>
    %300 = vector.broadcast %299 : vector<16x1xf32> to vector<16x8xf32>
    %301 = arith.mulf %296, %300 : vector<16x8xf32>
    %c448 = arith.constant 448 : index
    %c0_103 = arith.constant 0 : index
    %302 = vector.load %arg2[%c448, %c0_103] : memref<816x128xf32, #tpu.memory_space<vmem>>, vector<1x8xf32>
    %303 = vector.broadcast %302 : vector<1x8xf32> to vector<16x8xf32>
    %304 = arith.mulf %301, %303 : vector<16x8xf32>
    %c456 = arith.constant 456 : index
    %c0_104 = arith.constant 0 : index
    %305 = vector.load %arg2[%c456, %c0_104] : memref<816x128xf32, #tpu.memory_space<vmem>>, vector<1x8xf32>
    %306 = vector.broadcast %305 : vector<1x8xf32> to vector<16x8xf32>
    %307 = arith.addf %304, %306 : vector<16x8xf32>
    %cst_105 = arith.constant 0.000000e+00 : f32
    %308 = vector.broadcast %cst_105 : f32 to vector<16x8xf32>
    %309 = arith.maximumf %307, %308 : vector<16x8xf32>
    %c464 = arith.constant 464 : index
    %c0_106 = arith.constant 0 : index
    %310 = vector.load %arg2[%c464, %c0_106] : memref<816x128xf32, #tpu.memory_space<vmem>>, vector<8x1xf32>
    %cst_107 = arith.constant dense<0.000000e+00> : vector<16x1xf32>
    %311 = tpu.matmul %309, %310, %cst_107 {dimension_numbers = #tpu.dot_dimension_numbers<[1], [0], [0], [1], [0, 0, 1, 1], [], []>} : vector<16x8xf32>, vector<8x1xf32>, vector<16x1xf32> -> vector<16x1xf32>
    %c472 = arith.constant 472 : index
    %c0_108 = arith.constant 0 : index
    %312 = vector.load %arg2[%c472, %c0_108] : memref<816x128xf32, #tpu.memory_space<vmem>>, vector<1x1xf32>
    %313 = vector.broadcast %312 : vector<1x1xf32> to vector<16x1xf32>
    %314 = arith.addf %311, %313 : vector<16x1xf32>
    %c480 = arith.constant 480 : index
    %c0_109 = arith.constant 0 : index
    %315 = vector.load %arg2[%c480, %c0_109] : memref<816x128xf32, #tpu.memory_space<vmem>>, vector<16x24xf32>
    %cst_110 = arith.constant dense<0.000000e+00> : vector<16x24xf32>
    %316 = tpu.matmul %226, %315, %cst_110 {dimension_numbers = #tpu.dot_dimension_numbers<[1], [0], [0], [1], [0, 0, 1, 1], [], []>} : vector<16x16xf32>, vector<16x24xf32>, vector<16x24xf32> -> vector<16x24xf32>
    %c496 = arith.constant 496 : index
    %c0_111 = arith.constant 0 : index
    %317 = vector.load %arg2[%c496, %c0_111] : memref<816x128xf32, #tpu.memory_space<vmem>>, vector<1x24xf32>
    %318 = vector.broadcast %317 : vector<1x24xf32> to vector<16x24xf32>
    %319 = arith.addf %316, %318 : vector<16x24xf32>
    %320 = vector.extract_strided_slice %319 {offsets = [0, 0], sizes = [16, 16], strides = [1, 1]} : vector<16x24xf32> to vector<16x16xf32>
    %cst_112 = arith.constant dense<0.000000e+00> : vector<16xf32>
    %321 = vector.multi_reduction <add>, %320, %cst_112 [1] : vector<16x16xf32> to vector<16xf32>
    %322 = vector.shape_cast %321 : vector<16xf32> to vector<16x1xf32>
    %cst_113 = arith.constant 1.600000e+01 : f32
    %323 = vector.broadcast %cst_113 : f32 to vector<16x1xf32>
    %324 = arith.divf %322, %323 : vector<16x1xf32>
    %325 = vector.broadcast %324 : vector<16x1xf32> to vector<16x16xf32>
    %326 = arith.subf %320, %325 : vector<16x16xf32>
    %327 = vector.broadcast %324 : vector<16x1xf32> to vector<16x16xf32>
    %328 = arith.subf %320, %327 : vector<16x16xf32>
    %329 = arith.mulf %326, %328 : vector<16x16xf32>
    %cst_114 = arith.constant dense<0.000000e+00> : vector<16xf32>
    %330 = vector.multi_reduction <add>, %329, %cst_114 [1] : vector<16x16xf32> to vector<16xf32>
    %331 = vector.shape_cast %330 : vector<16xf32> to vector<16x1xf32>
    %cst_115 = arith.constant 1.600000e+01 : f32
    %332 = vector.broadcast %cst_115 : f32 to vector<16x1xf32>
    %333 = arith.divf %331, %332 : vector<16x1xf32>
    %334 = vector.broadcast %324 : vector<16x1xf32> to vector<16x16xf32>
    %335 = arith.subf %320, %334 : vector<16x16xf32>
    %cst_116 = arith.constant 9.99999974E-6 : f32
    %336 = vector.broadcast %cst_116 : f32 to vector<16x1xf32>
    %337 = arith.addf %333, %336 : vector<16x1xf32>
    %338 = math.rsqrt %337 : vector<16x1xf32>
    %339 = vector.broadcast %338 : vector<16x1xf32> to vector<16x16xf32>
    %340 = arith.mulf %335, %339 : vector<16x16xf32>
    %c504 = arith.constant 504 : index
    %c0_117 = arith.constant 0 : index
    %341 = vector.load %arg2[%c504, %c0_117] : memref<816x128xf32, #tpu.memory_space<vmem>>, vector<1x16xf32>
    %342 = vector.broadcast %341 : vector<1x16xf32> to vector<16x16xf32>
    %343 = arith.mulf %340, %342 : vector<16x16xf32>
    %c512 = arith.constant 512 : index
    %c0_118 = arith.constant 0 : index
    %344 = vector.load %arg2[%c512, %c0_118] : memref<816x128xf32, #tpu.memory_space<vmem>>, vector<1x16xf32>
    %345 = vector.broadcast %344 : vector<1x16xf32> to vector<16x16xf32>
    %346 = arith.addf %343, %345 : vector<16x16xf32>
    %cst_119 = arith.constant 0.000000e+00 : f32
    %347 = vector.broadcast %cst_119 : f32 to vector<16x16xf32>
    %348 = arith.maximumf %346, %347 : vector<16x16xf32>
    %c536 = arith.constant 536 : index
    %c0_120 = arith.constant 0 : index
    %349 = vector.load %arg2[%c536, %c0_120] : memref<816x128xf32, #tpu.memory_space<vmem>>, vector<16x16xf32>
    %cst_121 = arith.constant dense<0.000000e+00> : vector<16x16xf32>
    %350 = tpu.matmul %348, %349, %cst_121 {dimension_numbers = #tpu.dot_dimension_numbers<[1], [0], [0], [1], [0, 0, 1, 1], [], []>} : vector<16x16xf32>, vector<16x16xf32>, vector<16x16xf32> -> vector<16x16xf32>
    %c552 = arith.constant 552 : index
    %c0_122 = arith.constant 0 : index
    %351 = vector.load %arg2[%c552, %c0_122] : memref<816x128xf32, #tpu.memory_space<vmem>>, vector<1x16xf32>
    %352 = vector.broadcast %351 : vector<1x16xf32> to vector<16x16xf32>
    %353 = arith.addf %350, %352 : vector<16x16xf32>
    %cst_123 = arith.constant dense<0.000000e+00> : vector<16xf32>
    %354 = vector.multi_reduction <add>, %353, %cst_123 [1] : vector<16x16xf32> to vector<16xf32>
    %355 = vector.shape_cast %354 : vector<16xf32> to vector<16x1xf32>
    %cst_124 = arith.constant 1.600000e+01 : f32
    %356 = vector.broadcast %cst_124 : f32 to vector<16x1xf32>
    %357 = arith.divf %355, %356 : vector<16x1xf32>
    %358 = vector.broadcast %357 : vector<16x1xf32> to vector<16x16xf32>
    %359 = arith.subf %353, %358 : vector<16x16xf32>
    %360 = vector.broadcast %357 : vector<16x1xf32> to vector<16x16xf32>
    %361 = arith.subf %353, %360 : vector<16x16xf32>
    %362 = arith.mulf %359, %361 : vector<16x16xf32>
    %cst_125 = arith.constant dense<0.000000e+00> : vector<16xf32>
    %363 = vector.multi_reduction <add>, %362, %cst_125 [1] : vector<16x16xf32> to vector<16xf32>
    %364 = vector.shape_cast %363 : vector<16xf32> to vector<16x1xf32>
    %cst_126 = arith.constant 1.600000e+01 : f32
    %365 = vector.broadcast %cst_126 : f32 to vector<16x1xf32>
    %366 = arith.divf %364, %365 : vector<16x1xf32>
    %367 = vector.broadcast %357 : vector<16x1xf32> to vector<16x16xf32>
    %368 = arith.subf %353, %367 : vector<16x16xf32>
    %cst_127 = arith.constant 9.99999974E-6 : f32
    %369 = vector.broadcast %cst_127 : f32 to vector<16x1xf32>
    %370 = arith.addf %366, %369 : vector<16x1xf32>
    %371 = math.rsqrt %370 : vector<16x1xf32>
    %372 = vector.broadcast %371 : vector<16x1xf32> to vector<16x16xf32>
    %373 = arith.mulf %368, %372 : vector<16x16xf32>
    %c560 = arith.constant 560 : index
    %c0_128 = arith.constant 0 : index
    %374 = vector.load %arg2[%c560, %c0_128] : memref<816x128xf32, #tpu.memory_space<vmem>>, vector<1x16xf32>
    %375 = vector.broadcast %374 : vector<1x16xf32> to vector<16x16xf32>
    %376 = arith.mulf %373, %375 : vector<16x16xf32>
    %c568 = arith.constant 568 : index
    %c0_129 = arith.constant 0 : index
    %377 = vector.load %arg2[%c568, %c0_129] : memref<816x128xf32, #tpu.memory_space<vmem>>, vector<1x16xf32>
    %378 = vector.broadcast %377 : vector<1x16xf32> to vector<16x16xf32>
    %379 = arith.addf %376, %378 : vector<16x16xf32>
    %380 = arith.negf %379 : vector<16x16xf32>
    %381 = math.exp %380 : vector<16x16xf32>
    %cst_130 = arith.constant 1.000000e+00 : f32
    %382 = vector.broadcast %cst_130 : f32 to vector<16x16xf32>
    %383 = arith.addf %382, %381 : vector<16x16xf32>
    %384 = arith.divf %382, %383 : vector<16x16xf32>
    %385 = arith.mulf %226, %384 : vector<16x16xf32>
    %cst_131 = arith.constant 1.100000e+00 : f32
    %386 = vector.broadcast %cst_131 : f32 to vector<16x16xf32>
    %387 = arith.mulf %385, %386 : vector<16x16xf32>
    %388 = vector.extract_strided_slice %319 {offsets = [0, 16], sizes = [16, 8], strides = [1, 1]} : vector<16x24xf32> to vector<16x8xf32>
    %cst_132 = arith.constant dense<0.000000e+00> : vector<16xf32>
    %389 = vector.multi_reduction <add>, %388, %cst_132 [1] : vector<16x8xf32> to vector<16xf32>
    %390 = vector.shape_cast %389 : vector<16xf32> to vector<16x1xf32>
    %cst_133 = arith.constant 8.000000e+00 : f32
    %391 = vector.broadcast %cst_133 : f32 to vector<16x1xf32>
    %392 = arith.divf %390, %391 : vector<16x1xf32>
    %393 = vector.broadcast %392 : vector<16x1xf32> to vector<16x8xf32>
    %394 = arith.subf %388, %393 : vector<16x8xf32>
    %395 = vector.broadcast %392 : vector<16x1xf32> to vector<16x8xf32>
    %396 = arith.subf %388, %395 : vector<16x8xf32>
    %397 = arith.mulf %394, %396 : vector<16x8xf32>
    %cst_134 = arith.constant dense<0.000000e+00> : vector<16xf32>
    %398 = vector.multi_reduction <add>, %397, %cst_134 [1] : vector<16x8xf32> to vector<16xf32>
    %399 = vector.shape_cast %398 : vector<16xf32> to vector<16x1xf32>
    %cst_135 = arith.constant 8.000000e+00 : f32
    %400 = vector.broadcast %cst_135 : f32 to vector<16x1xf32>
    %401 = arith.divf %399, %400 : vector<16x1xf32>
    %402 = vector.broadcast %392 : vector<16x1xf32> to vector<16x8xf32>
    %403 = arith.subf %388, %402 : vector<16x8xf32>
    %cst_136 = arith.constant 9.99999974E-6 : f32
    %404 = vector.broadcast %cst_136 : f32 to vector<16x1xf32>
    %405 = arith.addf %401, %404 : vector<16x1xf32>
    %406 = math.rsqrt %405 : vector<16x1xf32>
    %407 = vector.broadcast %406 : vector<16x1xf32> to vector<16x8xf32>
    %408 = arith.mulf %403, %407 : vector<16x8xf32>
    %c520 = arith.constant 520 : index
    %c0_137 = arith.constant 0 : index
    %409 = vector.load %arg2[%c520, %c0_137] : memref<816x128xf32, #tpu.memory_space<vmem>>, vector<1x8xf32>
    %410 = vector.broadcast %409 : vector<1x8xf32> to vector<16x8xf32>
    %411 = arith.mulf %408, %410 : vector<16x8xf32>
    %c528 = arith.constant 528 : index
    %c0_138 = arith.constant 0 : index
    %412 = vector.load %arg2[%c528, %c0_138] : memref<816x128xf32, #tpu.memory_space<vmem>>, vector<1x8xf32>
    %413 = vector.broadcast %412 : vector<1x8xf32> to vector<16x8xf32>
    %414 = arith.addf %411, %413 : vector<16x8xf32>
    %cst_139 = arith.constant 0.000000e+00 : f32
    %415 = vector.broadcast %cst_139 : f32 to vector<16x8xf32>
    %416 = arith.maximumf %414, %415 : vector<16x8xf32>
    %c576 = arith.constant 576 : index
    %c0_140 = arith.constant 0 : index
    %417 = vector.load %arg2[%c576, %c0_140] : memref<816x128xf32, #tpu.memory_space<vmem>>, vector<8x4xf32>
    %cst_141 = arith.constant dense<0.000000e+00> : vector<16x4xf32>
    %418 = tpu.matmul %416, %417, %cst_141 {dimension_numbers = #tpu.dot_dimension_numbers<[1], [0], [0], [1], [0, 0, 1, 1], [], []>} : vector<16x8xf32>, vector<8x4xf32>, vector<16x4xf32> -> vector<16x4xf32>
    %c584 = arith.constant 584 : index
    %c0_142 = arith.constant 0 : index
    %419 = vector.load %arg2[%c584, %c0_142] : memref<816x128xf32, #tpu.memory_space<vmem>>, vector<1x4xf32>
    %420 = vector.broadcast %419 : vector<1x4xf32> to vector<16x4xf32>
    %421 = arith.addf %418, %420 : vector<16x4xf32>
    %cst_143 = arith.constant dense<0.000000e+00> : vector<16xf32>
    %422 = vector.multi_reduction <add>, %421, %cst_143 [1] : vector<16x4xf32> to vector<16xf32>
    %423 = vector.shape_cast %422 : vector<16xf32> to vector<16x1xf32>
    %cst_144 = arith.constant 4.000000e+00 : f32
    %424 = vector.broadcast %cst_144 : f32 to vector<16x1xf32>
    %425 = arith.divf %423, %424 : vector<16x1xf32>
    %426 = vector.broadcast %425 : vector<16x1xf32> to vector<16x4xf32>
    %427 = arith.subf %421, %426 : vector<16x4xf32>
    %428 = vector.broadcast %425 : vector<16x1xf32> to vector<16x4xf32>
    %429 = arith.subf %421, %428 : vector<16x4xf32>
    %430 = arith.mulf %427, %429 : vector<16x4xf32>
    %cst_145 = arith.constant dense<0.000000e+00> : vector<16xf32>
    %431 = vector.multi_reduction <add>, %430, %cst_145 [1] : vector<16x4xf32> to vector<16xf32>
    %432 = vector.shape_cast %431 : vector<16xf32> to vector<16x1xf32>
    %cst_146 = arith.constant 4.000000e+00 : f32
    %433 = vector.broadcast %cst_146 : f32 to vector<16x1xf32>
    %434 = arith.divf %432, %433 : vector<16x1xf32>
    %435 = vector.broadcast %425 : vector<16x1xf32> to vector<16x4xf32>
    %436 = arith.subf %421, %435 : vector<16x4xf32>
    %cst_147 = arith.constant 9.99999974E-6 : f32
    %437 = vector.broadcast %cst_147 : f32 to vector<16x1xf32>
    %438 = arith.addf %434, %437 : vector<16x1xf32>
    %439 = math.rsqrt %438 : vector<16x1xf32>
    %440 = vector.broadcast %439 : vector<16x1xf32> to vector<16x4xf32>
    %441 = arith.mulf %436, %440 : vector<16x4xf32>
    %c592 = arith.constant 592 : index
    %c0_148 = arith.constant 0 : index
    %442 = vector.load %arg2[%c592, %c0_148] : memref<816x128xf32, #tpu.memory_space<vmem>>, vector<1x4xf32>
    %443 = vector.broadcast %442 : vector<1x4xf32> to vector<16x4xf32>
    %444 = arith.mulf %441, %443 : vector<16x4xf32>
    %c600 = arith.constant 600 : index
    %c0_149 = arith.constant 0 : index
    %445 = vector.load %arg2[%c600, %c0_149] : memref<816x128xf32, #tpu.memory_space<vmem>>, vector<1x4xf32>
    %446 = vector.broadcast %445 : vector<1x4xf32> to vector<16x4xf32>
    %447 = arith.addf %444, %446 : vector<16x4xf32>
    %cst_150 = arith.constant 0.000000e+00 : f32
    %448 = vector.broadcast %cst_150 : f32 to vector<16x4xf32>
    %449 = arith.maximumf %447, %448 : vector<16x4xf32>
    %c608 = arith.constant 608 : index
    %c0_151 = arith.constant 0 : index
    %450 = vector.load %arg2[%c608, %c0_151] : memref<816x128xf32, #tpu.memory_space<vmem>>, vector<4x1xf32>
    %cst_152 = arith.constant dense<0.000000e+00> : vector<16x1xf32>
    %451 = tpu.matmul %449, %450, %cst_152 {dimension_numbers = #tpu.dot_dimension_numbers<[1], [0], [0], [1], [0, 0, 1, 1], [], []>} : vector<16x4xf32>, vector<4x1xf32>, vector<16x1xf32> -> vector<16x1xf32>
    %c616 = arith.constant 616 : index
    %c0_153 = arith.constant 0 : index
    %452 = vector.load %arg2[%c616, %c0_153] : memref<816x128xf32, #tpu.memory_space<vmem>>, vector<1x1xf32>
    %453 = vector.broadcast %452 : vector<1x1xf32> to vector<16x1xf32>
    %454 = arith.addf %451, %453 : vector<16x1xf32>
    %455 = arith.negf %454 : vector<16x1xf32>
    %456 = math.exp %455 : vector<16x1xf32>
    %cst_154 = arith.constant 1.000000e+00 : f32
    %457 = vector.broadcast %cst_154 : f32 to vector<16x1xf32>
    %458 = arith.addf %457, %456 : vector<16x1xf32>
    %459 = arith.divf %457, %458 : vector<16x1xf32>
    %460 = vector.broadcast %459 : vector<16x1xf32> to vector<16x16xf32>
    %461 = arith.mulf %226, %460 : vector<16x16xf32>
    %cst_155 = arith.constant 0.899999976 : f32
    %462 = vector.broadcast %cst_155 : f32 to vector<16x16xf32>
    %463 = arith.mulf %461, %462 : vector<16x16xf32>
    %c624 = arith.constant 624 : index
    %c0_156 = arith.constant 0 : index
    %464 = vector.load %arg2[%c624, %c0_156] : memref<816x128xf32, #tpu.memory_space<vmem>>, vector<16x16xf32>
    %cst_157 = arith.constant dense<0.000000e+00> : vector<16x16xf32>
    %465 = tpu.matmul %387, %464, %cst_157 {dimension_numbers = #tpu.dot_dimension_numbers<[1], [0], [0], [1], [0, 0, 1, 1], [], []>} : vector<16x16xf32>, vector<16x16xf32>, vector<16x16xf32> -> vector<16x16xf32>
    %c640 = arith.constant 640 : index
    %c0_158 = arith.constant 0 : index
    %466 = vector.load %arg2[%c640, %c0_158] : memref<816x128xf32, #tpu.memory_space<vmem>>, vector<16x16xf32>
    %cst_159 = arith.constant dense<0.000000e+00> : vector<16x16xf32>
    %467 = tpu.matmul %463, %466, %cst_159 {dimension_numbers = #tpu.dot_dimension_numbers<[1], [0], [0], [1], [0, 0, 1, 1], [], []>} : vector<16x16xf32>, vector<16x16xf32>, vector<16x16xf32> -> vector<16x16xf32>
    %468 = arith.addf %465, %467 : vector<16x16xf32>
    %c656 = arith.constant 656 : index
    %c0_160 = arith.constant 0 : index
    %469 = vector.load %arg2[%c656, %c0_160] : memref<816x128xf32, #tpu.memory_space<vmem>>, vector<1x16xf32>
    %470 = vector.broadcast %469 : vector<1x16xf32> to vector<16x16xf32>
    %471 = arith.addf %468, %470 : vector<16x16xf32>
    %cst_161 = arith.constant dense<0.000000e+00> : vector<16xf32>
    %472 = vector.multi_reduction <add>, %471, %cst_161 [1] : vector<16x16xf32> to vector<16xf32>
    %473 = vector.shape_cast %472 : vector<16xf32> to vector<16x1xf32>
    %cst_162 = arith.constant 1.600000e+01 : f32
    %474 = vector.broadcast %cst_162 : f32 to vector<16x1xf32>
    %475 = arith.divf %473, %474 : vector<16x1xf32>
    %476 = vector.broadcast %475 : vector<16x1xf32> to vector<16x16xf32>
    %477 = arith.subf %471, %476 : vector<16x16xf32>
    %478 = vector.broadcast %475 : vector<16x1xf32> to vector<16x16xf32>
    %479 = arith.subf %471, %478 : vector<16x16xf32>
    %480 = arith.mulf %477, %479 : vector<16x16xf32>
    %cst_163 = arith.constant dense<0.000000e+00> : vector<16xf32>
    %481 = vector.multi_reduction <add>, %480, %cst_163 [1] : vector<16x16xf32> to vector<16xf32>
    %482 = vector.shape_cast %481 : vector<16xf32> to vector<16x1xf32>
    %cst_164 = arith.constant 1.600000e+01 : f32
    %483 = vector.broadcast %cst_164 : f32 to vector<16x1xf32>
    %484 = arith.divf %482, %483 : vector<16x1xf32>
    %485 = vector.broadcast %475 : vector<16x1xf32> to vector<16x16xf32>
    %486 = arith.subf %471, %485 : vector<16x16xf32>
    %cst_165 = arith.constant 9.99999974E-6 : f32
    %487 = vector.broadcast %cst_165 : f32 to vector<16x1xf32>
    %488 = arith.addf %484, %487 : vector<16x1xf32>
    %489 = math.rsqrt %488 : vector<16x1xf32>
    %490 = vector.broadcast %489 : vector<16x1xf32> to vector<16x16xf32>
    %491 = arith.mulf %486, %490 : vector<16x16xf32>
    %c664 = arith.constant 664 : index
    %c0_166 = arith.constant 0 : index
    %492 = vector.load %arg2[%c664, %c0_166] : memref<816x128xf32, #tpu.memory_space<vmem>>, vector<1x16xf32>
    %493 = vector.broadcast %492 : vector<1x16xf32> to vector<16x16xf32>
    %494 = arith.mulf %491, %493 : vector<16x16xf32>
    %c672 = arith.constant 672 : index
    %c0_167 = arith.constant 0 : index
    %495 = vector.load %arg2[%c672, %c0_167] : memref<816x128xf32, #tpu.memory_space<vmem>>, vector<1x16xf32>
    %496 = vector.broadcast %495 : vector<1x16xf32> to vector<16x16xf32>
    %497 = arith.addf %494, %496 : vector<16x16xf32>
    %cst_168 = arith.constant 0.000000e+00 : f32
    %498 = vector.broadcast %cst_168 : f32 to vector<16x16xf32>
    %499 = arith.maximumf %497, %498 : vector<16x16xf32>
    %c680 = arith.constant 680 : index
    %c0_169 = arith.constant 0 : index
    %500 = vector.load %arg2[%c680, %c0_169] : memref<816x128xf32, #tpu.memory_space<vmem>>, vector<16x16xf32>
    %cst_170 = arith.constant dense<0.000000e+00> : vector<16x16xf32>
    %501 = tpu.matmul %499, %500, %cst_170 {dimension_numbers = #tpu.dot_dimension_numbers<[1], [0], [0], [1], [0, 0, 1, 1], [], []>} : vector<16x16xf32>, vector<16x16xf32>, vector<16x16xf32> -> vector<16x16xf32>
    %c696 = arith.constant 696 : index
    %c0_171 = arith.constant 0 : index
    %502 = vector.load %arg2[%c696, %c0_171] : memref<816x128xf32, #tpu.memory_space<vmem>>, vector<1x16xf32>
    %503 = vector.broadcast %502 : vector<1x16xf32> to vector<16x16xf32>
    %504 = arith.addf %501, %503 : vector<16x16xf32>
    %cst_172 = arith.constant dense<0.000000e+00> : vector<16xf32>
    %505 = vector.multi_reduction <add>, %504, %cst_172 [1] : vector<16x16xf32> to vector<16xf32>
    %506 = vector.shape_cast %505 : vector<16xf32> to vector<16x1xf32>
    %cst_173 = arith.constant 1.600000e+01 : f32
    %507 = vector.broadcast %cst_173 : f32 to vector<16x1xf32>
    %508 = arith.divf %506, %507 : vector<16x1xf32>
    %509 = vector.broadcast %508 : vector<16x1xf32> to vector<16x16xf32>
    %510 = arith.subf %504, %509 : vector<16x16xf32>
    %511 = vector.broadcast %508 : vector<16x1xf32> to vector<16x16xf32>
    %512 = arith.subf %504, %511 : vector<16x16xf32>
    %513 = arith.mulf %510, %512 : vector<16x16xf32>
    %cst_174 = arith.constant dense<0.000000e+00> : vector<16xf32>
    %514 = vector.multi_reduction <add>, %513, %cst_174 [1] : vector<16x16xf32> to vector<16xf32>
    %515 = vector.shape_cast %514 : vector<16xf32> to vector<16x1xf32>
    %cst_175 = arith.constant 1.600000e+01 : f32
    %516 = vector.broadcast %cst_175 : f32 to vector<16x1xf32>
    %517 = arith.divf %515, %516 : vector<16x1xf32>
    %518 = vector.broadcast %508 : vector<16x1xf32> to vector<16x16xf32>
    %519 = arith.subf %504, %518 : vector<16x16xf32>
    %cst_176 = arith.constant 9.99999974E-6 : f32
    %520 = vector.broadcast %cst_176 : f32 to vector<16x1xf32>
    %521 = arith.addf %517, %520 : vector<16x1xf32>
    %522 = math.rsqrt %521 : vector<16x1xf32>
    %523 = vector.broadcast %522 : vector<16x1xf32> to vector<16x16xf32>
    %524 = arith.mulf %519, %523 : vector<16x16xf32>
    %c704 = arith.constant 704 : index
    %c0_177 = arith.constant 0 : index
    %525 = vector.load %arg2[%c704, %c0_177] : memref<816x128xf32, #tpu.memory_space<vmem>>, vector<1x16xf32>
    %526 = vector.broadcast %525 : vector<1x16xf32> to vector<16x16xf32>
    %527 = arith.mulf %524, %526 : vector<16x16xf32>
    %c712 = arith.constant 712 : index
    %c0_178 = arith.constant 0 : index
    %528 = vector.load %arg2[%c712, %c0_178] : memref<816x128xf32, #tpu.memory_space<vmem>>, vector<1x16xf32>
    %529 = vector.broadcast %528 : vector<1x16xf32> to vector<16x16xf32>
    %530 = arith.addf %527, %529 : vector<16x16xf32>
    %cst_179 = arith.constant 0.000000e+00 : f32
    %531 = vector.broadcast %cst_179 : f32 to vector<16x16xf32>
    %532 = arith.maximumf %530, %531 : vector<16x16xf32>
    %533 = arith.addf %532, %226 : vector<16x16xf32>
    %c720 = arith.constant 720 : index
    %c0_180 = arith.constant 0 : index
    %534 = vector.load %arg2[%c720, %c0_180] : memref<816x128xf32, #tpu.memory_space<vmem>>, vector<16x16xf32>
    %cst_181 = arith.constant dense<0.000000e+00> : vector<16x16xf32>
    %535 = tpu.matmul %533, %534, %cst_181 {dimension_numbers = #tpu.dot_dimension_numbers<[1], [0], [0], [1], [0, 0, 1, 1], [], []>} : vector<16x16xf32>, vector<16x16xf32>, vector<16x16xf32> -> vector<16x16xf32>
    %c736 = arith.constant 736 : index
    %c0_182 = arith.constant 0 : index
    %536 = vector.load %arg2[%c736, %c0_182] : memref<816x128xf32, #tpu.memory_space<vmem>>, vector<1x16xf32>
    %537 = vector.broadcast %536 : vector<1x16xf32> to vector<16x16xf32>
    %538 = arith.addf %535, %537 : vector<16x16xf32>
    %cst_183 = arith.constant dense<0.000000e+00> : vector<16xf32>
    %539 = vector.multi_reduction <add>, %538, %cst_183 [1] : vector<16x16xf32> to vector<16xf32>
    %540 = vector.shape_cast %539 : vector<16xf32> to vector<16x1xf32>
    %cst_184 = arith.constant 1.600000e+01 : f32
    %541 = vector.broadcast %cst_184 : f32 to vector<16x1xf32>
    %542 = arith.divf %540, %541 : vector<16x1xf32>
    %543 = vector.broadcast %542 : vector<16x1xf32> to vector<16x16xf32>
    %544 = arith.subf %538, %543 : vector<16x16xf32>
    %545 = vector.broadcast %542 : vector<16x1xf32> to vector<16x16xf32>
    %546 = arith.subf %538, %545 : vector<16x16xf32>
    %547 = arith.mulf %544, %546 : vector<16x16xf32>
    %cst_185 = arith.constant dense<0.000000e+00> : vector<16xf32>
    %548 = vector.multi_reduction <add>, %547, %cst_185 [1] : vector<16x16xf32> to vector<16xf32>
    %549 = vector.shape_cast %548 : vector<16xf32> to vector<16x1xf32>
    %cst_186 = arith.constant 1.600000e+01 : f32
    %550 = vector.broadcast %cst_186 : f32 to vector<16x1xf32>
    %551 = arith.divf %549, %550 : vector<16x1xf32>
    %552 = vector.broadcast %542 : vector<16x1xf32> to vector<16x16xf32>
    %553 = arith.subf %538, %552 : vector<16x16xf32>
    %cst_187 = arith.constant 9.99999974E-6 : f32
    %554 = vector.broadcast %cst_187 : f32 to vector<16x1xf32>
    %555 = arith.addf %551, %554 : vector<16x1xf32>
    %556 = math.rsqrt %555 : vector<16x1xf32>
    %557 = vector.broadcast %556 : vector<16x1xf32> to vector<16x16xf32>
    %558 = arith.mulf %553, %557 : vector<16x16xf32>
    %c744 = arith.constant 744 : index
    %c0_188 = arith.constant 0 : index
    %559 = vector.load %arg2[%c744, %c0_188] : memref<816x128xf32, #tpu.memory_space<vmem>>, vector<1x16xf32>
    %560 = vector.broadcast %559 : vector<1x16xf32> to vector<16x16xf32>
    %561 = arith.mulf %558, %560 : vector<16x16xf32>
    %c752 = arith.constant 752 : index
    %c0_189 = arith.constant 0 : index
    %562 = vector.load %arg2[%c752, %c0_189] : memref<816x128xf32, #tpu.memory_space<vmem>>, vector<1x16xf32>
    %563 = vector.broadcast %562 : vector<1x16xf32> to vector<16x16xf32>
    %564 = arith.addf %561, %563 : vector<16x16xf32>
    %cst_190 = arith.constant 0.000000e+00 : f32
    %565 = vector.broadcast %cst_190 : f32 to vector<16x16xf32>
    %566 = arith.maximumf %564, %565 : vector<16x16xf32>
    %c760 = arith.constant 760 : index
    %c0_191 = arith.constant 0 : index
    %567 = vector.load %arg2[%c760, %c0_191] : memref<816x128xf32, #tpu.memory_space<vmem>>, vector<16x8xf32>
    %cst_192 = arith.constant dense<0.000000e+00> : vector<16x8xf32>
    %568 = tpu.matmul %566, %567, %cst_192 {dimension_numbers = #tpu.dot_dimension_numbers<[1], [0], [0], [1], [0, 0, 1, 1], [], []>} : vector<16x16xf32>, vector<16x8xf32>, vector<16x8xf32> -> vector<16x8xf32>
    %c776 = arith.constant 776 : index
    %c0_193 = arith.constant 0 : index
    %569 = vector.load %arg2[%c776, %c0_193] : memref<816x128xf32, #tpu.memory_space<vmem>>, vector<1x8xf32>
    %570 = vector.broadcast %569 : vector<1x8xf32> to vector<16x8xf32>
    %571 = arith.addf %568, %570 : vector<16x8xf32>
    %cst_194 = arith.constant dense<0.000000e+00> : vector<16xf32>
    %572 = vector.multi_reduction <add>, %571, %cst_194 [1] : vector<16x8xf32> to vector<16xf32>
    %573 = vector.shape_cast %572 : vector<16xf32> to vector<16x1xf32>
    %cst_195 = arith.constant 8.000000e+00 : f32
    %574 = vector.broadcast %cst_195 : f32 to vector<16x1xf32>
    %575 = arith.divf %573, %574 : vector<16x1xf32>
    %576 = vector.broadcast %575 : vector<16x1xf32> to vector<16x8xf32>
    %577 = arith.subf %571, %576 : vector<16x8xf32>
    %578 = vector.broadcast %575 : vector<16x1xf32> to vector<16x8xf32>
    %579 = arith.subf %571, %578 : vector<16x8xf32>
    %580 = arith.mulf %577, %579 : vector<16x8xf32>
    %cst_196 = arith.constant dense<0.000000e+00> : vector<16xf32>
    %581 = vector.multi_reduction <add>, %580, %cst_196 [1] : vector<16x8xf32> to vector<16xf32>
    %582 = vector.shape_cast %581 : vector<16xf32> to vector<16x1xf32>
    %cst_197 = arith.constant 8.000000e+00 : f32
    %583 = vector.broadcast %cst_197 : f32 to vector<16x1xf32>
    %584 = arith.divf %582, %583 : vector<16x1xf32>
    %585 = vector.broadcast %575 : vector<16x1xf32> to vector<16x8xf32>
    %586 = arith.subf %571, %585 : vector<16x8xf32>
    %cst_198 = arith.constant 9.99999974E-6 : f32
    %587 = vector.broadcast %cst_198 : f32 to vector<16x1xf32>
    %588 = arith.addf %584, %587 : vector<16x1xf32>
    %589 = math.rsqrt %588 : vector<16x1xf32>
    %590 = vector.broadcast %589 : vector<16x1xf32> to vector<16x8xf32>
    %591 = arith.mulf %586, %590 : vector<16x8xf32>
    %c784 = arith.constant 784 : index
    %c0_199 = arith.constant 0 : index
    %592 = vector.load %arg2[%c784, %c0_199] : memref<816x128xf32, #tpu.memory_space<vmem>>, vector<1x8xf32>
    %593 = vector.broadcast %592 : vector<1x8xf32> to vector<16x8xf32>
    %594 = arith.mulf %591, %593 : vector<16x8xf32>
    %c792 = arith.constant 792 : index
    %c0_200 = arith.constant 0 : index
    %595 = vector.load %arg2[%c792, %c0_200] : memref<816x128xf32, #tpu.memory_space<vmem>>, vector<1x8xf32>
    %596 = vector.broadcast %595 : vector<1x8xf32> to vector<16x8xf32>
    %597 = arith.addf %594, %596 : vector<16x8xf32>
    %cst_201 = arith.constant 0.000000e+00 : f32
    %598 = vector.broadcast %cst_201 : f32 to vector<16x8xf32>
    %599 = arith.maximumf %597, %598 : vector<16x8xf32>
    %c800 = arith.constant 800 : index
    %c0_202 = arith.constant 0 : index
    %600 = vector.load %arg2[%c800, %c0_202] : memref<816x128xf32, #tpu.memory_space<vmem>>, vector<8x1xf32>
    %cst_203 = arith.constant dense<0.000000e+00> : vector<16x1xf32>
    %601 = tpu.matmul %599, %600, %cst_203 {dimension_numbers = #tpu.dot_dimension_numbers<[1], [0], [0], [1], [0, 0, 1, 1], [], []>} : vector<16x8xf32>, vector<8x1xf32>, vector<16x1xf32> -> vector<16x1xf32>
    %c808 = arith.constant 808 : index
    %c0_204 = arith.constant 0 : index
    %602 = vector.load %arg2[%c808, %c0_204] : memref<816x128xf32, #tpu.memory_space<vmem>>, vector<1x1xf32>
    %603 = vector.broadcast %602 : vector<1x1xf32> to vector<16x1xf32>
    %604 = arith.addf %601, %603 : vector<16x1xf32>
    %605 = tpu.iota {dimensions = array<i32: 1>} : vector<16x2xi32>
    %c0_i32 = arith.constant 0 : i32
    %606 = vector.broadcast %c0_i32 : i32 to vector<16x2xi32>
    %607 = arith.cmpi eq, %605, %606 : vector<16x2xi32>
    %608 = vector.shape_cast %314 : vector<16x1xf32> to vector<16x1xf32>
    %609 = vector.broadcast %608 : vector<16x1xf32> to vector<16x2xf32>
    %610 = vector.shape_cast %604 : vector<16x1xf32> to vector<16x1xf32>
    %611 = vector.broadcast %610 : vector<16x1xf32> to vector<16x2xf32>
    %612 = arith.select %607, %609, %611 : vector<16x2xi1>, vector<16x2xf32>
    %c0_205 = arith.constant 0 : index
    %c0_206 = arith.constant 0 : index
    %c0_207 = arith.constant 0 : index
    %613 = vector.load %arg3[%c0_205, %c0_206, %c0_207] : memref<1x16x2xf32, #tpu.memory_space<vmem>>, vector<1x16x2xf32>
    %614 = vector.shape_cast %613 : vector<1x16x2xf32> to vector<16x2xf32>
    %615 = vector.shape_cast %612 : vector<16x2xf32> to vector<1x16x2xf32>
    tpu.vector_store %arg3[%c0_205, %c0_206, %c0_207], %615 {strides = array<i32>} : memref<1x16x2xf32, #tpu.memory_space<vmem>>, vector<1x16x2xf32>,
    return
  }
  func.func @transform_0(%arg0: i32) -> (i32, i32, i32) {
    %c0_i32 = arith.constant 0 : i32
    %c0_i32_0 = arith.constant 0 : i32
    %c0_i32_1 = arith.constant 0 : i32
    return %arg0, %c0_i32, %c0_i32_0 : i32, i32, i32
  }
  func.func @transform_1(%arg0: i32) -> (i32, i32) {
    %c0_i32 = arith.constant 0 : i32
    %c0_i32_0 = arith.constant 0 : i32
    %c0_i32_1 = arith.constant 0 : i32
    return %c0_i32, %c0_i32_0 : i32, i32
  }
  func.func @transform_2(%arg0: i32) -> (i32, i32, i32) {
    %c0_i32 = arith.constant 0 : i32
    %c0_i32_0 = arith.constant 0 : i32
    %c0_i32_1 = arith.constant 0 : i32
    return %arg0, %c0_i32, %c0_i32_0 : i32, i32, i32
  }
}

</mosaic_0001>

<bundles_post_ra>
// kernel: fwd.1
= control target key start
LH: loop header
LB: loop body
LE: loop exit
PB: predicated region body
PF: predicated region fallthrough
CT: control target
= control target key end

     0   :  { %7 = vsyncpa [#allocation3], 0  ;;  %s5735_s0 = inlined_call_operand.hbm [shape: f32[2,16,16], index: 0, kind: input, shape index: {}]   ;;  %s5736_s1 = inlined_call_operand.hbm [shape: f32[816,128], index: 1, kind: input, shape index: {}]   ;;  %s5737_s2 = inlined_call_operand.vmem [shape: f32[2,16,2], index: 2, kind: output, shape index: {}]  }
   0x1   :  { %9 = vsyncpa [#allocation3 + $0x1], 0 }
   0x2   :  { %10 = vsyncpa [#allocation5], 0  ;;  %s5269_s9 = smov 0   ;;  %s5271_s10 = smov 0  }
   0x3   :  { %s5273_s11 = smov 0   ;;  %s5275_s12 = smov 0  }
   0x4 LB: > { %s5288_s13 = sadd.s32 4294967295, %s5236_s12   ;;  %p36_p0 = scmp.ne.s32.totalorder %s5228_s10, %s5224_s9  ;;  %s5236_s12 = sphi %s5275_s12, %s5754_s12   ;;  %s5232_s11 = sphi %s5273_s11, %s5753_s11   ;;  %s5228_s10 = sphi %s5271_s10, %s5752_s10   ;;  %s5224_s9 = sphi %s5269_s9, %s5751_s9  }
   0x5   : > { %p5738_p1 = scmp.eq.s32.totalorder %s5288_s13, 0  ;;  %p4227_p2 = scmp.ge.s32.totalorder %s5236_s12, 1 }
   0x6   : > { %p94_p3 = scmp.lt.s32.totalorder %s5236_s12, 3  ;;  %s5238_s16 = smov [#allocation4]  }
   0x7   : > { %p5296_p4 = por %p5738_p1, %p36_p0  ;;  %s106_s17 = sshll.u32 %s5238_s16, 4  ;;  %s107_s17 = int_to_ptr.vmem [resolvable:$true] %s106_s17 }
   0x8   : > { %p5300_p5 = pnand %p4227_p2, %p94_p3  ;;  %s5313_s19 = sadd.s32 1, %s5236_s12  }
   0x9   : > { %s5741_s14 = scalar_select %p5296_p4, 1, 0 }
   0xa   : > { %s5742_s15 = scalar_select %p5300_p5, 1, 0 }
   0xb   : > { %p4936_p6 = pneg %p5300_p5  ;;  %s23_s20 = sadd.s32 1, %s5232_s11 }
   0xc   : > { %s20_s21 = ssub.s32 %s5236_s12, %s5313_s19  ;;  %s5140_s24 = scalar_lea.hbm %s5736_s1, 13056 }
   0xd   : > { %p5308_p7 = pnand %p4936_p6, %p5738_p1  ;;  %p5141_p8 = scmp.ne.s32.totalorder %s5736_s1, %s5140_s24 }
   0xe   : > { %p5147_p12 = scmp.lt.u32.totalorder %s5140_s24, %s5736_s1 }
   0xf   : > { %p5142_p9 = pneg %p5308_p7 }
  0x11   : > { %p5143_p10 = pnand %p5142_p9, %p5141_p8 }
  0x13   : > { %p5144_p11 = pneg %p5143_p10 }
  0x15   : > { %p5149_p13 = pnand %p5147_p12, %p5144_p11 }
  0x17   : > { %5152 = shalt.err (!%p5149_p13)
}
  0x18   : > { %s5153_s29 = scalar_lea.vmem %s107_s17, 13056  ;;  %p5161_p6 = scmp.lt.s32.totalorder %s107_s17, %s107_s17 }
  0x19   : > { %p5154_p0 = scmp.ne.s32.totalorder %s107_s17, %s5153_s29  ;;  %p5162_p1 = scmp.lt.s32.totalorder %s5153_s29, %s5153_s29 }
  0x1b   : > { %p5156_p2 = pnand %p5154_p0, %p5142_p9  ;;  %p5163_p4 = por %p5162_p1, %p5161_p6 }
  0x1d   : > { %p5157_p3 = pneg %p5156_p2 }
  0x1f   : > { %p5164_p5 = pnand %p5163_p4, %p5157_p3 }
  0x21   : > { %5167 = shalt.err (!%p5164_p5)
}
  0x22   : > { %s5239_s30 = smov 128   ;;  %s5240_s3 = smov 8  }
  0x23   : > { %4939 = dma.hbm_to_vmem [thread:$0]  (!%p5308_p7), %s5736_s1, 13056, %s107_s17, [#allocation5], %s5239_s30, %s5239_s30, %s5240_s3  }
  0x24   : > { %p21_p1 = scmp.eq.s32.totalorder %s20_s21, 0  ;;  %p30_p4 = scmp.ne.s32.totalorder %s5232_s11, %s5228_s10 }
  0x25   : > { %p31_p5 = scmp.eq.s32.totalorder %s5236_s12, 0  ;;  %p4945_p8 = scmp.lt.s32.totalorder %s5236_s12, 2 }
  0x26   : > { %s5342_s6 = scalar_select %p21_p1, %s5232_s11, %s23_s20  }
  0x27   : > { %p32_p9 = por %p31_p5, %p30_p4  ;;  %s120_s7 = sand.u32 1, %s5232_s11  }
  0x28   : > { %s4230_s8 = sshll.u32 %s120_s7, 4  ;;  %s4361_s9 = sshll.u32 %s5236_s12, 8 }
  0x29   : > { %s5349_s18 = scalar_lea.hbm %s5735_s0, %s4361_s9  ;;  %s124_s17 = scalar_lea.vmem [#allocation2], %s4230_s8 }
  0x2a   : > { %s131_s21 = sshll.u32 %s124_s17, 4  ;;  %p5353_p7 = pnand %p4945_p8, %p32_p9  ;;  %s5351_s21 = int_to_ptr.vmem [resolvable:$true] %s131_s21 }
  0x2b   : > { %s5357_s12 = scalar_lea.sflag [#allocation3], %s120_s7  ;;  %s5168_s23 = scalar_lea.hbm %s5349_s18, 256 }
  0x2c   : > { %p5169_p10 = scmp.ne.s32.totalorder %s5349_s18, %s5168_s23  ;;  %p5170_p11 = pneg %p5353_p7 }
  0x2d   : > { %s5173_s26 = scalar_lea.hbm %s5735_s0, 512  ;;  %p5174_p0 = scmp.lt.u32.totalorder %s5349_s18, %s5735_s0 }
  0x2e   : > { %p5171_p12 = pnand %p5170_p11, %p5169_p10  ;;  %p5175_p2 = scmp.lt.u32.totalorder %s5173_s26, %s5168_s23 }
  0x2f   : > { %p5177_p6 = scmp.lt.u32.totalorder %s5168_s23, %s5349_s18 }
  0x30   : > { %p5172_p13 = pneg %p5171_p12  ;;  %p5176_p3 = por %p5175_p2, %p5174_p0 }
  0x32   : > { %p5178_p1 = por %p5177_p6, %p5176_p3 }
  0x34   : > { %p5179_p4 = pnand %p5178_p1, %p5172_p13 }
  0x36   : > { %5182 = shalt.err (!%p5179_p4)
}
  0x37   : > { %s5183_s29 = scalar_lea.vmem %s5351_s21, 256  ;;  %s5241_s4 = smov [#allocation2]  }
  0x38   : > { %p5184_p5 = scmp.ne.s32.totalorder %s5351_s21, %s5183_s29  ;;  %s5188_s5 = sshll.u32 %s5241_s4, 4  ;;  %s5189_s5 = int_to_ptr.vmem [resolvable:$false] %s5188_s5 }
  0x39   : > { %s5190_s7 = scalar_lea.vmem %s5189_s5, 512  ;;  %p5191_p10 = scmp.lt.s32.totalorder %s5351_s21, %s5189_s5 }
  0x3a   : > { %p5186_p8 = pnand %p5184_p5, %p5170_p11  ;;  %p5192_p12 = scmp.lt.s32.totalorder %s5190_s7, %s5183_s29 }
  0x3c   : > { %p5187_p9 = pneg %p5186_p8  ;;  %p5193_p0 = por %p5192_p12, %p5191_p10 }
  0x3e   : > { %p5194_p2 = pnand %p5193_p0, %p5187_p9 }
  0x40   : > { %5197 = shalt.err (!%p5194_p2)
}
  0x41   : > { %4943 = dma.hbm_to_vmem [thread:$0]  (!%p5353_p7), %s5349_s18, 256, %s5351_s21, %s5357_s12, %s5239_s30, %s5239_s30, %s5240_s3  }
  0x42   : > { %p5745_p11 = scmp.ne.s32.totalorder %s5742_s15, 0 }
  0x43   : > { %s145_s8 = sand.u32 (!%p5745_p11), 1, %s5228_s10   ;;  %p5746_p13 = scmp.ne.s32.totalorder (!%p5745_p11), %s5741_s14, 0 }
  0x44   : > { %143 = sbr.rel (%p5745_p11) target bundleno = 11043 (0x2b23), region = 28  ;;  %s4234_s9 = sshll.u32 (!%p5745_p11), %s145_s8, 4 }
  0x45   : > { %s146_s16 = scalar_lea.sflag (!%p5745_p11), [#allocation3], %s145_s8  ;;  %s149_s22 = scalar_lea.vmem (!%p5745_p11), [#allocation2], %s4234_s9 }
  0x4b   : > { %5215 = dma.done.wait (%p5746_p13), %s146_s16, 256  }
  0x4c   : > { %5217 = vsyncadd (%p5746_p13), %s146_s16, 4294967040  ;;  %p5747_p3 = scmp.eq.s32.totalorder %s5288_s13, 0 }
  0x4e   : > { %5219 = dma.done.wait (%p5747_p3), [#allocation5], 13056   ;;  %p5748_p6 = pmov %p5747_p3 }
  0x4f   : > { %vm188_vm0 = vcmask 130048   ;;  %v181_v0 = vld [vmem:[#allocation4] sm:$0xff]  ;;  %v182_v1 = vld [vmem:[#allocation4 + $0x8] sm:$0xff]  ;;  %v270_v5 = vld [vmem:[#allocation4 + $0x18] sm:$0xff]  ;;  %vm364_vm1 = vcmask 31744   ;;  %s5242_s14 = smov 104  }
  0x50   : > { %5221 = vsyncadd (%p5748_p6), [#allocation5], 4294954240  ;;  %v5399_v2 = vld [vmem:[%s149_s22] sm:$0xff]  ;;  %v4768_v3 = vpack.c.bf16 %v182_v1, %v181_v0  ;;  %v5403_v4 = vld [vmem:[%s149_s22 + $0x8] sm:$0xff]  ;;  %s5243_s15 = smov 112   ;;  %s5244_s30 = smov 100  }
  0x51   : > { %4513 = vmatprep.mubr.msk.f32.mxu0 %vm188_vm0, %v5399_v2  ;;  %v271_v6 = vld [vmem:[#allocation4 + $0x20] sm:$0xff]  ;;  %v4238_v8 = vld [vmem:[#allocation4 + $0x10] ss:$0 sm:$0xff]  ;;  %v4241_v13 = vld [vmem:[#allocation4 + $0x28] ss:$0 sm:$0xff]  ;;  %s5245_s3 = smov 108  }
  0x52   : > { %4769 = vmatprep.subr.bf16.mxu0 %v4768_v3  ;;  %v4772_v7 = vpack.c.bf16 %v271_v6, %v270_v5  ;;  %s5246_s18 = smov 124   ;;  %s5247_s17 = smov 120   ;;  %vm5413_vm2 = vmpackc.low %vm364_vm1, %vm364_vm1  ;;  %vm1071_vm5 = vcmask 261120  }
  0x53   : > { %4771 = vmatpush3.bf16.msra.mxu0 %v4768_v3  ;;  %s5248_s21 = smov 116   ;;  %s5253_s20 = smov 16  }
  0x54   : > { %4773 = vmatprep.subr.bf16.mxu1 %v4772_v7  ;;  %p174_p7 = scmp.lt.s32.totalorder %s5288_s13, 1 }
  0x55   : > { %4775 = vmatpush3.bf16.msra.mxu1 %v4772_v7 }
  0x56   : > { %4514 = vmatmul.mubr.msk.f32.vlgmr.msra.gmra.mrb[0].mxu0 %vm188_vm0, %v5403_v4  ;;  %s5756_s13 = smov (!%p174_p7, %s5288_s13), 1 }
  0x57   : > { %s4362_s12 = sshll.u32 %s5756_s13, 4 }
  0x58   : > { %s178_s25 = scalar_lea.vmem %s5737_s2, %s4362_s12 }
 0x129   : > { %v4515_v9 = vpop.f32.mrb[0].mxu0 }
 0x12a   : > { %v261_v10 = vpop.f32.mrb[1].mxu0  ;;  %v267_v12 = vadd.f32 %v4515_v9, %v4238_v8 }
 0x12b   : > { %v262_v11 = vadd.f32 %v4238_v8, %v261_v10 }
 0x12d   : > { %4520 = vmatprep.mubr.msk.f32.mxu1 %vm188_vm0, %v262_v11 }
 0x12e   : > { %4521 = vmatmul.mubr.msk.f32.vlgmr.msra.gmra.mrb[0].mxu1 %vm188_vm0, %v267_v12 }
 0x201   : > { %v4522_v14 = vpop.f32.mrb[0].mxu1 }
 0x202   : > { %v355_v15 = vadd.f32 %v4522_v14, %v4241_v13  ;;  %v349_v16 = vpop.f32.mrb[1].mxu1 }
 0x203   : > { %v350_v17 = vadd.f32 %v4241_v13, %v349_v16 }
 0x205   : > { %4527 = vmatprep.mubr.msk.f32.mxu0 %vm364_vm1, %v350_v17  ;;  %v5004_v18 = vpack.i.bf16 %v355_v15, %v350_v17 }
 0x207   : > { %5005 = vrot.lane.b32.xlu1 %v5004_v18, %s5242_s14  ;;  %4995 = vrot.lane.b32.xlu0 %v5004_v18, %s5243_s15 }
 0x20b   : > { %5010 = vrot.lane.b32.xlu1 %v5004_v18, %s5244_s30  ;;  %5000 = vrot.lane.b32.xlu0 %v5004_v18, %s5245_s3 }
 0x20f   : > { %450 = vrot.lane.b32.xlu1 %v355_v15, %s5246_s18  ;;  %448 = vrot.lane.b32.xlu0 %v350_v17, %s5246_s18 }
 0x213   : > { %541 = vrot.lane.b32.xlu1 %v355_v15, %s5247_s17  ;;  %539 = vrot.lane.b32.xlu0 %v350_v17, %s5247_s17 }
 0x217   : > { %632 = vrot.lane.b32.xlu1 %v355_v15, %s5248_s21  ;;  %630 = vrot.lane.b32.xlu0 %v350_v17, %s5248_s21 }
 0x279   : > { %v5006_v19 = vpop.permute.xlu1 %5005  ;;  %v4996_v20 = vpop.permute.xlu0 %4995 }
 0x27a   : > { %v5008_v21 = vunpack.i.h.bf16 %v5006_v19  ;;  %v5007_v22 = vunpack.i.l.bf16 %v5006_v19  ;;  %v4998_v23 = vunpack.i.h.bf16 %v4996_v20  ;;  %v4997_v24 = vunpack.i.l.bf16 %v4996_v20 }
 0x27c   : > { %v4776_v26 = vpack.c.bf16 %v4998_v23, %v4997_v24  ;;  %v4788_v27 = vpack.c.bf16 %v5008_v21, %v5007_v22 }
 0x27d   : > { %v5011_v28 = vpop.permute.xlu1 %5010  ;;  %v5001_v29 = vpop.permute.xlu0 %5000 }
 0x27e   : > { %v5013_v30 = vunpack.i.h.bf16 %v5011_v28  ;;  %v5012_v31 = vunpack.i.l.bf16 %v5011_v28  ;;  %v5003_v32 = vunpack.i.h.bf16 %v5001_v29  ;;  %v5002_v33 = vunpack.i.l.bf16 %v5001_v29  ;;  %4778 = vmatprep.subr.msk.bf16.mxu0 %vm5413_vm2, %v4776_v26 }
 0x27f   : > { %4781 = vmatpush3.bf16.xpose.msk.msra.mxu0 %vm5413_vm2, %v4776_v26 }
 0x280   : > { %v4782_v34 = vpack.c.bf16 %v5003_v32, %v5002_v33  ;;  %4790 = vmatprep.subr.msk.bf16.mxu0 %vm5413_vm2, %v4788_v27  ;;  %v4794_v36 = vpack.c.bf16 %v5013_v30, %v5012_v31 }
 0x281   : > { %v449_v35 = vpop.permute.xlu0 %448  ;;  %v451_v37 = vpop.permute.xlu1 %450 }
 0x282   : > { %4784 = vmatprep.subr.msk.bf16.mxu1 %vm5413_vm2, %v4782_v34  ;;  %4534 = vmatprep.mubr.msk.f32.mxu1 %vm364_vm1, %v449_v35 }
 0x283   : > { %4787 = vmatpush3.bf16.xpose.msk.msra.mxu1 %vm5413_vm2, %v4782_v34 }
 0x284   : > { %4796 = vmatprep.subr.msk.bf16.mxu1 %vm5413_vm2, %v4794_v36 }
 0x285   : > { %v540_v38 = vpop.permute.xlu0 %539  ;;  %v542_v40 = vpop.permute.xlu1 %541 }
 0x286   : > { %4528 = vmatmul.mubr.msk.f32.vlgmr.msra.gmra.mrb[2].mxu0 %vm364_vm1, %v355_v15 }
 0x287   : > { %4793 = vmatpush3.bf16.xpose.msk.msra.mxu0 %vm5413_vm2, %v4788_v27  ;;  %4541 = vmatprep.mubr.msk.f32.mxu0 %vm364_vm1, %v540_v38 }
 0x289   : > { %v631_v39 = vpop.permute.xlu0 %630  ;;  %v633_v41 = vpop.permute.xlu1 %632 }
 0x28a   : > { %4535 = vmatmul.mubr.msk.f32.vlgmr.msra.gmra.mrb[2].mxu1 %vm364_vm1, %v451_v37 }
 0x28b   : > { %4799 = vmatpush3.bf16.xpose.msk.msra.mxu1 %vm5413_vm2, %v4794_v36  ;;  %4548 = vmatprep.mubr.msk.f32.mxu1 %vm364_vm1, %v631_v39 }
 0x28e   : > { %4542 = vmatmul.mubr.msk.f32.vlgmr.msra.gmra.mrb[4].mxu0 %vm364_vm1, %v542_v40 }
 0x28f   : > { %4555 = vmatprep.mubr.msk.f32.mxu0 %vm188_vm0, %v5399_v2 }
 0x292   : > { %4549 = vmatmul.mubr.msk.f32.vlgmr.msra.gmra.mrb[4].mxu1 %vm364_vm1, %v633_v41 }
 0x359   : > { %v4529_v42 = vpop.f32.mrb[2].mxu0 }
 0x35a   : > { %v722_v43 = vmul.f32 0.5, %v4529_v42  ;;  %v439_v44 = vpop.f32.mrb[3].mxu0 }
 0x35b   : > { %v721_v50 = vmul.f32 0.5, %v439_v44 }
 0x35c   : > { %v732_v45 = vsel %vm188_vm0, %v722_v43, -inf }
 0x35d   : > { %v4536_v46 = vpop.f32.mrb[2].mxu1  ;;  %733 = vmax.xlane.f32.xlu0 %v732_v45  ;;  %v729_v57 = vsel %vm188_vm0, %v721_v50, -inf }
 0x35e   : > { %v724_v47 = vmul.f32 0.5, %v4536_v46  ;;  %v530_v48 = vpop.f32.mrb[3].mxu1 }
 0x35f   : > { %v723_v49 = vmul.f32 0.5, %v530_v48 }
 0x360   : > { %v738_v51 = vsel %vm188_vm0, %v724_v47, -inf }
 0x361   : > { %739 = vmax.xlane.f32.xlu0 %v738_v51  ;;  %v4543_v52 = vpop.f32.mrb[4].mxu0  ;;  %v735_v53 = vsel %vm188_vm0, %v723_v49, -inf }
 0x362   : > { %736 = vmax.xlane.f32.xlu1 %v735_v53  ;;  %v621_v54 = vpop.f32.mrb[5].mxu0  ;;  %v726_v56 = vmul.f32 0.5, %v4543_v52 }
 0x363   : > { %v725_v55 = vmul.f32 0.5, %v621_v54 }
 0x364   : > { %v744_v63 = vsel %vm188_vm0, %v726_v56, -inf }
 0x365   : > { %v4550_v58 = vpop.f32.mrb[4].mxu1  ;;  %730 = vmax.xlane.f32.xlu0 %v729_v57  ;;  %v741_v59 = vsel %vm188_vm0, %v725_v55, -inf }
 0x366   : > { %v712_v60 = vpop.f32.mrb[5].mxu1  ;;  %742 = vmax.xlane.f32.xlu1 %v741_v59  ;;  %v728_v62 = vmul.f32 0.5, %v4550_v58  ;;  %v831_v59 = vlaneseq }
 0x367   : > { %v727_v61 = vmul.f32 0.5, %v712_v60 }
 0x368   : > { %v750_v1 = vsel %vm188_vm0, %v728_v62, -inf }
 0x369   : > { %745 = vmax.xlane.f32.xlu0 %v744_v63  ;;  %v747_v0 = vsel %vm188_vm0, %v727_v61, -inf  ;;  %v5462_v63 = vand.u32 127, %v831_v59 }
 0x36a   : > { %748 = vmax.xlane.f32.xlu1 %v747_v0 }
 0x36d   : > { %751 = vmax.xlane.f32.xlu0 %v750_v1 }
 0x3ea   : > { %v734_v2 = vpop.xlane.xlu0 %733 }
 0x3eb   : > { %v754_v3 = vsub.f32 %v722_v43, %v734_v2 }
 0x3ed   : > { %v763_v5 = vmul.f32 1.442695, %v754_v3 }
 0x3ee   : > { %v740_v6 = vpop.xlane.xlu0 %739 }
 0x3ef   : > { %5018 = vpow2.f32 %v763_v5  ;;  %v756_v7 = vsub.f32 %v724_v47, %v740_v6  ;;  %v737_v8 = vpop.xlane.xlu1 %736 }
 0x3f0   : > { %v755_v9 = vsub.f32 %v723_v49, %v737_v8 }
 0x3f1   : > { %v767_v10 = vmul.f32 1.442695, %v756_v7 }
 0x3f2   : > { %v765_v11 = vmul.f32 1.442695, %v755_v9  ;;  %v731_v12 = vpop.xlane.xlu0 %730  ;;  %v836_v9 = vcvt.s32.f32 %v5462_v63 }
 0x3f3   : > { %5020 = vpow2.f32 %v767_v10  ;;  %v753_v13 = vsub.f32 %v721_v50, %v731_v12  ;;  %v743_v14 = vpop.xlane.xlu1 %742 }
 0x3f4   : > { %v757_v15 = vsub.f32 %v725_v55, %v743_v14  ;;  %5022 = vpow2.f32 %v765_v11 }
 0x3f5   : > { %v761_v16 = vmul.f32 1.442695, %v753_v13 }
 0x3f6   : > { %v769_v17 = vmul.f32 1.442695, %v757_v15  ;;  %v746_v18 = vpop.xlane.xlu0 %745 }
 0x3f7   : > { %5024 = vpow2.f32 %v761_v16  ;;  %v758_v19 = vsub.f32 %v726_v56, %v746_v18  ;;  %v749_v20 = vpop.xlane.xlu1 %748 }
 0x3f8   : > { %v759_v21 = vsub.f32 %v727_v61, %v749_v20  ;;  %5026 = vpow2.f32 %v769_v17  ;;  %v837_v17 = vmul.f32 1e-07, %v836_v9 }
 0x3f9   : > { %v5450_v22 = vpop.eup %5018  ;;  %v771_v23 = vmul.f32 1.442695, %v758_v19 }
 0x3fa   : > { %v773_v24 = vmul.f32 1.442695, %v759_v21  ;;  %v752_v25 = vpop.xlane.xlu0 %751  ;;  %v780_v26 = vsel %vm188_vm0, %v5450_v22, 0.0 }
 0x3fb   : > { %5028 = vpow2.f32 %v771_v23  ;;  %v760_v27 = vsub.f32 %v728_v62, %v752_v25  ;;  %781 = vadd.xlane.f32.xlu1 %v780_v26  ;;  %v990_v26 = vld [vmem:[#allocation4 + $0x30] sm:$0xff] }
 0x3fc   : > { %5030 = vpow2.f32 %v773_v24 }
 0x3fd   : > { %v5021_v28 = vpop.eup %5020  ;;  %v775_v29 = vmul.f32 1.442695, %v760_v27  ;;  %v991_v27 = vld [vmem:[#allocation4 + $0x38] sm:$0xff] }
 0x3fe   : > { %v786_v30 = vsel %vm188_vm0, %v5021_v28, 0.0  ;;  %v5023_v31 = vpop.eup %5022 }
 0x3ff   : > { %5032 = vpow2.f32 %v775_v29  ;;  %787 = vadd.xlane.f32.xlu0 %v786_v30  ;;  %v783_v33 = vsel %vm188_vm0, %v5023_v31, 0.0 }
 0x401   : > { %v5025_v32 = vpop.eup %5024 }
 0x402   : > { %v777_v34 = vsel %vm188_vm0, %v5025_v32, 0.0  ;;  %v5027_v35 = vpop.eup %5026 }
 0x403   : > { %784 = vadd.xlane.f32.xlu0 %v783_v33  ;;  %778 = vadd.xlane.f32.xlu1 %v777_v34  ;;  %v789_v38 = vsel %vm188_vm0, %v5027_v35, 0.0 }
 0x405   : > { %v5029_v36 = vpop.eup %5028 }
 0x406   : > { %v792_v37 = vsel %vm188_vm0, %v5029_v36, 0.0  ;;  %v5031_v39 = vpop.eup %5030 }
 0x407   : > { %793 = vadd.xlane.f32.xlu0 %v792_v37  ;;  %790 = vadd.xlane.f32.xlu1 %v789_v38  ;;  %v795_v42 = vsel %vm188_vm0, %v5031_v39, 0.0  ;;  %v1069_v37 = vld [vmem:[#allocation4 + $0x58] sm:$0xff] }
 0x409   : > { %v5033_v40 = vpop.eup %5032 }
 0x40a   : > { %v798_v41 = vsel %vm188_vm0, %v5033_v40, 0.0 }
 0x40b   : > { %799 = vadd.xlane.f32.xlu0 %v798_v41  ;;  %796 = vadd.xlane.f32.xlu1 %v795_v42 }
 0x488   : > { %v782_v43 = vpop.xlane.xlu1 %781 }
 0x489   : > { %v802_v48 = vmul.f32 4.0, %v782_v43 }
 0x48c   : > { %v788_v44 = vpop.xlane.xlu0 %787 }
 0x48d   : > { %v804_v45 = vmul.f32 4.0, %v788_v44  ;;  %v5249_v44 = vmov 0.0  }
 0x48f   : > { %5034 = vrcp.f32 %v804_v45 }
 0x490   : > { %v785_v46 = vpop.xlane.xlu0 %784  ;;  %v779_v47 = vpop.xlane.xlu1 %778 }
 0x491   : > { %v803_v49 = vmul.f32 4.0, %v785_v46  ;;  %v801_v50 = vmul.f32 4.0, %v779_v47 }
 0x493   : > { %5036 = vrcp.f32 %v803_v49 }
 0x494   : > { %5038 = vrcp.f32 %v801_v50  ;;  %v794_v51 = vpop.xlane.xlu0 %793  ;;  %v791_v52 = vpop.xlane.xlu1 %790 }
 0x495   : > { %5040 = vrcp.f32 %v802_v48  ;;  %v806_v53 = vmul.f32 4.0, %v794_v51  ;;  %v805_v54 = vmul.f32 4.0, %v791_v52 }
 0x497   : > { %5042 = vrcp.f32 %v806_v53 }
 0x498   : > { %5044 = vrcp.f32 %v805_v54  ;;  %v800_v55 = vpop.xlane.xlu0 %799  ;;  %v797_v56 = vpop.xlane.xlu1 %796 }
 0x499   : > { %v808_v57 = vmul.f32 4.0, %v800_v55  ;;  %v807_v58 = vmul.f32 4.0, %v797_v56  ;;  %v5035_v60 = vpop.eup %5034 }
 0x49a   : > { %v816_v1 = vmul.f32 %v5035_v60, %v5021_v28  ;;  %v4800_v28 = vpack.c.bf16 %v991_v27, %v990_v26 }
 0x49b   : > { %5046 = vrcp.f32 %v808_v57 }
 0x49c   : > { %5048 = vrcp.f32 %v807_v58  ;;  %4801 = vmatprep.subr.bf16.mxu0 %v4800_v28 }
 0x49d   : > { %v5037_v61 = vpop.eup %5036  ;;  %4803 = vmatpush3.bf16.msra.mxu0 %v4800_v28 }
 0x49e   : > { %v5039_v62 = vpop.eup %5038  ;;  %v814_v5 = vmul.f32 %v5037_v61, %v5023_v31 }
 0x49f   : > { %v5041_v0 = vpop.eup %5040  ;;  %v810_v3 = vmul.f32 %v5039_v62, %v5025_v32 }
 0x4a0   : > { %v812_v7 = vmul.f32 %v5041_v0, %v5450_v22  ;;  %4556 = vmatmul.mubr.msk.f32.vlgmr.msra.gmra.mrb[6].mxu0 %vm188_vm0, %v5403_v4 }
 0x4a1   : > { %v5043_v2 = vpop.eup %5042  ;;  %v825_v13 = vadd.f32 %v814_v5, %v810_v3 }
 0x4a2   : > { %v5045_v6 = vpop.eup %5044  ;;  %v820_v8 = vmul.f32 %v5043_v2, %v5029_v36  ;;  %v826_v11 = vadd.f32 %v816_v1, %v812_v7  ;;  %v1068_v36 = vld [vmem:[#allocation4 + $0x50] sm:$0xff]  ;;  %v5250_v1 = vmov 1  }
 0x4a3   : > { %v818_v10 = vmul.f32 %v5045_v6, %v5027_v35  ;;  %v1067_v35 = vld [vmem:[#allocation4 + $0x48] sm:$0xff]  ;;  %5014 = vset.pattern.permute.xlu1 %v5250_v1  ;;  %5015 = vset.pattern.permute.xlu0 %v5250_v1  ;;  %v1405_v1 = vld [vmem:[#allocation4 + $0x98] sm:$0xff] }
 0x4a4   : > { %v828_v16 = vadd.f32 %v826_v11, %v820_v8  ;;  %v4804_v38 = vpack.c.bf16 %v1068_v36, %v1067_v35 }
 0x4a5   : > { %v5047_v12 = vpop.eup %5046  ;;  %v827_v19 = vadd.f32 %v825_v13, %v818_v10 }
 0x4a6   : > { %v5049_v14 = vpop.eup %5048  ;;  %v824_v15 = vmul.f32 %v5047_v12, %v5033_v40  ;;  %4805 = vmatprep.subr.bf16.mxu1 %v4804_v38 }
 0x4a7   : > { %v822_v18 = vmul.f32 %v5049_v14, %v5031_v39  ;;  %v1070_v39 = vld [vmem:[#allocation4 + $0x60] sm:$0xff]  ;;  %4807 = vmatpush3.bf16.msra.mxu1 %v4804_v38 }
 0x4a8   : > { %v830_v20 = vadd.f32 %v828_v16, %v824_v15  ;;  %v4808_v4 = vpack.c.bf16 %v1070_v39, %v1069_v37 }
 0x4a9   : > { %v829_v21 = vadd.f32 %v827_v19, %v822_v18 }
 0x4aa   : > { %v839_v23 = vsub.f32 %v830_v20, %v837_v17  ;;  %4809 = vmatprep.subr.bf16.mxu1 %v4808_v4 }
 0x4ab   : > { %v838_v24 = vsub.f32 %v829_v21, %v837_v17  ;;  %4811 = vmatpush3.bf16.msra.mxu1 %v4808_v4  ;;  %v834_v17 = vshrl.u32 %v831_v59, 7 }
 0x4ac   : > { %v843_v25 = vsel %vm188_vm0, %v839_v23, -inf }
 0x4ad   : > { %844 = vmax.xlane.f32.xlu0 %v843_v25  ;;  %v840_v22 = vsel %vm188_vm0, %v838_v24, -inf  ;;  %v5487_v18 = vsub.s32 0, %v834_v17  ;;  %vm930_vm14 = vcmp.eq.s32.totalorder %v834_v17, %v5462_v63  ;;  %v835_v21 = vadd.s32 8, %v834_v17 }
 0x4ae   : > { %841 = vmax.xlane.f32.xlu1 %v840_v22  ;;  %v4260_v25 = vsel %vm930_vm14, 1.0, %v5249_v44 }
 0x4af   : > { %vm931_vm15 = vcmp.eq.s32.totalorder %v835_v21, %v5462_v63 }
 0x4b0   : > { %v4261_v59 = vsel %vm931_vm15, 1.0, %v5249_v44 }
 0x53a   : > { %v845_v29 = vpop.xlane.xlu0 %844 }
 0x53b   : > { %vm847_vm3 = vcmp.ge.f32.partialorder %v839_v23, %v845_v29  ;;  %v842_v30 = vpop.xlane.xlu1 %841 }
 0x53c   : > { %v851_v31 = vsel %vm847_vm3, -1e+30, %v839_v23  ;;  %vm846_vm4 = vcmp.ge.f32.partialorder %v838_v24, %v842_v30  ;;  %v849_v45 = vsel %vm847_vm3, 1.0, %v5249_v44 }
 0x53d   : > { %v855_v32 = vsel %vm188_vm0, %v851_v31, -inf  ;;  %v850_v33 = vsel %vm846_vm4, -1e+30, %v838_v24  ;;  %v848_v47 = vsel %vm846_vm4, 1.0, %v5249_v44 }
 0x53e   : > { %856 = vmax.xlane.f32.xlu0 %v855_v32  ;;  %v852_v34 = vsel %vm188_vm0, %v850_v33, -inf }
 0x53f   : > { %853 = vmax.xlane.f32.xlu1 %v852_v34 }
 0x573   : > { %v4557_v40 = vpop.f32.mrb[6].mxu0 }
 0x574   : > { %v1058_v41 = vpop.f32.mrb[7].mxu0 }
 0x575   : > { %v4812_v42 = vpack.c.bf16 %v4557_v40, %v1058_v41  ;;  %4566 = vmatprep.mubr.msk.f32.mxu1 %vm1071_vm5, %v1058_v41 }
 0x576   : > { %4567 = vmatmul.mubr.msk.f32.vlgmr.msra.gmra.mrb[6].mxu1 %vm1071_vm5, %v4557_v40 }
 0x577   : > { %4813 = vmatprep.subr.bf16.mxu0 %v4812_v42 }
 0x578   : > { %4815 = vmatpush3.bf16.msra.mxu0 %v4812_v42 }
 0x5cb   : > { %v857_v43 = vpop.xlane.xlu0 %856 }
 0x5cc   : > { %vm859_vm6 = vcmp.ge.f32.partialorder %v851_v31, %v857_v43  ;;  %v854_v46 = vpop.xlane.xlu1 %853 }
 0x5cd   : > { %v861_v48 = vsel %vm859_vm6, 1.0, %v849_v45  ;;  %v863_v49 = vsel %vm859_vm6, -1e+30, %v851_v31  ;;  %vm858_vm7 = vcmp.ge.f32.partialorder %v850_v33, %v854_v46  ;;  %v5251_v31 = vmov -1e+30  }
 0x5ce   : > { %v860_v50 = vsel %vm858_vm7, 1.0, %v848_v47  ;;  %v867_v51 = vsel %vm188_vm0, %v863_v49, -inf  ;;  %v862_v52 = vsel %vm858_vm7, -1e+30, %v850_v33 }
 0x5cf   : > { %868 = vmax.xlane.f32.xlu0 %v867_v51  ;;  %v864_v53 = vsel %vm188_vm0, %v862_v52, -inf  ;;  %v1320_v51 = vld [vmem:[#allocation4 + $0x70] sm:$0xff] }
 0x5d0   : > { %865 = vmax.xlane.f32.xlu1 %v864_v53 }
 0x649   : > { %v4568_v0 = vpop.f32.mrb[6].mxu1 }
 0x64a   : > { %v1144_v2 = vpop.f32.mrb[7].mxu1 }
 0x65c   : > { %v869_v54 = vpop.xlane.xlu0 %868 }
 0x65d   : > { %vm871_vm8 = vcmp.ge.f32.partialorder %v863_v49, %v869_v54  ;;  %v866_v55 = vpop.xlane.xlu1 %865 }
 0x65e   : > { %v873_v56 = vsel %vm871_vm8, 1.0, %v861_v48  ;;  %v875_v57 = vsel %vm871_vm8, -1e+30, %v863_v49  ;;  %vm870_vm9 = vcmp.ge.f32.partialorder %v862_v52, %v866_v55 }
 0x65f   : > { %v872_v58 = vsel %vm870_vm9, 1.0, %v860_v50  ;;  %v879_v60 = vsel %vm188_vm0, %v875_v57, -inf  ;;  %v874_v61 = vsel %vm870_vm9, -1e+30, %v862_v52  ;;  %v1319_v50 = vld [vmem:[#allocation4 + $0x68] sm:$0xff] }
 0x660   : > { %880 = vmax.xlane.f32.xlu0 %v879_v60  ;;  %v876_v62 = vsel %vm188_vm0, %v874_v61, -inf  ;;  %v4816_v52 = vpack.c.bf16 %v1320_v51, %v1319_v50  ;;  %v1321_v60 = vld [vmem:[#allocation4 + $0x78] sm:$0xff] }
 0x661   : > { %877 = vmax.xlane.f32.xlu1 %v876_v62 }
 0x662   : > { %4817 = vmatprep.subr.bf16.mxu0 %v4816_v52 }
 0x6ed   : > { %v881_v3 = vpop.xlane.xlu0 %880 }
 0x6ee   : > { %vm883_vm10 = vcmp.ge.f32.partialorder %v875_v57, %v881_v3  ;;  %v878_v5 = vpop.xlane.xlu1 %877 }
 0x6ef   : > { %v885_v6 = vsel %vm883_vm10, 1.0, %v873_v56  ;;  %vm882_vm11 = vcmp.ge.f32.partialorder %v874_v61, %v878_v5  ;;  %v887_v7 = vsel %vm883_vm10, -1e+30, %v875_v57  ;;  %v1407_v5 = vld [vmem:[#allocation4 + $0xa8] sm:$0xff] }
 0x6f0   : > { %v891_v8 = vsel %vm188_vm0, %v887_v7, -inf  ;;  %v886_v9 = vsel %vm882_vm11, -1e+30, %v874_v61  ;;  %v884_v10 = vsel %vm882_vm11, 1.0, %v872_v58  ;;  %v1322_v61 = vld [vmem:[#allocation4 + $0x80] sm:$0xff]  ;;  %vm2428_vm11 = vcmask 7168  }
 0x6f1   : > { %892 = vmax.xlane.f32.xlu0 %v891_v8  ;;  %v888_v11 = vsel %vm188_vm0, %v886_v9, -inf  ;;  %v4820_v62 = vpack.c.bf16 %v1322_v61, %v1321_v60  ;;  %v1743_v60 = vld [vmem:[#allocation4 + $0xe0] sm:$0xff]  ;;  %v1744_v61 = vld [vmem:[#allocation4 + $0xe8] sm:$0xff] }
 0x6f2   : > { %889 = vmax.xlane.f32.xlu1 %v888_v11 }
 0x703   : > { %1187 = vperm.xlu1 %5014, %v1144_v2  }
 0x707   : > { %1192 = vperm.xlu0 %5015, %v4568_v0  }
 0x72c   : > { %1153 = vxpose.xlu1.b32.start [1/2] (short) (narrow) %v1144_v2, 8  ;;  %v1406_v2 = vld [vmem:[#allocation4 + $0xa0] sm:$0xff] }
 0x730   : > { %1154 = vxpose.xlu1.b32.end [2/2] (short) (narrow) %v4568_v0, 8  ;;  %v1404_v0 = vld [vmem:[#allocation4 + $0x90] sm:$0xff] }
 0x731   : > { %v4824_v3 = vpack.c.bf16 %v1405_v1, %v1404_v0  ;;  %v1745_v0 = vld [vmem:[#allocation4 + $0xf0] sm:$0xff] }
 0x732   : > { %v4848_v1 = vpack.c.bf16 %v1745_v0, %v1744_v61 }
 0x733   : > { %4825 = vmatprep.subr.bf16.mxu1 %v4824_v3 }
 0x734   : > { %4827 = vmatpush3.bf16.msra.mxu1 %v4824_v3 }
 0x77e   : > { %v893_v12 = vpop.xlane.xlu0 %892 }
 0x77f   : > { %v890_v13 = vpop.xlane.xlu1 %889  ;;  %vm895_vm13 = vcmp.ge.f32.partialorder %v887_v7, %v893_v12  ;;  %v4266_v7 = vld [vmem:[#allocation4 + $0x40] ss:$0 sm:$0xff] }
 0x780   : > { %vm894_vm12 = vcmp.ge.f32.partialorder %v886_v9, %v890_v13  ;;  %v897_v15 = vsel %vm895_vm13, 1.0, %v885_v6  ;;  %v4828_v6 = vpack.c.bf16 %v1407_v5, %v1406_v2  ;;  %v4273_v2 = vld [vmem:[#allocation4 + $0x88] ss:$0 sm:$0xff]  ;;  %vm3314_vm13 = vcmask 1043456  }
 0x781   : > { %v896_v14 = vsel %vm894_vm12, 1.0, %v884_v10  ;;  %vm2687_vm12 = vcmask 64512  }
 0x782   : > { %898 = vxpose.xlu0.b32.start [1/2] (short) (narrow) %v896_v14, 16  ;;  %4829 = vmatprep.subr.bf16.mxu1 %v4828_v6 }
 0x783   : > { %v1188_v16 = vpop.permute.xlu1 %1187  ;;  %4831 = vmatpush3.bf16.msra.mxu1 %v4828_v6 }
 0x786   : > { %899 = vxpose.xlu0.b32.end [2/2] (short) (narrow) %v897_v15, 16  ;;  %v1193_v24 = vpop.permute.xlu0 %1192 }
 0x7ac   : > { %v1169_v19 = vpop.trf.xlu1 }
 0x7ad   : > { %v1198_v20 = vrot.slane %v1169_v19, %v5487_v18 }
 0x7af   : > { %v1199_v23 = vadd.f32 %v1198_v20, %v1188_v16  ;;  %v1200_v26 = vadd.f32 %v1198_v20, %v1193_v24 }
 0x7b1   : > { %v1203_v22 = vmul.f32 0.2, %v1199_v23  ;;  %vm1201_vm2 = vcmp.ge.f32.partialorder %v1199_v23, 0.0  ;;  %v1204_v29 = vmul.f32 0.2, %v1200_v26  ;;  %vm1202_vm4 = vcmp.ge.f32.partialorder %v1200_v26, 0.0 }
 0x7b3   : > { %v1205_v33 = vsel %vm1201_vm2, %v1199_v23, %v1203_v22  ;;  %v1206_v38 = vsel %vm1202_vm4, %v1200_v26, %v1204_v29 }
 0x802   : > { %v914_v27 = vpop.trf.xlu0 }
 0x803   : > { %v5493_v28 = vmax.f32 %v914_v27, %v4260_v25 }
 0x805   : > { %vm986_vm3 = vcmp.gt.f32.partialorder %v5493_v28, 0.0 }
 0x806   : > { %v915_v30 = vpop.trf.xlu0  ;;  %v5497_v32 = vsel %vm986_vm3, 0.0, %v5251_v31 }
 0x807   : > { %v5499_v34 = vmax.f32 %v915_v30, %v4261_v59  ;;  %v1207_v35 = vadd.f32 %v1205_v33, %v5497_v32 }
 0x809   : > { %vm987_vm6 = vcmp.gt.f32.partialorder %v5499_v34, 0.0  ;;  %v1209_v36 = vsel %vm188_vm0, %v1207_v35, -inf }
 0x80a   : > { %1210 = vmax.xlane.f32.xlu1 %v1209_v36  ;;  %v5504_v37 = vsel %vm987_vm6, 0.0, %v5251_v31 }
 0x80b   : > { %v1208_v39 = vadd.f32 %v1206_v38, %v5504_v37 }
 0x80d   : > { %v1212_v4 = vsel %vm188_vm0, %v1208_v39, -inf }
 0x80e   : > { %1213 = vmax.xlane.f32.xlu0 %v1212_v4 }
 0x897   : > { %v1211_v40 = vpop.xlane.xlu1 %1210 }
 0x898   : > { %v1215_v41 = vsub.f32 %v1207_v35, %v1211_v40 }
 0x89a   : > { %v1217_v42 = vmul.f32 1.442695, %v1215_v41 }
 0x89b   : > { %v1214_v43 = vpop.xlane.xlu0 %1213 }
 0x89c   : > { %5050 = vpow2.f32 %v1217_v42  ;;  %v1216_v44 = vsub.f32 %v1208_v39, %v1214_v43 }
 0x89e   : > { %v1219_v45 = vmul.f32 1.442695, %v1216_v44 }
 0x8a0   : > { %5052 = vpow2.f32 %v1219_v45 }
 0x8a6   : > { %v5051_v46 = vpop.eup %5050 }
 0x8a7   : > { %v1221_v47 = vsel %vm188_vm0, %v5051_v46, 0.0 }
 0x8a8   : > { %1222 = vadd.xlane.f32.xlu1 %v1221_v47 }
 0x8aa   : > { %v5053_v48 = vpop.eup %5052 }
 0x8ab   : > { %v1224_v49 = vsel %vm188_vm0, %v5053_v48, 0.0 }
 0x8ac   : > { %1225 = vadd.xlane.f32.xlu1 %v1224_v49 }
 0x935   : > { %v1223_v53 = vpop.xlane.xlu1 %1222 }
 0x936   : > { %5054 = vrcp.f32 %v1223_v53  ;;  %v1658_v53 = vld [vmem:[#allocation4 + $0xb8] sm:$0xff] }
 0x939   : > { %v1226_v54 = vpop.xlane.xlu1 %1225 }
 0x93a   : > { %5056 = vrcp.f32 %v1226_v54 }
 0x940   : > { %v5055_v55 = vpop.eup %5054 }
 0x941   : > { %v1229_v56 = vmul.f32 %v5055_v55, %v5051_v46  ;;  %v1659_v55 = vld [vmem:[#allocation4 + $0xc0] sm:$0xff] }
 0x943   : > { %4573 = vmatprep.mubr.msk.f32.mxu0 %vm188_vm0, %v1229_v56  ;;  %v1660_v56 = vld [vmem:[#allocation4 + $0xc8] sm:$0xff] }
 0x944   : > { %v5057_v57 = vpop.eup %5056 }
 0x945   : > { %v1230_v58 = vmul.f32 %v5057_v57, %v5053_v48  ;;  %v4840_v57 = vpack.c.bf16 %v1660_v56, %v1659_v55  ;;  %v1996_v55 = vld [vmem:[#allocation4 + $0x100] sm:$0xff] }
 0x947   : > { %4574 = vmatmul.mubr.msk.f32.vlgmr.msra.gmra.mrb[8].mxu0 %vm188_vm0, %v1230_v58  ;;  %v1742_v58 = vld [vmem:[#allocation4 + $0xd8] sm:$0xff] }
 0x948   : > { %4819 = vmatpush3.bf16.msra.mxu0 %v4816_v52  ;;  %v1657_v52 = vld [vmem:[#allocation4 + $0xb0] sm:$0xff] }
 0x949   : > { %4821 = vmatprep.subr.bf16.mxu0 %v4820_v62  ;;  %v4836_v54 = vpack.c.bf16 %v1658_v53, %v1657_v52 }
 0x94b   : > { %4837 = vmatprep.subr.bf16.mxu1 %v4836_v54 }
 0x94c   : > { %4823 = vmatpush3.bf16.msra.mxu0 %v4820_v62  ;;  %v4844_v62 = vpack.c.bf16 %v1743_v60, %v1742_v58  ;;  %v1998_v58 = vld [vmem:[#allocation4 + $0x110] sm:$0xff] }
 0xa1a   : > { %v4575_v8 = vpop.f32.mrb[8].mxu0 }
 0xa1b   : > { %v5512_v9 = vadd.f32 %v4575_v8, %v4266_v7  ;;  %v1308_v10 = vpop.f32.mrb[9].mxu0 }
 0xa1c   : > { %v5514_v11 = vadd.f32 %v4266_v7, %v1308_v10 }
 0xa1d   : > { %v1318_v13 = vmax.f32 %v5512_v9, 0.0 }
 0xa1e   : > { %v1317_v12 = vmax.f32 %v5514_v11, 0.0 }
 0xa20   : > { %4584 = vmatprep.mubr.msk.f32.mxu0 %vm1071_vm5, %v1317_v12 }
 0xa21   : > { %4585 = vmatmul.mubr.msk.f32.vlgmr.msra.gmra.mrb[10].mxu0 %vm1071_vm5, %v1318_v13 }
 0xaf4   : > { %v4586_v14 = vpop.f32.mrb[10].mxu0 }
 0xaf5   : > { %v1395_v15 = vpop.f32.mrb[11].mxu0 }
 0xaf6   : > { %v4832_v16 = vpack.c.bf16 %v4586_v14, %v1395_v15  ;;  %4595 = vmatprep.mubr.msk.f32.mxu1 %vm1071_vm5, %v1395_v15 }
 0xaf7   : > { %4596 = vmatmul.mubr.msk.f32.vlgmr.msra.gmra.mrb[8].mxu1 %vm1071_vm5, %v4586_v14 }
 0xaf8   : > { %4833 = vmatprep.subr.bf16.mxu0 %v4832_v16  ;;  %4839 = vmatpush3.bf16.msra.mxu1 %v4836_v54  ;;  %v1995_v54 = vld [vmem:[#allocation4 + $0xf8] sm:$0xff] }
 0xaf9   : > { %4835 = vmatpush3.bf16.msra.mxu0 %v4832_v16  ;;  %4841 = vmatprep.subr.bf16.mxu1 %v4840_v57  ;;  %v4856_v56 = vpack.c.bf16 %v1996_v55, %v1995_v54 }
 0xafa   : > { %4845 = vmatprep.subr.bf16.mxu0 %v4844_v62 }
 0xafc   : > { %4843 = vmatpush3.bf16.msra.mxu1 %v4840_v57  ;;  %v1997_v57 = vld [vmem:[#allocation4 + $0x108] sm:$0xff] }
 0xafd   : > { %v4860_v60 = vpack.c.bf16 %v1998_v58, %v1997_v57 }
 0xbca   : > { %v4597_v17 = vpop.f32.mrb[8].mxu1 }
 0xbcb   : > { %1528 = vperm.xlu0 %5015, %v4597_v17   ;;  %v1480_v19 = vpop.f32.mrb[9].mxu1 }
 0xbcc   : > { %1523 = vperm.xlu1 %5014, %v1480_v19  }
 0xbf5   : > { %1489 = vxpose.xlu1.b32.start [1/2] (short) (narrow) %v1480_v19, 8 }
 0xbf9   : > { %1490 = vxpose.xlu1.b32.end [2/2] (short) (narrow) %v4597_v17, 8 }
 0xc4a   : > { %v1529_v24 = vpop.permute.xlu0 %1528 }
 0xc4b   : > { %v1524_v20 = vpop.permute.xlu1 %1523 }
 0xc75   : > { %v1505_v21 = vpop.trf.xlu1 }
 0xc76   : > { %v1534_v23 = vrot.slane %v1505_v21, %v5487_v18 }
 0xc78   : > { %v1535_v25 = vadd.f32 %v1534_v23, %v1524_v20  ;;  %v1536_v22 = vadd.f32 %v1534_v23, %v1529_v24 }
 0xc7a   : > { %v1539_v26 = vmul.f32 0.2, %v1535_v25  ;;  %v1540_v27 = vmul.f32 0.2, %v1536_v22  ;;  %vm1538_vm7 = vcmp.ge.f32.partialorder %v1536_v22, 0.0  ;;  %vm1537_vm8 = vcmp.ge.f32.partialorder %v1535_v25, 0.0 }
 0xc7c   : > { %v1542_v59 = vsel %vm1538_vm7, %v1536_v22, %v1540_v27  ;;  %v1541_v29 = vsel %vm1537_vm8, %v1535_v25, %v1539_v26 }
 0xc7d   : > { %v1544_v30 = vadd.f32 %v1542_v59, %v5504_v37  ;;  %v1543_v31 = vadd.f32 %v1541_v29, %v5497_v32 }
 0xc7f   : > { %v1548_v33 = vsel %vm188_vm0, %v1544_v30, -inf  ;;  %v1545_v35 = vsel %vm188_vm0, %v1543_v31, -inf }
 0xc80   : > { %1549 = vmax.xlane.f32.xlu1 %v1548_v33  ;;  %1546 = vmax.xlane.f32.xlu0 %v1545_v35 }
 0xd0d   : > { %v1550_v36 = vpop.xlane.xlu1 %1549  ;;  %v1547_v38 = vpop.xlane.xlu0 %1546 }
 0xd0e   : > { %v1552_v39 = vsub.f32 %v1544_v30, %v1550_v36  ;;  %v1551_v4 = vsub.f32 %v1543_v31, %v1547_v38 }
 0xd10   : > { %v1553_v40 = vmul.f32 1.442695, %v1551_v4  ;;  %v1555_v41 = vmul.f32 1.442695, %v1552_v39 }
 0xd12   : > { %5058 = vpow2.f32 %v1553_v40 }
 0xd13   : > { %5060 = vpow2.f32 %v1555_v41 }
 0xd1c   : > { %v5059_v42 = vpop.eup %5058 }
 0xd1d   : > { %v1557_v43 = vsel %vm188_vm0, %v5059_v42, 0.0  ;;  %v5061_v44 = vpop.eup %5060 }
 0xd1e   : > { %1558 = vadd.xlane.f32.xlu0 %v1557_v43  ;;  %v1560_v45 = vsel %vm188_vm0, %v5061_v44, 0.0  ;;  %v941_v43 = vsel %vm188_vm0, %v5499_v34, 0.0 }
 0xd22   : > { %1561 = vadd.xlane.f32.xlu0 %v1560_v45 }
 0xdab   : > { %v1559_v46 = vpop.xlane.xlu0 %1558 }
 0xdac   : > { %5062 = vrcp.f32 %v1559_v46 }
 0xdaf   : > { %v1562_v47 = vpop.xlane.xlu0 %1561 }
 0xdb0   : > { %5064 = vrcp.f32 %v1562_v47 }
 0xdb6   : > { %v5063_v48 = vpop.eup %5062 }
 0xdb7   : > { %v1565_v49 = vmul.f32 %v5063_v48, %v5059_v42 }
 0xdb9   : > { %4602 = vmatprep.mubr.msk.f32.mxu0 %vm188_vm0, %v1565_v49 }
 0xdba   : > { %v5065_v50 = vpop.eup %5064 }
 0xdbb   : > { %v1566_v51 = vmul.f32 %v5065_v50, %v5061_v44 }
 0xdbd   : > { %4603 = vmatmul.mubr.msk.f32.vlgmr.msra.gmra.mrb[12].mxu0 %vm188_vm0, %v1566_v51 }
 0xdbe   : > { %4847 = vmatpush3.bf16.msra.mxu0 %v4844_v62 }
 0xdbf   : > { %4849 = vmatprep.subr.bf16.mxu0 %v4848_v1 }
 0xdc2   : > { %4851 = vmatpush3.bf16.msra.mxu0 %v4848_v1 }
 0xdc3   : > { %4857 = vmatprep.subr.bf16.mxu0 %v4856_v56 }
 0xe90   : > { %v4604_v3 = vpop.f32.mrb[12].mxu0 }
 0xe91   : > { %v1650_v5 = vadd.f32 %v4604_v3, %v4273_v2  ;;  %v1644_v6 = vpop.f32.mrb[13].mxu0 }
 0xe92   : > { %v1645_v7 = vadd.f32 %v4273_v2, %v1644_v6 }
 0xe93   : > { %v5537_v8 = vadd.f32 %v1650_v5, %v1318_v13  ;;  %v4280_v5 = vld [vmem:[#allocation4 + $0xd0] ss:$0 sm:$0xff] }
 0xe94   : > { %v5541_v10 = vadd.f32 %v1645_v7, %v1317_v12 }
 0xe95   : > { %v1656_v15 = vmax.f32 %v5537_v8, 0.0  ;;  %v2171_v8 = vld [vmem:[#allocation4 + $0x138] sm:$0xff] }
 0xe96   : > { %v1655_v14 = vmax.f32 %v5541_v10, 0.0 }
 0xe98   : > { %4613 = vmatprep.mubr.msk.f32.mxu1 %vm1071_vm5, %v1655_v14 }
 0xe99   : > { %4614 = vmatmul.mubr.msk.f32.vlgmr.msra.gmra.mrb[10].mxu1 %vm1071_vm5, %v1656_v15 }
 0xf6c   : > { %v4615_v16 = vpop.f32.mrb[10].mxu1 }
 0xf6d   : > { %v1733_v9 = vpop.f32.mrb[11].mxu1 }
 0xf6e   : > { %v4852_v13 = vpack.c.bf16 %v4615_v16, %v1733_v9  ;;  %4624 = vmatprep.mubr.msk.f32.mxu0 %vm1071_vm5, %v1733_v9 }
 0xf6f   : > { %4625 = vmatmul.mubr.msk.f32.vlgmr.msra.gmra.mrb[14].mxu0 %vm1071_vm5, %v4615_v16 }
 0xf70   : > { %4853 = vmatprep.subr.bf16.mxu1 %v4852_v13  ;;  %4859 = vmatpush3.bf16.msra.mxu0 %v4856_v56 }
 0xf71   : > { %4855 = vmatpush3.bf16.msra.mxu1 %v4852_v13  ;;  %4861 = vmatprep.subr.bf16.mxu0 %v4860_v60 }
 0xf74   : > { %4863 = vmatpush3.bf16.msra.mxu0 %v4860_v60 }
0x1042   : > { %v4626_v11 = vpop.f32.mrb[14].mxu0 }
0x1043   : > { %v1818_v12 = vpop.f32.mrb[15].mxu0 }
0x1044   : > { %1827 = vxpose.xlu1.b32.start [1/2] (short) (narrow) %v1818_v12, 8  ;;  %1861 = vperm.xlu0 %5015, %v1818_v12  }
0x1048   : > { %1828 = vxpose.xlu1.b32.end [2/2] (short) (narrow) %v4626_v11, 8  ;;  %1866 = vperm.xlu0 %5015, %v4626_v11  }
0x10c3   : > { %v1862_v17 = vpop.permute.xlu0 %1861 }
0x10c4   : > { %v1843_v19 = vpop.trf.xlu1 }
0x10c5   : > { %v1872_v20 = vrot.slane %v1843_v19, %v5487_v18 }
0x10c7   : > { %v1873_v21 = vadd.f32 %v1872_v20, %v1862_v17  ;;  %v1867_v23 = vpop.permute.xlu0 %1866 }
0x10c8   : > { %v1874_v24 = vadd.f32 %v1872_v20, %v1867_v23  ;;  %v2170_v23 = vld [vmem:[#allocation4 + $0x130] sm:$0xff] }
0x10c9   : > { %v1877_v25 = vmul.f32 0.2, %v1873_v21  ;;  %vm1875_vm9 = vcmp.ge.f32.partialorder %v1873_v21, 0.0  ;;  %v4872_v10 = vpack.c.bf16 %v2171_v8, %v2170_v23  ;;  %v2469_v23 = vld [vmem:[#allocation4 + $0x188] sm:$0xff] }
0x10ca   : > { %vm1876_vm10 = vcmp.ge.f32.partialorder %v1874_v24, 0.0  ;;  %v1878_v22 = vmul.f32 0.2, %v1874_v24 }
0x10cb   : > { %v1879_v26 = vsel %vm1875_vm9, %v1873_v21, %v1877_v25  ;;  %v2174_v25 = vld [vmem:[#allocation4 + $0x150] sm:$0xff] }
0x10cc   : > { %v1881_v27 = vadd.f32 %v1879_v26, %v5497_v32  ;;  %v1880_v59 = vsel %vm1876_vm10, %v1874_v24, %v1878_v22  ;;  %v2175_v22 = vld [vmem:[#allocation4 + $0x158] sm:$0xff] }
0x10cd   : > { %v1882_v30 = vadd.f32 %v1880_v59, %v5504_v37  ;;  %v938_v37 = vsel %vm188_vm0, %v5493_v28, 0.0  ;;  %v4880_v26 = vpack.c.bf16 %v2175_v22, %v2174_v25  ;;  %v4296_v25 = vld [vmem:[#allocation4 + $0x190] ss:$0 sm:$0xff] }
0x10ce   : > { %v1883_v29 = vsel %vm188_vm0, %v1881_v27, -inf }
0x10cf   : > { %1884 = vmax.xlane.f32.xlu0 %v1883_v29  ;;  %v1886_v31 = vsel %vm188_vm0, %v1882_v30, -inf }
0x10d3   : > { %1887 = vmax.xlane.f32.xlu0 %v1886_v31 }
0x115c   : > { %v1885_v33 = vpop.xlane.xlu0 %1884 }
0x115d   : > { %v1889_v35 = vsub.f32 %v1881_v27, %v1885_v33  ;;  %v4285_v27 = vld [vmem:[#allocation4 + $0x118] ss:$0 sm:$0xff] }
0x115f   : > { %v1891_v36 = vmul.f32 1.442695, %v1889_v35 }
0x1160   : > { %v1888_v38 = vpop.xlane.xlu0 %1887 }
0x1161   : > { %5066 = vpow2.f32 %v1891_v36  ;;  %v1890_v39 = vsub.f32 %v1882_v30, %v1888_v38 }
0x1163   : > { %v1893_v4 = vmul.f32 1.442695, %v1890_v39 }
0x1165   : > { %5068 = vpow2.f32 %v1893_v4  ;;  %v2340_v4 = vld [vmem:[#allocation4 + $0x168] sm:$0xff] }
0x116b   : > { %v5067_v40 = vpop.eup %5066 }
0x116c   : > { %v1895_v32 = vsel %vm188_vm0, %v5067_v40, 0.0 }
0x116d   : > { %1896 = vadd.xlane.f32.xlu0 %v1895_v32 }
0x116f   : > { %v5069_v41 = vpop.eup %5068 }
0x1170   : > { %v1898_v42 = vsel %vm188_vm0, %v5069_v41, 0.0 }
0x1171   : > { %1899 = vadd.xlane.f32.xlu0 %v1898_v42 }
0x1175   : > { %939 = vadd.xlane.f32.xlu0 %v938_v37 }
0x1179   : > { %942 = vadd.xlane.f32.xlu0 %v941_v43 }
0x11fa   : > { %v1897_v44 = vpop.xlane.xlu0 %1896 }
0x11fb   : > { %5070 = vrcp.f32 %v1897_v44 }
0x11fe   : > { %v1900_v45 = vpop.xlane.xlu0 %1899 }
0x11ff   : > { %5072 = vrcp.f32 %v1900_v45 }
0x1202   : > { %v940_v46 = vpop.xlane.xlu0 %939 }
0x1203   : > { %5074 = vrsqrt.f32 %v940_v46 }
0x1205   : > { %v5071_v47 = vpop.eup %5070 }
0x1206   : > { %v943_v48 = vpop.xlane.xlu0 %942  ;;  %v1903_v49 = vmul.f32 %v5071_v47, %v5067_v40  ;;  %v2341_v40 = vld [vmem:[#allocation4 + $0x170] sm:$0xff]  ;;  %v5252_v47 = vmov 0  }
0x1207   : > { %5076 = vrsqrt.f32 %v943_v48  ;;  %v4888_v32 = vpack.c.bf16 %v2341_v40, %v2340_v4  ;;  %5016 = vset.pattern.permute.xlu1 %v5252_v47  ;;  %v4293_v48 = vld [vmem:[#allocation4 + $0x178] ss:$0 sm:$0xff] }
0x1208   : > { %4631 = vmatprep.mubr.msk.f32.mxu1 %vm188_vm0, %v1903_v49 }
0x1209   : > { %v5073_v50 = vpop.eup %5072 }
0x120a   : > { %v1904_v51 = vmul.f32 %v5073_v50, %v5069_v41  ;;  %v4290_v41 = vld [vmem:[#allocation4 + $0x160] ss:$0 sm:$0xff] }
0x120c   : > { %4632 = vmatmul.mubr.msk.f32.vlgmr.msra.gmra.mrb[12].mxu1 %vm188_vm0, %v1904_v51 }
0x120d   : > { %v5075_v52 = vpop.eup %5074 }
0x120e   : > { %948 = vxpose.xlu0.b32.start [1/2] (short) (narrow) %v5075_v52, 8  ;;  %v946_v62 = vmul.f32 %v5075_v52, %v5493_v28 }
0x1211   : > { %v5077_v53 = vpop.eup %5076 }
0x1212   : > { %949 = vxpose.xlu0.b32.end [2/2] (short) (narrow) %v5077_v53, 8  ;;  %v947_v0 = vmul.f32 %v5077_v53, %v5499_v34  ;;  %v2169_v34 = vld [vmem:[#allocation4 + $0x128] sm:$0xff] }
0x123b   : > { %5017 = vset.pattern.permute.xlu0 %v5252_v47  ;;  %v2819_v47 = vld [vmem:[#allocation4 + $0x1e8] sm:$0xff] }
0x128e   : > { %v964_v61 = vpop.trf.xlu0 }
0x128f   : > { %v983_v1 = vrot.slane %v964_v61, %v5487_v18  ;;  %v2168_v18 = vld [vmem:[#allocation4 + $0x120] sm:$0xff] }
0x1290   : > { %v4868_v21 = vpack.c.bf16 %v2169_v34, %v2168_v18 }
0x1291   : > { %v984_v2 = vmul.f32 %v983_v1, %v946_v62  ;;  %v985_v3 = vmul.f32 %v983_v1, %v947_v0 }
0x1293   : > { %4649 = vmatprep.mubr.msk.f32.mxu1 %vm188_vm0, %v984_v2 }
0x12df   : > { %v4633_v6 = vpop.f32.mrb[12].mxu1 }
0x12e0   : > { %v1988_v7 = vadd.f32 %v4633_v6, %v4280_v5  ;;  %v1982_v16 = vpop.f32.mrb[13].mxu1 }
0x12e1   : > { %v1983_v9 = vadd.f32 %v4280_v5, %v1982_v16 }
0x12e2   : > { %v1992_v13 = vadd.f32 %v1988_v7, %v1656_v15  ;;  %v2173_v15 = vld [vmem:[#allocation4 + $0x148] sm:$0xff] }
0x12e3   : > { %v1991_v11 = vadd.f32 %v1983_v9, %v1655_v14  ;;  %v2172_v14 = vld [vmem:[#allocation4 + $0x140] sm:$0xff] }
0x12e4   : > { %v1994_v12 = vmax.f32 %v1992_v13, 0.0  ;;  %v4876_v24 = vpack.c.bf16 %v2173_v15, %v2172_v14 }
0x12e5   : > { %v1993_v28 = vmax.f32 %v1991_v11, 0.0 }
0x12e7   : > { %4642 = vmatprep.mubr.msk.f32.mxu0 %vm1071_vm5, %v1993_v28 }
0x12e8   : > { %4643 = vmatmul.mubr.msk.f32.vlgmr.msra.gmra.mrb[16].mxu0 %vm1071_vm5, %v1994_v12  ;;  %vm2176_vm5 = vcmask 523264  }
0x12e9   : > { %4675 = vmatprep.mubr.msk.f32.mxu0 %vm188_vm0, %v984_v2 }
0x13bb   : > { %v4644_v17 = vpop.f32.mrb[16].mxu0 }
0x13bc   : > { %v2071_v19 = vpop.f32.mrb[17].mxu0 }
0x13bd   : > { %v4864_v20 = vpack.c.bf16 %v4644_v17, %v2071_v19 }
0x13bf   : > { %4865 = vmatprep.subr.bf16.mxu1 %v4864_v20 }
0x13c0   : > { %4867 = vmatpush3.bf16.msra.mxu1 %v4864_v20 }
0x13c1   : > { %4869 = vmatprep.subr.bf16.mxu1 %v4868_v21 }
0x13c3   : > { %4650 = vmatmul.mubr.msk.f32.vlgmr.msra.gmra.mrb[14].mxu1 %vm188_vm0, %v985_v3 }
0x13c4   : > { %4871 = vmatpush3.bf16.msra.mxu1 %v4868_v21  ;;  %v2468_v21 = vld [vmem:[#allocation4 + $0x180] sm:$0xff] }
0x13c5   : > { %4873 = vmatprep.subr.bf16.mxu1 %v4872_v10  ;;  %v4892_v8 = vpack.c.bf16 %v2469_v23, %v2468_v21 }
0x13c8   : > { %4875 = vmatpush3.bf16.msra.mxu1 %v4872_v10 }
0x13c9   : > { %4877 = vmatprep.subr.bf16.mxu1 %v4876_v24 }
0x13cc   : > { %4879 = vmatpush3.bf16.msra.mxu1 %v4876_v24 }
0x13cd   : > { %4881 = vmatprep.subr.bf16.mxu1 %v4880_v26 }
0x13d0   : > { %4883 = vmatpush3.bf16.msra.mxu1 %v4880_v26 }
0x1496   : > { %v4651_v59 = vpop.f32.mrb[14].mxu1 }
0x1497   : > { %v2163_v29 = vadd.f32 %v4651_v59, %v4285_v27  ;;  %v2157_v30 = vpop.f32.mrb[15].mxu1 }
0x1498   : > { %v2158_v31 = vadd.f32 %v4285_v27, %v2157_v30 }
0x1499   : > { %v2167_v35 = vmax.f32 %v2163_v29, 0.0 }
0x149a   : > { %v2166_v33 = vmax.f32 %v2158_v31, 0.0 }
0x149c   : > { %4668 = vmatprep.mubr.msk.f32.mxu1 %vm2176_vm5, %v2166_v33 }
0x149d   : > { %4669 = vmatmul.mubr.msk.f32.vlgmr.msra.gmra.mrb[16].mxu1 %vm2176_vm5, %v2167_v35 }
0x1570   : > { %v4670_v36 = vpop.f32.mrb[16].mxu1 }
0x1571   : > { %v2249_v38 = vpop.f32.mrb[17].mxu1 }
0x1572   : > { %v4884_v39 = vpack.c.bf16 %v4670_v36, %v2249_v38 }
0x1574   : > { %4885 = vmatprep.subr.bf16.mxu0 %v4884_v39 }
0x1575   : > { %4887 = vmatpush3.bf16.msra.mxu0 %v4884_v39 }
0x1576   : > { %4889 = vmatprep.subr.bf16.mxu0 %v4888_v32 }
0x1578   : > { %4676 = vmatmul.mubr.msk.f32.vlgmr.msra.gmra.mrb[18].mxu0 %vm188_vm0, %v985_v3 }
0x1579   : > { %4891 = vmatpush3.bf16.msra.mxu0 %v4888_v32 }
0x157a   : > { %4893 = vmatprep.subr.bf16.mxu0 %v4892_v8 }
0x164b   : > { %v4677_v42 = vpop.f32.mrb[18].mxu0 }
0x164c   : > { %v2335_v37 = vadd.f32 %v4677_v42, %v4290_v41  ;;  %v2329_v43 = vpop.f32.mrb[19].mxu0  ;;  %v2599_v42 = vld [vmem:[#allocation4 + $0x1a8] sm:$0xff] }
0x164d   : > { %v2330_v44 = vadd.f32 %v4290_v41, %v2329_v43 }
0x164e   : > { %v5581_v46 = vmax.f32 %v2335_v37, 0.0  ;;  %v2600_v37 = vld [vmem:[#allocation4 + $0x1b0] sm:$0xff] }
0x164f   : > { %v5579_v45 = vmax.f32 %v2330_v44, 0.0  ;;  %v4896_v43 = vpack.c.bf16 %v2600_v37, %v2599_v42  ;;  %v2818_v44 = vld [vmem:[#allocation4 + $0x1e0] sm:$0xff] }
0x1650   : > { %v3168_v37 = vld [vmem:[#allocation4 + $0x240] sm:$0xff] }
0x1651   : > { %4682 = vmatprep.mubr.msk.f32.mxu0 %vm188_vm0, %v5579_v45 }
0x1652   : > { %4683 = vmatmul.mubr.msk.f32.vlgmr.msra.gmra.mrb[20].mxu0 %vm188_vm0, %v5581_v46 }
0x1653   : > { %4895 = vmatpush3.bf16.msra.mxu0 %v4892_v8 }
0x1654   : > { %4897 = vmatprep.subr.bf16.mxu0 %v4896_v43 }
0x1725   : > { %v4684_v49 = vpop.f32.mrb[20].mxu0 }
0x1726   : > { %v2425_v50 = vadd.f32 %v4684_v49, %v4293_v48  ;;  %v2419_v51 = vpop.f32.mrb[21].mxu0 }
0x1727   : > { %v2420_v52 = vadd.f32 %v4293_v48, %v2419_v51  ;;  %v4900_v48 = vpack.c.bf16 %v2819_v47, %v2818_v44 }
0x1728   : > { %v2430_v53 = vsel %vm2428_vm11, %v2425_v50, -inf }
0x1729   : > { %v2429_v54 = vsel %vm2428_vm11, %v2420_v52, -inf }
0x172a   : > { %v2431_v55 = vmax.f32 %v2429_v54, %v2430_v53 }
0x172c   : > { %v2432_v56 = vrot.slane %v2431_v55, 4 }
0x172e   : > { %v2433_v57 = vmax.f32 %v2431_v55, %v2432_v56  ;;  %v4299_v56 = vld [vmem:[#allocation4 + $0x198] ss:$0 sm:$0xff] }
0x1730   : > { %v2434_v58 = vrot.slane %v2433_v57, 2 }
0x1732   : > { %v2435_v60 = vmax.f32 %v2433_v57, %v2434_v58  ;;  %v4300_v58 = vld [vmem:[#allocation4 + $0x1a0] ss:$0 sm:$0xff] }
0x1734   : > { %v2436_v61 = vrot.slane %v2435_v60, 1 }
0x1736   : > { %v2437_v62 = vmax.f32 %v2435_v60, %v2436_v61 }
0x1738   : > { %v2438_v0 = vsub.f32 %v2420_v52, %v2437_v62  ;;  %v2439_v1 = vsub.f32 %v2425_v50, %v2437_v62 }
0x173a   : > { %v2440_v2 = vmul.f32 1.442695, %v2438_v0  ;;  %v2442_v3 = vmul.f32 1.442695, %v2439_v1 }
0x173c   : > { %5078 = vpow2.f32 %v2440_v2 }
0x173d   : > { %5080 = vpow2.f32 %v2442_v3 }
0x1746   : > { %v5079_v5 = vpop.eup %5078 }
0x1747   : > { %v5081_v6 = vpop.eup %5080  ;;  %v2444_v7 = vsel %vm2428_vm11, %v5079_v5, 0.0 }
0x1748   : > { %v2445_v16 = vsel %vm2428_vm11, %v5081_v6, 0.0 }
0x1749   : > { %v2446_v9 = vadd.f32 %v2445_v16, %v2444_v7  ;;  %v4301_v16 = vld [vmem:[#allocation4 + $0x1b8] ss:$0 sm:$0xff] }
0x174b   : > { %v2447_v13 = vrot.slane %v2446_v9, 4 }
0x174d   : > { %v2448_v11 = vadd.f32 %v2447_v13, %v2446_v9 }
0x174f   : > { %v2449_v28 = vrot.slane %v2448_v11, 2 }
0x1751   : > { %v2450_v12 = vadd.f32 %v2449_v28, %v2448_v11  ;;  %v4309_v28 = vld [vmem:[#allocation4 + $0x1f0] ss:$0 sm:$0xff] }
0x1753   : > { %v2451_v18 = vrot.slane %v2450_v12, 1 }
0x1755   : > { %v2452_v34 = vadd.f32 %v2451_v18, %v2450_v12 }
0x1757   : > { %5082 = vrcp.f32 %v2452_v34 }
0x1761   : > { %v5083_v17 = vpop.eup %5082 }
0x1762   : > { %v2454_v19 = vmul.f32 %v5083_v17, %v5079_v5  ;;  %v2455_v20 = vmul.f32 %v5083_v17, %v5081_v6 }
0x1764   : > { %2458 = vperm.xlu1 %5016, %v2454_v19  }
0x1768   : > { %2463 = vperm.xlu1 %5016, %v2455_v20  }
0x17e3   : > { %v2459_v10 = vpop.permute.xlu1 %2458 }
0x17e4   : > { %v2466_v14 = vmul.f32 %v2459_v10, %v5579_v45 }
0x17e6   : > { %4689 = vmatprep.mubr.msk.f32.mxu0 %vm188_vm0, %v2466_v14 }
0x17e7   : > { %v2464_v15 = vpop.permute.xlu1 %2463 }
0x17e8   : > { %v2467_v24 = vmul.f32 %v2464_v15, %v5581_v46 }
0x17ea   : > { %4690 = vmatmul.mubr.msk.f32.vlgmr.msra.gmra.mrb[22].mxu0 %vm188_vm0, %v2467_v24 }
0x17eb   : > { %4899 = vmatpush3.bf16.msra.mxu0 %v4896_v43 }
0x17ec   : > { %4901 = vmatprep.subr.bf16.mxu0 %v4900_v48 }
0x18bd   : > { %v4691_v22 = vpop.f32.mrb[22].mxu0 }
0x18be   : > { %v2553_v26 = vadd.f32 %v4691_v22, %v4296_v25  ;;  %v2547_v27 = vpop.f32.mrb[23].mxu0 }
0x18bf   : > { %v2548_v59 = vadd.f32 %v4296_v25, %v2547_v27 }
0x18c0   : > { %v2559_v29 = vsel %vm188_vm0, %v2553_v26, 0.0 }
0x18c1   : > { %2560 = vadd.xlane.f32.xlu0 %v2559_v29  ;;  %v2556_v30 = vsel %vm188_vm0, %v2548_v59, 0.0 }
0x18c2   : > { %2557 = vadd.xlane.f32.xlu1 %v2556_v30 }
0x18d7   : > { %2827 = vrot.lane.b32.xlu0 %v5581_v46, %s5243_s15 }
0x194e   : > { %v2561_v31 = vpop.xlane.xlu0 %2560 }
0x194f   : > { %v2564_v33 = vmul.f32 0.0625, %v2561_v31  ;;  %v2558_v35 = vpop.xlane.xlu1 %2557  ;;  %v4321_v31 = vld [vmem:[#allocation4 + $0x208] ss:$0 sm:$0xff] }
0x1950   : > { %v2563_v36 = vmul.f32 0.0625, %v2558_v35 }
0x1951   : > { %v2566_v38 = vsub.f32 %v2553_v26, %v2564_v33  ;;  %v4322_v33 = vld [vmem:[#allocation4 + $0x210] ss:$0 sm:$0xff] }
0x1952   : > { %v2565_v39 = vsub.f32 %v2548_v59, %v2563_v36  ;;  %v5609_v7 = vpop.permute.xlu0 %2827 }
0x1953   : > { %v2568_v32 = vmul.f32 %v2566_v38, %v2566_v38 }
0x1954   : > { %v2567_v4 = vmul.f32 %v2565_v39, %v2565_v39 }
0x1955   : > { %v2572_v41 = vsel %vm188_vm0, %v2568_v32, 0.0 }
0x1956   : > { %v2569_v40 = vsel %vm188_vm0, %v2567_v4, 0.0 }
0x1957   : > { %2570 = vadd.xlane.f32.xlu1 %v2569_v40 }
0x195b   : > { %2573 = vadd.xlane.f32.xlu1 %v2572_v41 }
0x196c   : > { %2825 = vrot.lane.b32.xlu1 %v5579_v45, %s5243_s15 }
0x19e4   : > { %v2571_v49 = vpop.xlane.xlu1 %2570 }
0x19e5   : > { %v2575_v50 = vmul.f32 0.0625, %v2571_v49 }
0x19e7   : > { %v2577_v51 = vadd.f32 1e-05, %v2575_v50 }
0x19e8   : > { %v2574_v52 = vpop.xlane.xlu1 %2573 }
0x19e9   : > { %5084 = vrsqrt.f32 %v2577_v51  ;;  %v2576_v53 = vmul.f32 0.0625, %v2574_v52 }
0x19eb   : > { %v2578_v54 = vadd.f32 1e-05, %v2576_v53 }
0x19ec   : > { %v5604_v6 = vpop.permute.xlu1 %2825 }
0x19ed   : > { %5086 = vrsqrt.f32 %v2578_v54 }
0x19f3   : > { %v5085_v55 = vpop.eup %5084 }
0x19f4   : > { %v2581_v57 = vmul.f32 %v5085_v55, %v2565_v39 }
0x19f6   : > { %v2588_v60 = vmul.f32 %v4299_v56, %v2581_v57 }
0x19f7   : > { %v5087_v61 = vpop.eup %5086 }
0x19f8   : > { %v2582_v62 = vmul.f32 %v5087_v61, %v2566_v38  ;;  %v2595_v0 = vadd.f32 %v4300_v58, %v2588_v60 }
0x19fa   : > { %v2589_v1 = vmul.f32 %v4299_v56, %v2582_v62  ;;  %v2597_v2 = vmax.f32 %v2595_v0, 0.0 }
0x19fc   : > { %v2596_v3 = vadd.f32 %v4300_v58, %v2589_v1  ;;  %4696 = vmatprep.mubr.msk.f32.mxu0 %vm188_vm0, %v2597_v2 }
0x19fe   : > { %v2598_v5 = vmax.f32 %v2596_v3, 0.0 }
0x1a00   : > { %4697 = vmatmul.mubr.msk.f32.vlgmr.msra.gmra.mrb[24].mxu0 %vm188_vm0, %v2598_v5 }
0x1a01   : > { %4903 = vmatpush3.bf16.msra.mxu0 %v4900_v48  ;;  %4708 = vmatprep.mubr.msk.f32.mxu0 %vm188_vm0, %v5604_v6 }
0x1a02   : > { %4718 = vmatprep.subr.mxu0 %v3168_v37 }
0x1a04   : > { %4709 = vmatmul.mubr.msk.f32.vlgmr.msra.gmra.mrb[26].mxu0 %vm188_vm0, %v5609_v7 }
0x1a05   : > { %4719 = vmatpush3.msra.mxu0 %v3168_v37 }
0x1ad3   : > { %v4698_v9 = vpop.f32.mrb[24].mxu0 }
0x1ad4   : > { %v2678_v13 = vpop.f32.mrb[25].mxu0  ;;  %v2684_v35 = vadd.f32 %v4698_v9, %v4301_v16 }
0x1ad5   : > { %v5613_v11 = vadd.f32 %v4301_v16, %v2678_v13 }
0x1ad6   : > { %v2691_v36 = vsel %vm2687_vm12, %v2684_v35, 0.0 }
0x1ad7   : > { %v4710_v12 = vpop.f32.mrb[26].mxu0  ;;  %v2688_v61 = vsel %vm2687_vm12, %v5613_v11, 0.0 }
0x1ad8   : > { %v2899_v18 = vpop.f32.mrb[27].mxu0  ;;  %v5619_v17 = vadd.f32 %v4710_v12, %v4309_v28 }
0x1ad9   : > { %v5615_v34 = vadd.f32 %v4309_v28, %v2899_v18 }
0x1ada   : > { %v2911_v62 = vsel %vm188_vm0, %v5619_v17, 0.0 }
0x1adb   : > { %3104 = vrot.lane.b32.xlu1 %v5615_v34, %s5243_s15  ;;  %v2908_v38 = vsel %vm188_vm0, %v5615_v34, 0.0 }
0x1adf   : > { %3106 = vrot.lane.b32.xlu1 %v5619_v17, %s5243_s15 }
0x1b4d   : > { %v3105_v19 = vpop.permute.xlu1 %3104 }
0x1b4e   : > { %v3110_v20 = vsel %vm2687_vm12, %v3105_v19, 0.0 }
0x1b4f   : > { %3111 = vadd.xlane.f32.xlu1 %v3110_v20 }
0x1b51   : > { %v3107_v21 = vpop.permute.xlu1 %3106 }
0x1b52   : > { %v3113_v23 = vsel %vm2687_vm12, %v3107_v21, 0.0 }
0x1b53   : > { %3114 = vadd.xlane.f32.xlu0 %v3113_v23 }
0x1bdc   : > { %v3112_v8 = vpop.xlane.xlu1 %3111 }
0x1bdd   : > { %v3116_v10 = vmul.f32 0.125, %v3112_v8 }
0x1bdf   : > { %v3118_v14 = vsub.f32 %v5615_v34, %v3116_v10 }
0x1be0   : > { %v3115_v15 = vpop.xlane.xlu0 %3114 }
0x1be1   : > { %v3117_v24 = vmul.f32 0.125, %v3115_v15  ;;  %v3120_v25 = vmul.f32 %v3118_v14, %v3118_v14 }
0x1be3   : > { %v3119_v22 = vsub.f32 %v5619_v17, %v3117_v24  ;;  %3124 = vrot.lane.b32.xlu1 %v3120_v25, %s5243_s15  ;;  %v2731_v24 = vld [vmem:[#allocation4 + $0x1d0] sm:$0xff] }
0x1be4   : > { %4699 = vmatprep.subr.mxu1 %v2731_v24 }
0x1be5   : > { %v3121_v26 = vmul.f32 %v3119_v22, %v3119_v22  ;;  %4700 = vmatpush3.msra.mxu1 %v2731_v24 }
0x1be7   : > { %3126 = vrot.lane.b32.xlu0 %v3121_v26, %s5243_s15 }
0x1c55   : > { %v3125_v27 = vpop.permute.xlu1 %3124 }
0x1c56   : > { %v3130_v59 = vsel %vm2687_vm12, %v3125_v27, 0.0  ;;  %v4323_v27 = vld [vmem:[#allocation4 + $0x248] ss:$0 sm:$0xff] }
0x1c57   : > { %3131 = vadd.xlane.f32.xlu1 %v3130_v59 }
0x1c59   : > { %v3127_v29 = vpop.permute.xlu0 %3126 }
0x1c5a   : > { %v3133_v30 = vsel %vm2687_vm12, %v3127_v29, 0.0 }
0x1c5b   : > { %3134 = vadd.xlane.f32.xlu0 %v3133_v30 }
0x1c68   : > { %3150 = vrot.lane.b32.xlu1 %v4321_v31, %s5253_s20 }
0x1c71   : > { %3161 = vrot.lane.b32.xlu0 %v4322_v33, %s5253_s20 }
0x1c90   : > { %2692 = vadd.xlane.f32.xlu0 %v2691_v36 }
0x1c94   : > { %2909 = vadd.xlane.f32.xlu0 %v2908_v38 }
0x1ce4   : > { %v3132_v39 = vpop.xlane.xlu1 %3131 }
0x1ce5   : > { %v3136_v4 = vmul.f32 0.125, %v3132_v39 }
0x1ce7   : > { %v3138_v40 = vadd.f32 1e-05, %v3136_v4 }
0x1ce8   : > { %v3135_v32 = vpop.xlane.xlu0 %3134  ;;  %v3151_v44 = vpop.permute.xlu1 %3150 }
0x1ce9   : > { %5088 = vrsqrt.f32 %v3138_v40  ;;  %v3137_v41 = vmul.f32 0.125, %v3135_v32 }
0x1ceb   : > { %v3139_v42 = vadd.f32 1e-05, %v3137_v41 }
0x1cec   : > { %v3162_v48 = vpop.permute.xlu0 %3161 }
0x1ced   : > { %5090 = vrsqrt.f32 %v3139_v42 }
0x1cf3   : > { %v5089_v43 = vpop.eup %5088 }
0x1cf4   : > { %v3142_v47 = vmul.f32 %v5089_v43, %v3118_v14 }
0x1cf6   : > { %v3153_v49 = vmul.f32 %v3151_v44, %v3142_v47  ;;  %v4304_v47 = vld [vmem:[#allocation4 + $0x1c0] ss:$0 sm:$0xff] }
0x1cf7   : > { %v5091_v50 = vpop.eup %5090 }
0x1cf8   : > { %v3143_v51 = vmul.f32 %v5091_v50, %v3119_v22  ;;  %v3164_v52 = vadd.f32 %v3162_v48, %v3153_v49 }
0x1cfa   : > { %v3154_v53 = vmul.f32 %v3151_v44, %v3143_v51  ;;  %v3166_v54 = vmax.f32 %v3164_v52, 0.0  ;;  %v4305_v51 = vld [vmem:[#allocation4 + $0x1c8] ss:$0 sm:$0xff] }
0x1cfc   : > { %v3165_v55 = vadd.f32 %v3162_v48, %v3154_v53  ;;  %3176 = vrot.lane.b32.xlu1 %v3166_v54, %s5243_s15 }
0x1cfe   : > { %v3167_v56 = vmax.f32 %v3165_v55, 0.0  ;;  %v4312_v55 = vld [vmem:[#allocation4 + $0x1f8] ss:$0 sm:$0xff] }
0x1d00   : > { %3178 = vrot.lane.b32.xlu1 %v3167_v56, %s5243_s15 }
0x1d1d   : > { %v2693_v57 = vpop.xlane.xlu0 %2692 }
0x1d1e   : > { %v2696_v58 = vmul.f32 0.125, %v2693_v57 }
0x1d20   : > { %v5638_v60 = vsub.f32 %v2684_v35, %v2696_v58 }
0x1d21   : > { %v2910_v5 = vpop.xlane.xlu0 %2909 }
0x1d22   : > { %v2700_v0 = vmul.f32 %v5638_v60, %v5638_v60  ;;  %v2914_v16 = vmul.f32 0.0625, %v2910_v5 }
0x1d24   : > { %2689 = vadd.xlane.f32.xlu1 %v2688_v61  ;;  %v2704_v1 = vsel %vm2687_vm12, %v2700_v0, 0.0  ;;  %v2916_v28 = vsub.f32 %v5615_v34, %v2914_v16  ;;  %v2951_v34 = vld [vmem:[#allocation4 + $0x220] sm:$0xff] }
0x1d26   : > { %v2918_v8 = vmul.f32 %v2916_v28, %v2916_v28 }
0x1d28   : > { %2912 = vadd.xlane.f32.xlu1 %v2911_v62  ;;  %v2920_v15 = vsel %vm188_vm0, %v2918_v8, 0.0  ;;  %v4313_v62 = vld [vmem:[#allocation4 + $0x200] ss:$0 sm:$0xff] }
0x1d2c   : > { %2705 = vadd.xlane.f32.xlu1 %v2704_v1 }
0x1d6e   : > { %v3177_v2 = vpop.permute.xlu1 %3176 }
0x1d6f   : > { %4720 = vmatprep.mubr.msk.f32.mxu0 %vm2687_vm12, %v3177_v2 }
0x1d72   : > { %v3179_v3 = vpop.permute.xlu1 %3178 }
0x1d73   : > { %4721 = vmatmul.mubr.msk.f32.vlgmr.msra.gmra.mrb[28].mxu0 %vm2687_vm12, %v3179_v3 }
0x1db1   : > { %v2690_v9 = vpop.xlane.xlu1 %2689 }
0x1db2   : > { %v2695_v13 = vmul.f32 0.125, %v2690_v9 }
0x1db4   : > { %v2697_v12 = vsub.f32 %v5613_v11, %v2695_v13  ;;  %v2950_v11 = vld [vmem:[#allocation4 + $0x218] sm:$0xff] }
0x1db5   : > { %v2913_v18 = vpop.xlane.xlu1 %2912  ;;  %v4904_v25 = vpack.c.bf16 %v2951_v34, %v2950_v11  ;;  %v4314_v11 = vld [vmem:[#allocation4 + $0x228] ss:$0 sm:$0xff] }
0x1db6   : > { %v2915_v19 = vmul.f32 0.0625, %v2913_v18  ;;  %v2699_v20 = vmul.f32 %v2697_v12, %v2697_v12 }
0x1db7   : > { %4905 = vmatprep.subr.bf16.mxu1 %v4904_v25 }
0x1db8   : > { %v2917_v21 = vsub.f32 %v5619_v17, %v2915_v19  ;;  %v2701_v23 = vsel %vm2687_vm12, %v2699_v20, 0.0 }
0x1db9   : > { %2702 = vadd.xlane.f32.xlu0 %v2701_v23  ;;  %v2706_v22 = vpop.xlane.xlu1 %2705 }
0x1dba   : > { %v2919_v10 = vmul.f32 %v2917_v21, %v2917_v21  ;;  %v2708_v17 = vmul.f32 0.125, %v2706_v22 }
0x1dbc   : > { %v2923_v14 = vsel %vm188_vm0, %v2919_v10, 0.0  ;;  %v2710_v26 = vadd.f32 1e-05, %v2708_v17 }
0x1dbd   : > { %2924 = vadd.xlane.f32.xlu1 %v2923_v14  ;;  %2921 = vadd.xlane.f32.xlu0 %v2920_v15  ;;  %v3302_v14 = vld [vmem:[#allocation4 + $0x260] sm:$0xf] }
0x1dbe   : > { %5092 = vrsqrt.f32 %v2710_v26 }
0x1dc8   : > { %v5093_v43 = vpop.eup %5092 }
0x1dc9   : > { %v2714_v44 = vmul.f32 %v5093_v43, %v5638_v60 }
0x1dcb   : > { %v2721_v49 = vmul.f32 %v4304_v47, %v2714_v44 }
0x1dcd   : > { %v2728_v54 = vadd.f32 %v4305_v51, %v2721_v49 }
0x1dcf   : > { %v2730_v2 = vmax.f32 %v2728_v54, 0.0 }
0x1e46   : > { %v4722_v59 = vpop.f32.mrb[28].mxu0  ;;  %v2703_v29 = vpop.xlane.xlu0 %2702 }
0x1e47   : > { %v3256_v30 = vadd.f32 %v4722_v59, %v4323_v27  ;;  %v2707_v31 = vmul.f32 0.125, %v2703_v29  ;;  %v3250_v33 = vpop.f32.mrb[29].mxu0 }
0x1e48   : > { %v3251_v35 = vadd.f32 %v4323_v27, %v3250_v33 }
0x1e49   : > { %v2709_v36 = vadd.f32 1e-05, %v2707_v31  ;;  %v3262_v38 = vsel %vm364_vm1, %v3256_v30, 0.0 }
0x1e4a   : > { %3263 = vadd.xlane.f32.xlu1 %v3262_v38  ;;  %v2925_v39 = vpop.xlane.xlu1 %2924  ;;  %v2922_v4 = vpop.xlane.xlu0 %2921  ;;  %v3259_v40 = vsel %vm364_vm1, %v3251_v35, 0.0  ;;  %v4326_v38 = vld [vmem:[#allocation4 + $0x250] ss:$0 sm:$0xff] }
0x1e4b   : > { %5094 = vrsqrt.f32 %v2709_v36  ;;  %v2927_v32 = vmul.f32 0.0625, %v2925_v39  ;;  %v2926_v41 = vmul.f32 0.0625, %v2922_v4  ;;  %3260 = vadd.xlane.f32.xlu0 %v3259_v40 }
0x1e4d   : > { %v2929_v42 = vadd.f32 1e-05, %v2927_v32  ;;  %v2928_v37 = vadd.f32 1e-05, %v2926_v41  ;;  %v4327_v32 = vld [vmem:[#allocation4 + $0x258] ss:$0 sm:$0xff] }
0x1e4f   : > { %5096 = vrsqrt.f32 %v2929_v42 }
0x1e50   : > { %5098 = vrsqrt.f32 %v2928_v37 }
0x1e55   : > { %v5095_v48 = vpop.eup %5094 }
0x1e56   : > { %v2713_v50 = vmul.f32 %v5095_v48, %v2697_v12 }
0x1e58   : > { %v2720_v52 = vmul.f32 %v4304_v47, %v2713_v50 }
0x1e59   : > { %v5097_v53 = vpop.eup %5096 }
0x1e5a   : > { %v5099_v56 = vpop.eup %5098  ;;  %v2933_v57 = vmul.f32 %v5097_v53, %v2917_v21  ;;  %v2727_v58 = vadd.f32 %v4305_v51, %v2720_v52 }
0x1e5b   : > { %v2932_v61 = vmul.f32 %v5099_v56, %v2916_v28 }
0x1e5c   : > { %v2729_v0 = vmax.f32 %v2727_v58, 0.0  ;;  %v2940_v1 = vmul.f32 %v4312_v55, %v2933_v57  ;;  %v4328_v58 = vld [vmem:[#allocation4 + $0x268] ss:$0 sm:$0xff] }
0x1e5d   : > { %v2939_v3 = vmul.f32 %v4312_v55, %v2932_v61 }
0x1e5e   : > { %4701 = vmatprep.mubr.msk.f32.mxu1 %vm2687_vm12, %v2729_v0  ;;  %v2947_v60 = vadd.f32 %v4313_v62, %v2940_v1 }
0x1e5f   : > { %4702 = vmatmul.mubr.msk.f32.vlgmr.msra.gmra.mrb[18].mxu1 %vm2687_vm12, %v2730_v2  ;;  %v2946_v5 = vadd.f32 %v4313_v62, %v2939_v3 }
0x1e60   : > { %4907 = vmatpush3.bf16.msra.mxu1 %v4904_v25  ;;  %v2949_v16 = vmax.f32 %v2947_v60, 0.0 }
0x1e61   : > { %v2948_v9 = vmax.f32 %v2946_v5, 0.0  ;;  %4723 = vmatprep.subr.msk.mxu1 %vm3314_vm13, %v3302_v14 }
0x1e63   : > { %4715 = vmatprep.mubr.msk.f32.mxu1 %vm188_vm0, %v2948_v9 }
0x1e64   : > { %4716 = vmatmul.mubr.msk.f32.vlgmr.msra.gmra.mrb[20].mxu1 %vm188_vm0, %v2949_v16 }
0x1e65   : > { %4724 = vmatpush3.msk.msra.mxu1 %vm3314_vm13, %v3302_v14  ;;  %v4318_v14 = vld [vmem:[#allocation4 + $0x238] ss:$0 sm:$0xff] }
0x1ed7   : > { %v3264_v13 = vpop.xlane.xlu1 %3263 }
0x1ed8   : > { %v3267_v28 = vmul.f32 0.25, %v3264_v13  ;;  %v3261_v12 = vpop.xlane.xlu0 %3260 }
0x1ed9   : > { %v3266_v18 = vmul.f32 0.25, %v3261_v12 }
0x1eda   : > { %v3269_v19 = vsub.f32 %v3256_v30, %v3267_v28 }
0x1edb   : > { %v3268_v20 = vsub.f32 %v3251_v35, %v3266_v18 }
0x1edc   : > { %v3271_v21 = vmul.f32 %v3269_v19, %v3269_v19 }
0x1edd   : > { %v3270_v23 = vmul.f32 %v3268_v20, %v3268_v20 }
0x1ede   : > { %v3275_v8 = vsel %vm364_vm1, %v3271_v21, 0.0 }
0x1edf   : > { %3276 = vadd.xlane.f32.xlu1 %v3275_v8  ;;  %v3272_v10 = vsel %vm364_vm1, %v3270_v23, 0.0  ;;  %v4317_v23 = vld [vmem:[#allocation4 + $0x230] ss:$0 sm:$0xff] }
0x1ee0   : > { %3273 = vadd.xlane.f32.xlu0 %v3272_v10 }
0x1f32   : > { %v5664_v15 = vpop.f32.mrb[18].mxu1 }
0x1f33   : > { %v5666_v24 = vpop.f32.mrb[19].mxu1 }
0x1f37   : > { %v4717_v34 = vpop.f32.mrb[20].mxu1 }
0x1f38   : > { %v3035_v25 = vadd.f32 %v4717_v34, %v4314_v11  ;;  %v3029_v22 = vpop.f32.mrb[21].mxu1 }
0x1f39   : > { %v3030_v17 = vadd.f32 %v4314_v11, %v3029_v22 }
0x1f3a   : > { %v3041_v26 = vsel %vm188_vm0, %v3035_v25, 0.0 }
0x1f3b   : > { %3042 = vadd.xlane.f32.xlu1 %v3041_v26  ;;  %v3038_v27 = vsel %vm188_vm0, %v3030_v17, 0.0 }
0x1f3c   : > { %3039 = vadd.xlane.f32.xlu0 %v3038_v27 }
0x1f6c   : > { %v3277_v59 = vpop.xlane.xlu1 %3276 }
0x1f6d   : > { %v3279_v29 = vmul.f32 0.25, %v3277_v59  ;;  %v3274_v30 = vpop.xlane.xlu0 %3273 }
0x1f6e   : > { %v3278_v31 = vmul.f32 0.25, %v3274_v30 }
0x1f6f   : > { %v3281_v33 = vadd.f32 1e-05, %v3279_v29 }
0x1f70   : > { %v3280_v35 = vadd.f32 1e-05, %v3278_v31 }
0x1f71   : > { %5100 = vrsqrt.f32 %v3281_v33 }
0x1f72   : > { %5102 = vrsqrt.f32 %v3280_v35 }
0x1f7b   : > { %v5101_v36 = vpop.eup %5100 }
0x1f7c   : > { %v5103_v39 = vpop.eup %5102  ;;  %v3285_v4 = vmul.f32 %v5101_v36, %v3269_v19 }
0x1f7d   : > { %v3284_v40 = vmul.f32 %v5103_v39, %v3268_v20  ;;  %v3421_v39 = vld [vmem:[#allocation4 + $0x280] sm:$0xff] }
0x1f7e   : > { %v3292_v41 = vmul.f32 %v4326_v38, %v3285_v4  ;;  %v3422_v4 = vld [vmem:[#allocation4 + $0x288] sm:$0xff] }
0x1f7f   : > { %v3291_v42 = vmul.f32 %v4326_v38, %v3284_v40  ;;  %v4908_v40 = vpack.c.bf16 %v3422_v4, %v3421_v39  ;;  %v4341_v4 = vld [vmem:[#allocation4 + $0x2b8] ss:$0 sm:$0xff] }
0x1f80   : > { %v3299_v37 = vadd.f32 %v4327_v32, %v3292_v41  ;;  %v3420_v41 = vld [vmem:[#allocation4 + $0x278] sm:$0xff] }
0x1f81   : > { %v3298_v43 = vadd.f32 %v4327_v32, %v3291_v42  ;;  %4909 = vmatprep.subr.bf16.mxu0 %v4908_v40  ;;  %v3419_v32 = vld [vmem:[#allocation4 + $0x270] sm:$0xff] }
0x1f82   : > { %v3301_v47 = vmax.f32 %v3299_v37, 0.0  ;;  %4911 = vmatpush3.bf16.msra.mxu0 %v4908_v40  ;;  %v4912_v42 = vpack.c.bf16 %v3420_v41, %v3419_v32 }
0x1f83   : > { %v3300_v44 = vmax.f32 %v3298_v43, 0.0 }
0x1f84   : > { %4913 = vmatprep.subr.bf16.mxu0 %v4912_v42 }
0x1f85   : > { %4725 = vmatprep.mubr.msk.f32.mxu1 %vm364_vm1, %v3300_v44 }
0x1f86   : > { %4726 = vmatmul.mubr.msk.f32.vlgmr.msra.gmra.mrb[22].mxu1 %vm364_vm1, %v3301_v47  ;;  %vm4146_vm1 = vcmask 15360  }
0x1fc8   : > { %v3043_v48 = vpop.xlane.xlu1 %3042 }
0x1fc9   : > { %v3045_v49 = vmul.f32 0.0625, %v3043_v48  ;;  %v3040_v50 = vpop.xlane.xlu0 %3039 }
0x1fca   : > { %v3044_v51 = vmul.f32 0.0625, %v3040_v50 }
0x1fcb   : > { %v3047_v52 = vsub.f32 %v3035_v25, %v3045_v49 }
0x1fcc   : > { %v3046_v53 = vsub.f32 %v3030_v17, %v3044_v51 }
0x1fcd   : > { %v3049_v54 = vmul.f32 %v3047_v52, %v3047_v52 }
0x1fce   : > { %v3048_v55 = vmul.f32 %v3046_v53, %v3046_v53 }
0x1fcf   : > { %v3053_v56 = vsel %vm188_vm0, %v3049_v54, 0.0 }
0x1fd0   : > { %3054 = vadd.xlane.f32.xlu1 %v3053_v56  ;;  %v3050_v57 = vsel %vm188_vm0, %v3048_v55, 0.0 }
0x1fd1   : > { %3051 = vadd.xlane.f32.xlu0 %v3050_v57 }
0x2059   : > { %v4727_v61 = vpop.f32.mrb[22].mxu1 }
0x205a   : > { %v3390_v62 = vadd.f32 %v4727_v61, %v4328_v58  ;;  %v3384_v0 = vpop.f32.mrb[23].mxu1  ;;  %v4338_v61 = vld [vmem:[#allocation4 + $0x290] ss:$0 sm:$0xff] }
0x205b   : > { %v3385_v1 = vadd.f32 %v4328_v58, %v3384_v0 }
0x205c   : > { %v4333_v2 = vmul.f32 -1.442695, %v3390_v62 }
0x205d   : > { %v4332_v3 = vmul.f32 -1.442695, %v3385_v1  ;;  %v3055_v60 = vpop.xlane.xlu1 %3054 }
0x205e   : > { %5104 = vpow2.f32 %v4333_v2  ;;  %v3057_v5 = vmul.f32 0.0625, %v3055_v60  ;;  %v3052_v16 = vpop.xlane.xlu0 %3051 }
0x205f   : > { %5106 = vpow2.f32 %v4332_v3  ;;  %v3056_v9 = vmul.f32 0.0625, %v3052_v16 }
0x2060   : > { %v3059_v13 = vadd.f32 1e-05, %v3057_v5 }
0x2061   : > { %v3058_v28 = vadd.f32 1e-05, %v3056_v9 }
0x2062   : > { %5108 = vrsqrt.f32 %v3059_v13 }
0x2063   : > { %5110 = vrsqrt.f32 %v3058_v28 }
0x2068   : > { %v5105_v12 = vpop.eup %5104 }
0x2069   : > { %v5107_v18 = vpop.eup %5106  ;;  %v3400_v19 = vadd.f32 1.0, %v5105_v12 }
0x206a   : > { %v3399_v20 = vadd.f32 1.0, %v5107_v18 }
0x206b   : > { %5112 = vrcp.f32 %v3400_v19 }
0x206c   : > { %v5109_v21 = vpop.eup %5108  ;;  %5114 = vrcp.f32 %v3399_v20 }
0x206d   : > { %v5111_v8 = vpop.eup %5110  ;;  %v3063_v10 = vmul.f32 %v5109_v21, %v3047_v52  ;;  %v3642_v21 = vld [vmem:[#allocation4 + $0x2a8] sm:$0xff] }
0x206e   : > { %v3062_v11 = vmul.f32 %v5111_v8, %v3046_v53 }
0x206f   : > { %v3070_v34 = vmul.f32 %v4317_v23, %v3063_v10 }
0x2070   : > { %v3069_v25 = vmul.f32 %v4317_v23, %v3062_v11  ;;  %v3643_v23 = vld [vmem:[#allocation4 + $0x2b0] sm:$0xff] }
0x2071   : > { %v3077_v22 = vadd.f32 %v4318_v14, %v3070_v34  ;;  %v4916_v8 = vpack.c.bf16 %v3643_v23, %v3642_v21 }
0x2072   : > { %v3076_v17 = vadd.f32 %v4318_v14, %v3069_v25 }
0x2073   : > { %v4320_v26 = vmul.f32 -1.442695, %v3077_v22  ;;  %4917 = vmatprep.subr.bf16.mxu1 %v4916_v8 }
0x2074   : > { %v4319_v27 = vmul.f32 -1.442695, %v3076_v17  ;;  %4919 = vmatpush3.bf16.msra.mxu1 %v4916_v8  ;;  %v4346_v8 = vld [vmem:[#allocation4 + $0x2e0] ss:$0 sm:$0xff] }
0x2075   : > { %v5113_v59 = vpop.eup %5112  ;;  %5116 = vpow2.f32 %v4320_v26  ;;  %v4339_v26 = vld [vmem:[#allocation4 + $0x298] ss:$0 sm:$0xff] }
0x2076   : > { %v5115_v29 = vpop.eup %5114  ;;  %5118 = vpow2.f32 %v4319_v27  ;;  %3412 = vperm.xlu1 %5016, %v5113_v59  }
0x2077   : > { %3407 = vperm.xlu0 %5017, %v5115_v29  }
0x207f   : > { %v5117_v30 = vpop.eup %5116 }
0x2080   : > { %v5119_v31 = vpop.eup %5118  ;;  %v3085_v35 = vadd.f32 1.0, %v5117_v30  ;;  %v4340_v30 = vld [vmem:[#allocation4 + $0x2a0] ss:$0 sm:$0xff] }
0x2081   : > { %v3084_v33 = vadd.f32 1.0, %v5119_v31 }
0x2083   : > { %5120 = vrcp.f32 %v3084_v33 }
0x2084   : > { %5122 = vrcp.f32 %v3085_v35 }
0x208d   : > { %v5121_v36 = vpop.eup %5120 }
0x208e   : > { %3092 = vrot.lane.b32.xlu1 %v5121_v36, %s5253_s20  ;;  %v5123_v38 = vpop.eup %5122 }
0x2092   : > { %3094 = vrot.lane.b32.xlu1 %v5123_v38, %s5253_s20 }
0x20f5   : > { %v3413_v37 = vpop.permute.xlu1 %3412 }
0x20f6   : > { %v3408_v43 = vpop.permute.xlu0 %3407  ;;  %v3416_v47 = vmul.f32 %v3413_v37, %v5581_v46 }
0x20f7   : > { %v3415_v44 = vmul.f32 %v3408_v43, %v5579_v45 }
0x20f8   : > { %v3418_v49 = vmul.f32 0.9, %v3416_v47 }
0x20f9   : > { %v3417_v48 = vmul.f32 0.9, %v3415_v44 }
0x20fb   : > { %3425 = vrot.lane.b32.xlu1 %v3417_v48, %s5243_s15 }
0x20ff   : > { %3427 = vrot.lane.b32.xlu1 %v3418_v49, %s5243_s15 }
0x2100   : > { %v3093_v50 = vpop.permute.xlu1 %3092 }
0x2101   : > { %v3098_v51 = vmul.f32 %v3093_v50, %v5579_v45 }
0x2103   : > { %v3100_v52 = vmul.f32 1.1, %v3098_v51 }
0x2104   : > { %v3095_v53 = vpop.permute.xlu1 %3094 }
0x2105   : > { %v3099_v54 = vmul.f32 %v3095_v53, %v5581_v46  ;;  %3510 = vrot.lane.b32.xlu1 %v3100_v52, %s5243_s15 }
0x2107   : > { %v3101_v55 = vmul.f32 1.1, %v3099_v54 }
0x2109   : > { %3512 = vrot.lane.b32.xlu1 %v3101_v55, %s5243_s15 }
0x216d   : > { %v3426_v56 = vpop.permute.xlu1 %3425 }
0x216e   : > { %4732 = vmatprep.mubr.msk.f32.mxu0 %vm188_vm0, %v3426_v56  ;;  %v3776_v56 = vld [vmem:[#allocation4 + $0x2d0] sm:$0xff] }
0x2171   : > { %v3428_v57 = vpop.permute.xlu1 %3427 }
0x2172   : > { %4733 = vmatmul.mubr.msk.f32.vlgmr.msra.gmra.mrb[30].mxu0 %vm188_vm0, %v3428_v57  ;;  %v3777_v57 = vld [vmem:[#allocation4 + $0x2d8] sm:$0xff] }
0x2173   : > { %4915 = vmatpush3.bf16.msra.mxu0 %v4912_v42 }
0x2177   : > { %v3511_v58 = vpop.permute.xlu1 %3510 }
0x2178   : > { %4739 = vmatprep.mubr.msk.f32.mxu0 %vm188_vm0, %v3511_v58  ;;  %v4920_v58 = vpack.c.bf16 %v3777_v57, %v3776_v56  ;;  %v4351_v56 = vld [vmem:[#allocation4 + $0x308] ss:$0 sm:$0xff] }
0x217a   : > { %4921 = vmatprep.subr.bf16.mxu1 %v4920_v58 }
0x217b   : > { %v3513_v45 = vpop.permute.xlu1 %3512 }
0x217c   : > { %4740 = vmatmul.mubr.msk.f32.vlgmr.msra.gmra.mrb[30].mxu0 %vm188_vm0, %v3513_v45 }
0x224f   : > { %v4741_v46 = vpop.f32.mrb[30].mxu0 }
0x2250   : > { %v3599_v62 = vadd.f32 %v4741_v46, %v4338_v61  ;;  %v3584_v0 = vpop.f32.mrb[31].mxu0 }
0x2251   : > { %v3598_v1 = vadd.f32 %v4338_v61, %v3584_v0 }
0x2252   : > { %v3603_v2 = vsel %vm188_vm0, %v3599_v62, 0.0 }
0x2253   : > { %3604 = vadd.xlane.f32.xlu0 %v3603_v2  ;;  %v3600_v3 = vsel %vm188_vm0, %v3598_v1, 0.0 }
0x2254   : > { %3601 = vadd.xlane.f32.xlu1 %v3600_v3  ;;  %v4344_v3 = vld [vmem:[#allocation4 + $0x2c0] ss:$0 sm:$0xff] }
0x22e0   : > { %v3605_v60 = vpop.xlane.xlu0 %3604 }
0x22e1   : > { %v3607_v5 = vmul.f32 0.0625, %v3605_v60  ;;  %v3602_v16 = vpop.xlane.xlu1 %3601 }
0x22e2   : > { %v3606_v9 = vmul.f32 0.0625, %v3602_v16 }
0x22e3   : > { %v3609_v13 = vsub.f32 %v3599_v62, %v3607_v5 }
0x22e4   : > { %v3608_v28 = vsub.f32 %v3598_v1, %v3606_v9  ;;  %v4345_v9 = vld [vmem:[#allocation4 + $0x2c8] ss:$0 sm:$0xff] }
0x22e5   : > { %v3611_v12 = vmul.f32 %v3609_v13, %v3609_v13 }
0x22e6   : > { %v3610_v18 = vmul.f32 %v3608_v28, %v3608_v28 }
0x22e7   : > { %v3615_v19 = vsel %vm188_vm0, %v3611_v12, 0.0 }
0x22e8   : > { %3616 = vadd.xlane.f32.xlu1 %v3615_v19  ;;  %v3612_v20 = vsel %vm188_vm0, %v3610_v18, 0.0 }
0x22e9   : > { %3613 = vadd.xlane.f32.xlu0 %v3612_v20 }
0x2375   : > { %v3617_v10 = vpop.xlane.xlu1 %3616 }
0x2376   : > { %v3619_v14 = vmul.f32 0.0625, %v3617_v10  ;;  %v3614_v11 = vpop.xlane.xlu0 %3613 }
0x2377   : > { %v3618_v34 = vmul.f32 0.0625, %v3614_v11 }
0x2378   : > { %v3621_v25 = vadd.f32 1e-05, %v3619_v14 }
0x2379   : > { %v3620_v22 = vadd.f32 1e-05, %v3618_v34 }
0x237a   : > { %5124 = vrsqrt.f32 %v3621_v25 }
0x237b   : > { %5126 = vrsqrt.f32 %v3620_v22 }
0x2384   : > { %v5125_v17 = vpop.eup %5124 }
0x2385   : > { %v5127_v27 = vpop.eup %5126  ;;  %v3625_v59 = vmul.f32 %v5125_v17, %v3609_v13 }
0x2386   : > { %v3624_v29 = vmul.f32 %v5127_v27, %v3608_v28 }
0x2387   : > { %v3632_v31 = vmul.f32 %v4339_v26, %v3625_v59 }
0x2388   : > { %v3631_v33 = vmul.f32 %v4339_v26, %v3624_v29 }
0x2389   : > { %v3639_v35 = vadd.f32 %v4340_v30, %v3632_v31 }
0x238a   : > { %v3638_v36 = vadd.f32 %v4340_v30, %v3631_v33 }
0x238b   : > { %v3641_v39 = vmax.f32 %v3639_v35, 0.0  ;;  %v3906_v35 = vld [vmem:[#allocation4 + $0x2f8] sm:$0xff] }
0x238c   : > { %v3640_v38 = vmax.f32 %v3638_v36, 0.0  ;;  %v3907_v36 = vld [vmem:[#allocation4 + $0x300] sm:$0xff] }
0x238e   : > { %4746 = vmatprep.mubr.msk.f32.mxu1 %vm188_vm0, %v3640_v38  ;;  %v4924_v38 = vpack.c.bf16 %v3907_v36, %v3906_v35 }
0x238f   : > { %4747 = vmatmul.mubr.msk.f32.vlgmr.msra.gmra.mrb[24].mxu1 %vm188_vm0, %v3641_v39 }
0x2390   : > { %4923 = vmatpush3.bf16.msra.mxu1 %v4920_v58  ;;  %4925 = vmatprep.subr.bf16.mxu0 %v4924_v38 }
0x2391   : > { %4927 = vmatpush3.bf16.msra.mxu0 %v4924_v38 }
0x2462   : > { %v4748_v40 = vpop.f32.mrb[24].mxu1 }
0x2463   : > { %v3727_v32 = vadd.f32 %v4748_v40, %v4341_v4  ;;  %v3721_v41 = vpop.f32.mrb[25].mxu1 }
0x2464   : > { %v3722_v42 = vadd.f32 %v4341_v4, %v3721_v41 }
0x2465   : > { %v3733_v37 = vsel %vm188_vm0, %v3727_v32, 0.0 }
0x2466   : > { %3734 = vadd.xlane.f32.xlu1 %v3733_v37  ;;  %v3730_v43 = vsel %vm188_vm0, %v3722_v42, 0.0 }
0x2467   : > { %3731 = vadd.xlane.f32.xlu0 %v3730_v43  ;;  %v4349_v43 = vld [vmem:[#allocation4 + $0x2e8] ss:$0 sm:$0xff] }
0x24f3   : > { %v3735_v44 = vpop.xlane.xlu1 %3734 }
0x24f4   : > { %v3737_v47 = vmul.f32 0.0625, %v3735_v44  ;;  %v3732_v48 = vpop.xlane.xlu0 %3731 }
0x24f5   : > { %v3736_v49 = vmul.f32 0.0625, %v3732_v48 }
0x24f6   : > { %v3739_v50 = vsub.f32 %v3727_v32, %v3737_v47 }
0x24f7   : > { %v3738_v51 = vsub.f32 %v3722_v42, %v3736_v49  ;;  %v4350_v49 = vld [vmem:[#allocation4 + $0x2f0] ss:$0 sm:$0xff] }
0x24f8   : > { %v3741_v52 = vmul.f32 %v3739_v50, %v3739_v50 }
0x24f9   : > { %v3740_v53 = vmul.f32 %v3738_v51, %v3738_v51 }
0x24fa   : > { %v3745_v54 = vsel %vm188_vm0, %v3741_v52, 0.0 }
0x24fb   : > { %3746 = vadd.xlane.f32.xlu1 %v3745_v54  ;;  %v3742_v55 = vsel %vm188_vm0, %v3740_v53, 0.0 }
0x24fc   : > { %3743 = vadd.xlane.f32.xlu0 %v3742_v55 }
0x2588   : > { %v3747_v45 = vpop.xlane.xlu1 %3746 }
0x2589   : > { %v3749_v61 = vmul.f32 0.0625, %v3747_v45  ;;  %v3744_v46 = vpop.xlane.xlu0 %3743 }
0x258a   : > { %v3748_v62 = vmul.f32 0.0625, %v3744_v46 }
0x258b   : > { %v3751_v0 = vadd.f32 1e-05, %v3749_v61 }
0x258c   : > { %v3750_v1 = vadd.f32 1e-05, %v3748_v62 }
0x258d   : > { %5128 = vrsqrt.f32 %v3751_v0 }
0x258e   : > { %5130 = vrsqrt.f32 %v3750_v1 }
0x2597   : > { %v5129_v2 = vpop.eup %5128 }
0x2598   : > { %v5131_v60 = vpop.eup %5130  ;;  %v3755_v5 = vmul.f32 %v5129_v2, %v3739_v50 }
0x2599   : > { %v3754_v16 = vmul.f32 %v5131_v60, %v3738_v51 }
0x259a   : > { %v3762_v13 = vmul.f32 %v4344_v3, %v3755_v5 }
0x259b   : > { %v3761_v28 = vmul.f32 %v4344_v3, %v3754_v16 }
0x259c   : > { %v3769_v12 = vadd.f32 %v4345_v9, %v3762_v13 }
0x259d   : > { %v3768_v18 = vadd.f32 %v4345_v9, %v3761_v28 }
0x259e   : > { %v3771_v19 = vmax.f32 %v3769_v12, 0.0  ;;  %v4306_v12 = vld [vmem:[#allocation4 + $0x1d8] ss:$0 sm:$0xff] }
0x259f   : > { %v3770_v20 = vmax.f32 %v3768_v18, 0.0  ;;  %v2815_v18 = vadd.f32 %v5664_v15, %v4306_v12 }
0x25a0   : > { %v3775_v23 = vadd.f32 %v3771_v19, %v5609_v7  ;;  %v2810_v19 = vadd.f32 %v4306_v12, %v5666_v24 }
0x25a1   : > { %v3774_v21 = vadd.f32 %v3770_v20, %v5604_v6  ;;  %v4036_v20 = vld [vmem:[#allocation4 + $0x320] sm:$0xff] }
0x25a2   : > { %4763 = vmatprep.subr.mxu1 %v4036_v20 }
0x25a3   : > { %4753 = vmatprep.mubr.msk.f32.mxu1 %vm188_vm0, %v3774_v21 }
0x25a4   : > { %4754 = vmatmul.mubr.msk.f32.vlgmr.msra.gmra.mrb[26].mxu1 %vm188_vm0, %v3775_v23 }
0x25a5   : > { %4764 = vmatpush3.msra.mxu1 %v4036_v20 }
0x2677   : > { %v4755_v10 = vpop.f32.mrb[26].mxu1 }
0x2678   : > { %v3861_v14 = vadd.f32 %v4755_v10, %v4346_v8  ;;  %v3855_v11 = vpop.f32.mrb[27].mxu1 }
0x2679   : > { %v3856_v34 = vadd.f32 %v4346_v8, %v3855_v11 }
0x267a   : > { %v3867_v25 = vsel %vm188_vm0, %v3861_v14, 0.0 }
0x267b   : > { %3868 = vadd.xlane.f32.xlu1 %v3867_v25  ;;  %v3864_v22 = vsel %vm188_vm0, %v3856_v34, 0.0  ;;  %v4354_v25 = vld [vmem:[#allocation4 + $0x310] ss:$0 sm:$0xff] }
0x267c   : > { %3865 = vadd.xlane.f32.xlu0 %v3864_v22 }
0x2708   : > { %v3869_v17 = vpop.xlane.xlu1 %3868 }
0x2709   : > { %v3871_v26 = vmul.f32 0.0625, %v3869_v17  ;;  %v3866_v6 = vpop.xlane.xlu0 %3865 }
0x270a   : > { %v3870_v27 = vmul.f32 0.0625, %v3866_v6 }
0x270b   : > { %v3873_v7 = vsub.f32 %v3861_v14, %v3871_v26  ;;  %v4355_v26 = vld [vmem:[#allocation4 + $0x318] ss:$0 sm:$0xff] }
0x270c   : > { %v3872_v59 = vsub.f32 %v3856_v34, %v3870_v27 }
0x270d   : > { %v3875_v29 = vmul.f32 %v3873_v7, %v3873_v7 }
0x270e   : > { %v3874_v30 = vmul.f32 %v3872_v59, %v3872_v59 }
0x270f   : > { %v3879_v31 = vsel %vm188_vm0, %v3875_v29, 0.0 }
0x2710   : > { %3880 = vadd.xlane.f32.xlu1 %v3879_v31  ;;  %v3876_v33 = vsel %vm188_vm0, %v3874_v30, 0.0  ;;  %v4356_v30 = vld [vmem:[#allocation4 + $0x328] ss:$0 sm:$0xff] }
0x2711   : > { %3877 = vadd.xlane.f32.xlu0 %v3876_v33 }
0x279d   : > { %v3881_v39 = vpop.xlane.xlu1 %3880 }
0x279e   : > { %v3883_v4 = vmul.f32 0.0625, %v3881_v39  ;;  %v3878_v40 = vpop.xlane.xlu0 %3877 }
0x279f   : > { %v3882_v32 = vmul.f32 0.0625, %v3878_v40 }
0x27a0   : > { %v3885_v41 = vadd.f32 1e-05, %v3883_v4 }
0x27a1   : > { %v3884_v42 = vadd.f32 1e-05, %v3882_v32 }
0x27a2   : > { %5132 = vrsqrt.f32 %v3885_v41 }
0x27a3   : > { %5134 = vrsqrt.f32 %v3884_v42 }
0x27ac   : > { %v5133_v37 = vpop.eup %5132 }
0x27ad   : > { %v5135_v44 = vpop.eup %5134  ;;  %v3889_v47 = vmul.f32 %v5133_v37, %v3873_v7 }
0x27ae   : > { %v3888_v48 = vmul.f32 %v5135_v44, %v3872_v59 }
0x27af   : > { %v3896_v50 = vmul.f32 %v4349_v43, %v3889_v47 }
0x27b0   : > { %v3895_v51 = vmul.f32 %v4349_v43, %v3888_v48 }
0x27b1   : > { %v3903_v52 = vadd.f32 %v4350_v49, %v3896_v50 }
0x27b2   : > { %v3902_v53 = vadd.f32 %v4350_v49, %v3895_v51 }
0x27b3   : > { %v3905_v55 = vmax.f32 %v3903_v52, 0.0 }
0x27b4   : > { %v3904_v54 = vmax.f32 %v3902_v53, 0.0 }
0x27b6   : > { %4760 = vmatprep.mubr.msk.f32.mxu0 %vm188_vm0, %v3904_v54 }
0x27b7   : > { %4761 = vmatmul.mubr.msk.f32.vlgmr.msra.gmra.mrb[32].mxu0 %vm188_vm0, %v3905_v55  ;;  %vm4123_vm0 = vcmp.eq.s32.totalorder %v5462_v63, 0 }
0x288a   : > { %v4762_v57 = vpop.f32.mrb[32].mxu0 }
0x288b   : > { %v3991_v58 = vadd.f32 %v4762_v57, %v4351_v56  ;;  %v3985_v45 = vpop.f32.mrb[33].mxu0 }
0x288c   : > { %v3986_v61 = vadd.f32 %v4351_v56, %v3985_v45 }
0x288d   : > { %v3997_v46 = vsel %vm2687_vm12, %v3991_v58, 0.0 }
0x288e   : > { %3998 = vadd.xlane.f32.xlu1 %v3997_v46  ;;  %v3994_v62 = vsel %vm2687_vm12, %v3986_v61, 0.0 }
0x288f   : > { %3995 = vadd.xlane.f32.xlu0 %v3994_v62 }
0x291b   : > { %v3999_v0 = vpop.xlane.xlu1 %3998 }
0x291c   : > { %v4001_v1 = vmul.f32 0.125, %v3999_v0  ;;  %v3996_v2 = vpop.xlane.xlu0 %3995 }
0x291d   : > { %v4000_v3 = vmul.f32 0.125, %v3996_v2 }
0x291e   : > { %v4003_v60 = vsub.f32 %v3991_v58, %v4001_v1 }
0x291f   : > { %v4002_v5 = vsub.f32 %v3986_v61, %v4000_v3 }
0x2920   : > { %v4005_v16 = vmul.f32 %v4003_v60, %v4003_v60 }
0x2921   : > { %v4004_v9 = vmul.f32 %v4002_v5, %v4002_v5 }
0x2922   : > { %v4009_v13 = vsel %vm2687_vm12, %v4005_v16, 0.0 }
0x2923   : > { %4010 = vadd.xlane.f32.xlu1 %v4009_v13  ;;  %v4006_v28 = vsel %vm2687_vm12, %v4004_v9, 0.0 }
0x2924   : > { %4007 = vadd.xlane.f32.xlu0 %v4006_v28 }
0x2934   : > { %4131 = vperm.xlu1 %5016, %v2815_v18  }
0x293a   : > { %4126 = vperm.xlu0 %5017, %v2810_v19  }
0x29b0   : > { %v4011_v21 = vpop.xlane.xlu1 %4010 }
0x29b1   : > { %v4013_v23 = vmul.f32 0.125, %v4011_v21  ;;  %v4008_v8 = vpop.xlane.xlu0 %4007 }
0x29b2   : > { %v4012_v10 = vmul.f32 0.125, %v4008_v8 }
0x29b3   : > { %v4015_v14 = vadd.f32 1e-05, %v4013_v23 }
0x29b4   : > { %v4014_v11 = vadd.f32 1e-05, %v4012_v10  ;;  %v4132_v39 = vpop.permute.xlu1 %4131 }
0x29b5   : > { %5136 = vrsqrt.f32 %v4015_v14 }
0x29b6   : > { %5138 = vrsqrt.f32 %v4014_v11 }
0x29b9   : > { %v4127_v38 = vpop.permute.xlu0 %4126 }
0x29bf   : > { %v5137_v34 = vpop.eup %5136 }
0x29c0   : > { %v5139_v22 = vpop.eup %5138  ;;  %v4019_v17 = vmul.f32 %v5137_v34, %v4003_v60 }
0x29c1   : > { %v4018_v15 = vmul.f32 %v5139_v22, %v4002_v5 }
0x29c2   : > { %v4026_v24 = vmul.f32 %v4354_v25, %v4019_v17 }
0x29c3   : > { %v4025_v6 = vmul.f32 %v4354_v25, %v4018_v15 }
0x29c4   : > { %v4033_v27 = vadd.f32 %v4355_v26, %v4026_v24 }
0x29c5   : > { %v4032_v7 = vadd.f32 %v4355_v26, %v4025_v6 }
0x29c6   : > { %v4035_v29 = vmax.f32 %v4033_v27, 0.0 }
0x29c7   : > { %v4034_v59 = vmax.f32 %v4032_v7, 0.0 }
0x29c9   : > { %4765 = vmatprep.mubr.msk.f32.mxu1 %vm2687_vm12, %v4034_v59 }
0x29ca   : > { %4766 = vmatmul.mubr.msk.f32.vlgmr.msra.gmra.mrb[28].mxu1 %vm2687_vm12, %v4035_v29 }
0x2a9d   : > { %v4767_v31 = vpop.f32.mrb[28].mxu1 }
0x2a9e   : > { %v4120_v33 = vadd.f32 %v4767_v31, %v4356_v30  ;;  %v4114_v35 = vpop.f32.mrb[29].mxu1 }
0x2a9f   : > { %v4115_v36 = vadd.f32 %v4356_v30, %v4114_v35 }
0x2aa0   : > { %4141 = vperm.xlu0 %5017, %v4120_v33  }
0x2aa1   : > { %4136 = vperm.xlu1 %5016, %v4115_v36  }
0x2b1f   : > { %v4142_v4 = vpop.permute.xlu0 %4141 }
0x2b20   : > { %v4145_v40 = vsel %vm4123_vm0, %v4132_v39, %v4142_v4  ;;  %v4137_v32 = vpop.permute.xlu1 %4136 }
0x2b21   : > { %4148 = vst.msk [vmem:[%s178_s25 + $0x8] sm:$0xff] %vm4146_vm1, %v4145_v40  ;;  %v4144_v41 = vsel %vm4123_vm0, %v4127_v38, %v4137_v32 }
0x2b22   : > { %4147 = vst.msk [vmem:[%s178_s25] sm:$0xff] %vm4146_vm1, %v4144_v41 }
0x2b23 PF: > { %p13_p1 = scmp.ge.s32.totalorder %s5313_s19, 4   ;;  %s5751_s9 = smov %s5228_s10 }
0x2b24   : > { %s5752_s10 = smov %s5232_s11  ;;  %s5753_s11 = smov %s5342_s6 }
0x2b25   : > { %s5754_s12 = smov %s5313_s19  ;;  %15 = sbr.rel (!%p13_p1) target bundleno = 4 (0x4), region = 72 }
0x2b2c   :  { %4170 = vsyncpa [#allocation3], 1 }
0x2b2d   :  { %4172 = vsyncpa [#allocation3 + $0x1], 1 }
0x2b2e   :  { %4173 = vsyncpa [#allocation5], 1 }

</bundles_post_ra>
